<compile_context>
chip_gen: v6e
topology: v6e:2x2x1
jax: 0.10.0
libtpu: 0.0.40
codegen_flags: <defaults>
</compile_context>

<pallas_src>
import functools

import jax
import jax.numpy as jnp
from jax import lax
from jax.experimental import pallas as pl
from jax.experimental.pallas import tpu as pltpu


# ----------------------------------------------------------------------------
# Pallas kernel: one grid step == U timesteps of the HyperLSTM recurrence for
# one batch chunk.  Gate order inside all 4*dim blocks is (i, f, o, j).
# ----------------------------------------------------------------------------
def hyperlstm_kernel(
    x_ref,                         # (U, Bc, D_in) raw input block
    w_x_ref,                       # (D_in, 4HH+4H) fused [hwx_x | wx]  (reordered)
    xb_ref,                        # (1, 4HH+4H)   hyper wh-bias (+fb) | zeros
    w_h_ref,                       # (H, 4HH+4H)   fused [hwx_h | wh]  (reordered)
    hwh_ref,                       # (HH, 4HH)     hyper-cell recurrent (reordered)
    w_d_ref,                       # (HH, 12H)     fused hypernet weight
    b_d_ref,                       # (1, 12H)      fused hypernet bias (+fb on f)
    h_ref, c_ref, hh_ref, hc_ref,  # outputs == resident recurrent state
    xp_ref,                        # scratch: (U, Bc, 4HH+4H) per-block x-projection
    *, U, T, H, HH):
  f32 = jnp.float32
  sig = jax.nn.sigmoid
  tb = pl.program_id(1)            # time-block index (serial "arbitrary" axis)
  B = h_ref.shape[0]               # batch-chunk size
  D_in = x_ref.shape[2]
  GW = w_x_ref.shape[1]
  G4H, G4HH = 4 * H, 4 * HH
  cdt = w_x_ref.dtype              # matmul operand dtype (f32 or bf16)

  @pl.when(tb == 0)
  def _():
    h_ref[...] = jnp.zeros_like(h_ref)
    c_ref[...] = jnp.zeros_like(c_ref)
    hh_ref[...] = jnp.zeros_like(hh_ref)
    hc_ref[...] = jnp.zeros_like(hc_ref)

  # ---- in-kernel x projection for all U timesteps of this block (off the serial
  #      chain): one MXU matmul + one bias add; hyper wh-bias & its forget_bias
  #      are already folded into xb.
  x_blk = x_ref[...].reshape(U * B, D_in).astype(cdt)
  xp = jnp.dot(x_blk, w_x_ref[...], preferred_element_type=f32).reshape(U, B, GW)
  xp_ref[...] = xp + jnp.broadcast_to(xb_ref[...], (U, B, GW))

  # Hoist weight loads / bias broadcast out of the unrolled timestep loop
  # (JAX does not CSE broadcast_in_dim).
  w_h = w_h_ref[...]
  hwh = hwh_ref[...]
  w_d = w_d_ref[...]
  b_d = jnp.broadcast_to(b_d_ref[...], (B, 3 * G4H))

  need_mask = (T % U) != 0   # static; only True when the last block is ragged

  def step(u, carry):
    h, c, hyper_h, hyper_c = carry
    xpu = xp_ref[u]                                                    # (B, GW)
    # Single fused matmul on the serial path: hyper-cell h-part + main-cell h-part.
    hp = jnp.dot(h.astype(cdt), w_h, preferred_element_type=f32)       # (B, GW)

    # ---- hyper LSTM cell (gate order i, f, o, j; biases pre-folded) ----
    hg = xpu[:, :G4HH] + hp[:, :G4HH] + jnp.dot(
        hyper_h.astype(cdt), hwh, preferred_element_type=f32)
    hs = sig(hg[:, :3 * HH])                 # one EUP pass over i|f|o
    hgj = jnp.tanh(hg[:, 3 * HH:])           # one EUP pass over j
    hyper_c_n = hyper_c * hs[:, HH:2 * HH] + hs[:, :HH] * hgj
    hyper_h_n = jnp.tanh(hyper_c_n) * hs[:, 2 * HH:]

    # ---- fused hypernetwork: ONE matmul -> [d_x | d_h | d_b], each (B, 4H)
    #      already replicated across the 4 gate blocks (the reference reuses the
    #      same d for all gates).  Main forget_bias is folded into b_d.
    d = jnp.dot(hyper_h_n.astype(cdt), w_d, preferred_element_type=f32) + b_d

    # ---- main LSTM gates, lane-dense on the full (B, 4H) slab ----
    gates = (xpu[:, G4HH:] * d[:, :G4H]
             + hp[:, G4HH:] * d[:, G4H:2 * G4H]
             + d[:, 2 * G4H:])
    gs = sig(gates[:, :3 * H])
    gj = jnp.tanh(gates[:, 3 * H:])
    c_n = c * gs[:, H:2 * H] + gs[:, :H] * gj
    h_n = jnp.tanh(c_n) * gs[:, 2 * H:]

    if need_mask:
      valid = (tb * U + u) < T
      h_n = jnp.where(valid, h_n, h)
      c_n = jnp.where(valid, c_n, c)
      hyper_h_n = jnp.where(valid, hyper_h_n, hyper_h)
      hyper_c_n = jnp.where(valid, hyper_c_n, hyper_c)
    return (h_n, c_n, hyper_h_n, hyper_c_n)

  carry0 = (h_ref[...], c_ref[...], hh_ref[...], hc_ref[...])
  h, c, hyper_h, hyper_c = lax.fori_loop(0, U, step, carry0, unroll=True)

  h_ref[...] = h
  c_ref[...] = c
  hh_ref[...] = hyper_h
  hc_ref[...] = hyper_c


# ----------------------------------------------------------------------------
# Wrapper: weight fusion / reordering / bias folding, grid setup, pallas_call.
# ----------------------------------------------------------------------------
def hyper_lstm_forward(x, params, *, forget_bias=1.0, unroll=8, batch_chunks=1,
                       compute_dtype=jnp.float32):
  T, B, D_in = x.shape
  H = params["wh_t"].shape[0]
  HH = params["hwh_t"].shape[0]
  f32 = jnp.float32
  G4H, G4HH = 4 * H, 4 * HH
  GW = G4HH + G4H

  assert B % batch_chunks == 0, "batch must divide evenly into batch_chunks"
  Bc = B // batch_chunks
  if batch_chunks > 1:
    # (8,128) rule: the block batch dim must be a sublane multiple when < B.
    assert Bc % 8 == 0, "per-chunk batch must be a multiple of 8"

  def reorder(w):
    # gate blocks along the last axis: (i, f, j, o) -> (i, f, o, j)
    i, f, j, o = jnp.split(w, 4, axis=-1)
    return jnp.concatenate([i, f, o, j], axis=-1)

  # ---- fused / reordered weights (computed once, outside the recurrence) ----
  w_x = jnp.concatenate([reorder(params["hwx_x_t"]), reorder(params["wx_t"])],
                        axis=1)                                        # (D_in, GW)
  w_h = jnp.concatenate([reorder(params["hwx_h_t"]), reorder(params["wh_t"])],
                        axis=1)                                        # (H, GW)
  hwh = reorder(params["hwh_t"])                                       # (HH, 4HH)

  # hyper-cell wh-bias + hyper forget_bias folded into the x-projection bias.
  hwh_b = reorder(params["hwh_b"])
  hwh_b = hwh_b.at[:, HH:2 * HH].add(forget_bias)                      # f gate
  xb = jnp.concatenate([hwh_b, jnp.zeros((1, G4H), f32)], axis=1)      # (1, GW)

  # Exact algebraic fusion of the hypernetwork (no nonlinearity between z and d):
  #   d_x = hh @ (whz_ix @ wzd_ix) + whz_ix_b @ wzd_ix   (same for d_h, d_b)
  # Each (HH, H) block is tiled x4 so d comes out already gate-replicated.
  def tile4(a):
    return jnp.tile(a, (1, 4))
  wdx = params["whz_ix_t"] @ params["wzd_ix_t"]
  wdh = params["whz_ih_t"] @ params["wzd_ih_t"]
  wdb = params["whz_ib_t"] @ params["wzd_ib_t"]
  w_d = jnp.concatenate([tile4(wdx), tile4(wdh), tile4(wdb)], axis=1)  # (HH, 12H)
  bdx = params["whz_ix_b"] @ params["wzd_ix_t"]
  bdh = params["whz_ih_b"] @ params["wzd_ih_t"]
  bdb = params["wzd_ib_b"]
  b_d = jnp.concatenate([tile4(bdx), tile4(bdh), tile4(bdb)], axis=1)  # (1, 12H)
  # main-cell forget_bias folded into the f-gate column of the d_b block
  b_d = b_d.at[:, 2 * G4H + H:2 * G4H + 2 * H].add(forget_bias)

  # Matmul operands in compute_dtype (bf16 on v6e/v7x for ~3x MXU rate and half
  # the resident weight VMEM); state / biases / nonlinearities stay f32.
  w_x = w_x.astype(compute_dtype)
  w_h = w_h.astype(compute_dtype)
  hwh = hwh.astype(compute_dtype)
  w_d = w_d.astype(compute_dtype)

  U = int(max(1, min(unroll, T)))
  n_blocks = pl.cdiv(T, U)
  T_pad = n_blocks * U
  x_in = x.astype(compute_dtype)
  if T_pad != T:
    x_in = jnp.pad(x_in, ((0, T_pad - T), (0, 0), (0, 0)))

  kernel = functools.partial(hyperlstm_kernel, U=U, T=T, H=H, HH=HH)

  # Constant weights: whole-array resident in VMEM, single-buffered.
  vmem_spec = pl.BlockSpec(memory_space=pltpu.MemorySpace.VMEM)
  weights = (w_x, xb, w_h, hwh, w_d, b_d)

  in_specs = [pl.BlockSpec((U, Bc, D_in), lambda bb, tb: (tb, bb, 0))]
  in_specs += [vmem_spec] * len(weights)

  out_shapes = (
      jax.ShapeDtypeStruct((B, H), f32),    # h
      jax.ShapeDtypeStruct((B, H), f32),    # c
      jax.ShapeDtypeStruct((B, HH), f32),   # hyper_h
      jax.ShapeDtypeStruct((B, HH), f32),   # hyper_c
  )
  out_specs = (
      pl.BlockSpec((Bc, H), lambda bb, tb: (bb, 0)),
      pl.BlockSpec((Bc, H), lambda bb, tb: (bb, 0)),
      pl.BlockSpec((Bc, HH), lambda bb, tb: (bb, 0)),
      pl.BlockSpec((Bc, HH), lambda bb, tb: (bb, 0)),
  )

  # VMEM budget from the actual resident footprint (2x margin for pipeline /
  # loop temporaries), capped below v7x's 64 MiB physical VMEM.
  est = (sum(int(w.size) * w.dtype.itemsize for w in (w_x, w_h, hwh, w_d))
         + (int(xb.size) + int(b_d.size)) * 4
         + U * Bc * GW * 4                       # xp scratch
         + 2 * U * Bc * D_in * x_in.dtype.itemsize  # double-buffered x block
         + 2 * Bc * (2 * H + 2 * HH) * 4)        # resident state outputs
  vmem_limit = int(min(max(2 * est, 32 * 2**20), 56 * 2**20))

  h, c, hyper_h, hyper_c = pl.pallas_call(
      kernel,
      out_shape=out_shapes,
      grid_spec=pltpu.PrefetchScalarGridSpec(
          num_scalar_prefetch=0,
          grid=(batch_chunks, n_blocks),
          in_specs=in_specs,
          out_specs=out_specs,
          scratch_shapes=[pltpu.VMEM((U, Bc, GW), f32)],
      ),
      compiler_params=pltpu.CompilerParams(
          # batch chunks are independent recurrences (uses v7x's 2nd TensorCore);
          # the time-chunk axis is a serial recurrence -> "arbitrary".
          dimension_semantics=("parallel", "arbitrary"),
          vmem_limit_bytes=vmem_limit,
      ),
  )(x_in, *weights)

  # Same return structure as the PyTorch module (final states only).
  return h, ((h, c), (hyper_h, hyper_c))


# ----------------------------------------------------------------------------
# Deterministic parameter initialization (mirrors HyperLSTM.reset_parameters).
# ----------------------------------------------------------------------------
def init_hyper_lstm_params(key, input_dim, hidden_dim, hyper_hidden_dim,
                           hyper_embedding_dim):
  D_in, H, HH, E = input_dim, hidden_dim, hyper_hidden_dim, hyper_embedding_dim
  ks = jax.random.split(key, 4)

  def orthogonal(k, out_dim, in_dim):
    a = jax.random.normal(k, (out_dim, in_dim), jnp.float32)
    q, r = jnp.linalg.qr(a)
    q = q * jnp.sign(jnp.diagonal(r))[None, :]
    return q  # (out_dim, in_dim)

  p = {}
  # hyper LSTM cell: wx (no bias), wh (bias=0); input = concat(x, h)
  hwx = orthogonal(ks[0], 4 * HH, D_in + H)              # (4HH, D_in+H)
  hwx_t = hwx.T                                          # (D_in+H, 4HH)
  p["hwx_x_t"] = hwx_t[:D_in]                            # (D_in, 4HH)
  p["hwx_h_t"] = hwx_t[D_in:]                            # (H,    4HH)
  p["hwh_t"] = orthogonal(ks[1], 4 * HH, HH).T           # (HH, 4HH)
  p["hwh_b"] = jnp.zeros((1, 4 * HH), jnp.float32)

  # hyper projections (weights 0 / bias 1 for ix & ih; normal(0, 0.01) for ib)
  p["whz_ix_t"] = jnp.zeros((HH, E), jnp.float32)
  p["whz_ix_b"] = jnp.ones((1, E), jnp.float32)
  p["whz_ih_t"] = jnp.zeros((HH, E), jnp.float32)
  p["whz_ih_b"] = jnp.ones((1, E), jnp.float32)
  p["whz_ib_t"] = (0.01 * jax.random.normal(ks[2], (E, HH), jnp.float32)).T

  p["wzd_ix_t"] = jnp.full((E, H), 0.1 / E, jnp.float32)
  p["wzd_ih_t"] = jnp.full((E, H), 0.1 / E, jnp.float32)
  p["wzd_ib_t"] = jnp.zeros((E, H), jnp.float32)
  p["wzd_ib_b"] = jnp.zeros((1, H), jnp.float32)

  # main LSTM (no biases)
  p["wx_t"] = orthogonal(ks[3], 4 * H, D_in).T           # (D_in, 4H)
  p["wh_t"] = orthogonal(jax.random.fold_in(ks[3], 1), 4 * H, H).T  # (H, 4H)
  return p


# ----------------------------------------------------------------------------
# Pure-JAX reference (unfused, HIGHEST precision) for a sanity check.
# ----------------------------------------------------------------------------
def reference_forward(x, p, forget_bias=1.0):
  T, B, _ = x.shape
  H = p["wh_t"].shape[0]
  HH = p["hwh_t"].shape[0]
  dot = lambda a, b: jnp.dot(a, b, precision=lax.Precision.HIGHEST)
  sig = jax.nn.sigmoid

  h = jnp.zeros((B, H)); c = jnp.zeros((B, H))
  hh = jnp.zeros((B, HH)); hc = jnp.zeros((B, HH))
  for t in range(T):
    xt = x[t]
    g = dot(xt, p["hwx_x_t"]) + dot(h, p["hwx_h_t"]) + dot(hh, p["hwh_t"]) + p["hwh_b"]
    hi, hf, hj, ho = jnp.split(g, 4, axis=1)
    hc = hc * sig(hf + forget_bias) + sig(hi) * jnp.tanh(hj)
    hh = jnp.tanh(hc) * sig(ho)

    d_x = dot(dot(hh, p["whz_ix_t"]) + p["whz_ix_b"], p["wzd_ix_t"])
    d_h = dot(dot(hh, p["whz_ih_t"]) + p["whz_ih_b"], p["wzd_ih_t"])
    d_b = dot(dot(hh, p["whz_ib_t"]), p["wzd_ib_t"]) + p["wzd_ib_b"]

    gx = dot(xt, p["wx_t"]); gh = dot(h, p["wh_t"])
    ix, fx, jx, ox = jnp.split(gx, 4, axis=1)
    ih, fh, jh, oh = jnp.split(gh, 4, axis=1)
    i = ix * d_x + ih * d_h + d_b
    f = fx * d_x + fh * d_h + d_b
    j = jx * d_x + jh * d_h + d_b
    o = ox * d_x + oh * d_h + d_b
    c = c * sig(f + forget_bias) + sig(i) * jnp.tanh(j)
    h = jnp.tanh(c) * sig(o)
  return h, c, hh, hc


if __name__ == "__main__":
  # Small shapes consistent with the module's forward signature.
  SEQ, BATCH = 8, 4
  INPUT_DIM, HIDDEN_DIM = 16, 32
  HYPER_HIDDEN_DIM, HYPER_EMBED_DIM = 128, 32

  key = jax.random.PRNGKey(0)
  k_x, k_p = jax.random.split(key)
  x = jax.random.normal(k_x, (SEQ, BATCH, INPUT_DIM), jnp.float32)
  params = init_hyper_lstm_params(k_p, INPUT_DIM, HIDDEN_DIM,
                                  HYPER_HIDDEN_DIM, HYPER_EMBED_DIM)

  # unroll=4 -> 2 time blocks: exercises resident state across grid steps.
  # (On v6e/v7x, pass compute_dtype=jnp.bfloat16 and batch_chunks=2 for perf.)
  out_h, ((h, c), (hyper_h, hyper_c)) = jax.block_until_ready(
      hyper_lstm_forward(x, params, forget_bias=1.0, unroll=4, batch_chunks=1))

  # sanity check against pure-JAX reference (loose tolerance: MXU f32 passes).
  rh, rc, rhh, rhc = reference_forward(x, params, forget_bias=1.0)
  for a, b in ((h, rh), (c, rc), (hyper_h, rhh), (hyper_c, rhc)):
    assert a.shape == b.shape and bool(jnp.all(jnp.isfinite(a)))
    assert float(jnp.max(jnp.abs(a - b))) < 3e-2, float(jnp.max(jnp.abs(a - b)))

  print("KERNEL_OK")
</pallas_src>

<mosaic_0001>
module attributes {stable_mosaic.version = 11 : i64} {
  func.func @hyperlstm_kernel(%arg0: i32, %arg1: i32, %arg2: memref<4x4x16xf32, #tpu.memory_space<vmem>>, %arg3: memref<16x640xf32, #tpu.memory_space<vmem>>, %arg4: memref<1x640xf32, #tpu.memory_space<vmem>>, %arg5: memref<32x640xf32, #tpu.memory_space<vmem>>, %arg6: memref<128x512xf32, #tpu.memory_space<vmem>>, %arg7: memref<128x384xf32, #tpu.memory_space<vmem>>, %arg8: memref<1x384xf32, #tpu.memory_space<vmem>>, %arg9: memref<4x32xf32, #tpu.memory_space<vmem>>, %arg10: memref<4x32xf32, #tpu.memory_space<vmem>>, %arg11: memref<4x128xf32, #tpu.memory_space<vmem>>, %arg12: memref<4x128xf32, #tpu.memory_space<vmem>>, %arg13: memref<4x4x640xf32, #tpu.memory_space<vmem>>) attributes {dimension_semantics = [#tpu.dimension_semantics<parallel>, #tpu.dimension_semantics<arbitrary>], iteration_bounds = array<i64: 1, 2>, scalar_prefetch = 0 : i64, scratch_operands = 1 : i64, tpu.core_type = #tpu.core_type<tc>, window_params = [{transform_indices = @transform_0, window_bounds = array<i64: 4, 4, 16>}, {pipeline_mode = #tpu.pipeline_mode<synchronous>, transform_indices = @transform_1, window_bounds = array<i64: 16, 640>}, {pipeline_mode = #tpu.pipeline_mode<synchronous>, transform_indices = @transform_2, window_bounds = array<i64: 1, 640>}, {pipeline_mode = #tpu.pipeline_mode<synchronous>, transform_indices = @transform_3, window_bounds = array<i64: 32, 640>}, {pipeline_mode = #tpu.pipeline_mode<synchronous>, transform_indices = @transform_4, window_bounds = array<i64: 128, 512>}, {pipeline_mode = #tpu.pipeline_mode<synchronous>, transform_indices = @transform_5, window_bounds = array<i64: 128, 384>}, {pipeline_mode = #tpu.pipeline_mode<synchronous>, transform_indices = @transform_6, window_bounds = array<i64: 1, 384>}, {transform_indices = @transform_7, window_bounds = array<i64: 4, 32>}, {transform_indices = @transform_8, window_bounds = array<i64: 4, 32>}, {transform_indices = @transform_9, window_bounds = array<i64: 4, 128>}, {transform_indices = @transform_10, window_bounds = array<i64: 4, 128>}]} {
    %c0_i32 = arith.constant 0 : i32
    %0 = arith.cmpi eq, %arg1, %c0_i32 : i32
    %1 = arith.extui %0 : i1 to i32
    %c0_i32_0 = arith.constant 0 : i32
    %2 = arith.cmpi ne, %1, %c0_i32_0 : i32
    scf.if %2 {
      %cst_63 = arith.constant 0.000000e+00 : f32
      %235 = vector.broadcast %cst_63 : f32 to vector<4x32xf32>
      %c0_64 = arith.constant 0 : index
      %c0_65 = arith.constant 0 : index
      %236 = vector.load %arg9[%c0_64, %c0_65] : memref<4x32xf32, #tpu.memory_space<vmem>>, vector<4x32xf32>
      tpu.vector_store %arg9[%c0_64, %c0_65], %235 {strides = array<i32>} : memref<4x32xf32, #tpu.memory_space<vmem>>, vector<4x32xf32>,
      %cst_66 = arith.constant 0.000000e+00 : f32
      %237 = vector.broadcast %cst_66 : f32 to vector<4x32xf32>
      %c0_67 = arith.constant 0 : index
      %c0_68 = arith.constant 0 : index
      %238 = vector.load %arg10[%c0_67, %c0_68] : memref<4x32xf32, #tpu.memory_space<vmem>>, vector<4x32xf32>
      tpu.vector_store %arg10[%c0_67, %c0_68], %237 {strides = array<i32>} : memref<4x32xf32, #tpu.memory_space<vmem>>, vector<4x32xf32>,
      %cst_69 = arith.constant 0.000000e+00 : f32
      %239 = vector.broadcast %cst_69 : f32 to vector<4x128xf32>
      %c0_70 = arith.constant 0 : index
      %c0_71 = arith.constant 0 : index
      %240 = vector.load %arg11[%c0_70, %c0_71] : memref<4x128xf32, #tpu.memory_space<vmem>>, vector<4x128xf32>
      tpu.vector_store %arg11[%c0_70, %c0_71], %239 {strides = array<i32>} : memref<4x128xf32, #tpu.memory_space<vmem>>, vector<4x128xf32>,
      %cst_72 = arith.constant 0.000000e+00 : f32
      %241 = vector.broadcast %cst_72 : f32 to vector<4x128xf32>
      %c0_73 = arith.constant 0 : index
      %c0_74 = arith.constant 0 : index
      %242 = vector.load %arg12[%c0_73, %c0_74] : memref<4x128xf32, #tpu.memory_space<vmem>>, vector<4x128xf32>
      tpu.vector_store %arg12[%c0_73, %c0_74], %241 {strides = array<i32>} : memref<4x128xf32, #tpu.memory_space<vmem>>, vector<4x128xf32>,
    } else {
    }
    %c0 = arith.constant 0 : index
    %c0_1 = arith.constant 0 : index
    %c0_2 = arith.constant 0 : index
    %3 = vector.load %arg2[%c0, %c0_1, %c0_2] : memref<4x4x16xf32, #tpu.memory_space<vmem>>, vector<4x4x16xf32>
    %4 = vector.shape_cast %3 : vector<4x4x16xf32> to vector<16x16xf32>
    %c0_3 = arith.constant 0 : index
    %c0_4 = arith.constant 0 : index
    %5 = vector.load %arg3[%c0_3, %c0_4] : memref<16x640xf32, #tpu.memory_space<vmem>>, vector<16x640xf32>
    %cst = arith.constant dense<0.000000e+00> : vector<16x640xf32>
    %6 = tpu.matmul %4, %5, %cst {dimension_numbers = #tpu.dot_dimension_numbers<[1], [0], [0], [1], [0, 0, 1, 1], [], []>} : vector<16x16xf32>, vector<16x640xf32>, vector<16x640xf32> -> vector<16x640xf32>
    %7 = vector.shape_cast %6 : vector<16x640xf32> to vector<4x4x640xf32>
    %c0_5 = arith.constant 0 : index
    %c0_6 = arith.constant 0 : index
    %8 = vector.load %arg4[%c0_5, %c0_6] : memref<1x640xf32, #tpu.memory_space<vmem>>, vector<1x640xf32>
    %9 = vector.shape_cast %8 : vector<1x640xf32> to vector<1x1x640xf32>
    %10 = vector.broadcast %9 : vector<1x1x640xf32> to vector<4x4x640xf32>
    %11 = arith.addf %7, %10 : vector<4x4x640xf32>
    %c0_7 = arith.constant 0 : index
    %c0_8 = arith.constant 0 : index
    %c0_9 = arith.constant 0 : index
    %12 = vector.load %arg13[%c0_7, %c0_8, %c0_9] : memref<4x4x640xf32, #tpu.memory_space<vmem>>, vector<4x4x640xf32>
    tpu.vector_store %arg13[%c0_7, %c0_8, %c0_9], %11 {strides = array<i32>} : memref<4x4x640xf32, #tpu.memory_space<vmem>>, vector<4x4x640xf32>,
    %c0_10 = arith.constant 0 : index
    %c0_11 = arith.constant 0 : index
    %13 = vector.load %arg5[%c0_10, %c0_11] : memref<32x640xf32, #tpu.memory_space<vmem>>, vector<32x640xf32>
    %c0_12 = arith.constant 0 : index
    %c0_13 = arith.constant 0 : index
    %14 = vector.load %arg6[%c0_12, %c0_13] : memref<128x512xf32, #tpu.memory_space<vmem>>, vector<128x512xf32>
    %c0_14 = arith.constant 0 : index
    %c0_15 = arith.constant 0 : index
    %15 = vector.load %arg7[%c0_14, %c0_15] : memref<128x384xf32, #tpu.memory_space<vmem>>, vector<128x384xf32>
    %c0_16 = arith.constant 0 : index
    %c0_17 = arith.constant 0 : index
    %16 = vector.load %arg8[%c0_16, %c0_17] : memref<1x384xf32, #tpu.memory_space<vmem>>, vector<1x384xf32>
    %17 = vector.shape_cast %16 : vector<1x384xf32> to vector<1x384xf32>
    %18 = vector.broadcast %17 : vector<1x384xf32> to vector<4x384xf32>
    %c0_18 = arith.constant 0 : index
    %c0_19 = arith.constant 0 : index
    %19 = vector.load %arg9[%c0_18, %c0_19] : memref<4x32xf32, #tpu.memory_space<vmem>>, vector<4x32xf32>
    %c0_20 = arith.constant 0 : index
    %c0_21 = arith.constant 0 : index
    %20 = vector.load %arg10[%c0_20, %c0_21] : memref<4x32xf32, #tpu.memory_space<vmem>>, vector<4x32xf32>
    %c0_22 = arith.constant 0 : index
    %c0_23 = arith.constant 0 : index
    %21 = vector.load %arg11[%c0_22, %c0_23] : memref<4x128xf32, #tpu.memory_space<vmem>>, vector<4x128xf32>
    %c0_24 = arith.constant 0 : index
    %c0_25 = arith.constant 0 : index
    %22 = vector.load %arg12[%c0_24, %c0_25] : memref<4x128xf32, #tpu.memory_space<vmem>>, vector<4x128xf32>
    %c0_i32_26 = arith.constant 0 : i32
    %23 = arith.index_cast %c0_i32_26 : i32 to index
    %c0_27 = arith.constant 0 : index
    %c0_28 = arith.constant 0 : index
    %24 = vector.load %arg13[%23, %c0_27, %c0_28] : memref<4x4x640xf32, #tpu.memory_space<vmem>>, vector<1x4x640xf32>
    %25 = vector.shape_cast %24 : vector<1x4x640xf32> to vector<4x640xf32>
    %cst_29 = arith.constant dense<0.000000e+00> : vector<4x640xf32>
    %26 = tpu.matmul %19, %13, %cst_29 {dimension_numbers = #tpu.dot_dimension_numbers<[1], [0], [0], [1], [0, 0, 1, 1], [], []>} : vector<4x32xf32>, vector<32x640xf32>, vector<4x640xf32> -> vector<4x640xf32>
    %27 = vector.extract_strided_slice %25 {offsets = [0, 0], sizes = [4, 512], strides = [1, 1]} : vector<4x640xf32> to vector<4x512xf32>
    %28 = vector.extract_strided_slice %26 {offsets = [0, 0], sizes = [4, 512], strides = [1, 1]} : vector<4x640xf32> to vector<4x512xf32>
    %29 = arith.addf %27, %28 : vector<4x512xf32>
    %cst_30 = arith.constant dense<0.000000e+00> : vector<4x512xf32>
    %30 = tpu.matmul %21, %14, %cst_30 {dimension_numbers = #tpu.dot_dimension_numbers<[1], [0], [0], [1], [0, 0, 1, 1], [], []>} : vector<4x128xf32>, vector<128x512xf32>, vector<4x512xf32> -> vector<4x512xf32>
    %31 = arith.addf %29, %30 : vector<4x512xf32>
    %32 = vector.extract_strided_slice %31 {offsets = [0, 0], sizes = [4, 384], strides = [1, 1]} : vector<4x512xf32> to vector<4x384xf32>
    %33 = arith.negf %32 : vector<4x384xf32>
    %34 = math.exp %33 : vector<4x384xf32>
    %cst_31 = arith.constant 1.000000e+00 : f32
    %35 = vector.broadcast %cst_31 : f32 to vector<4x384xf32>
    %36 = arith.addf %35, %34 : vector<4x384xf32>
    %37 = arith.divf %35, %36 : vector<4x384xf32>
    %38 = vector.extract_strided_slice %31 {offsets = [0, 384], sizes = [4, 128], strides = [1, 1]} : vector<4x512xf32> to vector<4x128xf32>
    %39 = math.tanh %38 : vector<4x128xf32>
    %40 = vector.extract_strided_slice %37 {offsets = [0, 128], sizes = [4, 128], strides = [1, 1]} : vector<4x384xf32> to vector<4x128xf32>
    %41 = arith.mulf %22, %40 : vector<4x128xf32>
    %42 = vector.extract_strided_slice %37 {offsets = [0, 0], sizes = [4, 128], strides = [1, 1]} : vector<4x384xf32> to vector<4x128xf32>
    %43 = arith.mulf %42, %39 : vector<4x128xf32>
    %44 = arith.addf %41, %43 : vector<4x128xf32>
    %45 = math.tanh %44 : vector<4x128xf32>
    %46 = vector.extract_strided_slice %37 {offsets = [0, 256], sizes = [4, 128], strides = [1, 1]} : vector<4x384xf32> to vector<4x128xf32>
    %47 = arith.mulf %45, %46 : vector<4x128xf32>
    %cst_32 = arith.constant dense<0.000000e+00> : vector<4x384xf32>
    %48 = tpu.matmul %47, %15, %cst_32 {dimension_numbers = #tpu.dot_dimension_numbers<[1], [0], [0], [1], [0, 0, 1, 1], [], []>} : vector<4x128xf32>, vector<128x384xf32>, vector<4x384xf32> -> vector<4x384xf32>
    %49 = arith.addf %48, %18 : vector<4x384xf32>
    %50 = vector.extract_strided_slice %25 {offsets = [0, 512], sizes = [4, 128], strides = [1, 1]} : vector<4x640xf32> to vector<4x128xf32>
    %51 = vector.extract_strided_slice %49 {offsets = [0, 0], sizes = [4, 128], strides = [1, 1]} : vector<4x384xf32> to vector<4x128xf32>
    %52 = arith.mulf %50, %51 : vector<4x128xf32>
    %53 = vector.extract_strided_slice %26 {offsets = [0, 512], sizes = [4, 128], strides = [1, 1]} : vector<4x640xf32> to vector<4x128xf32>
    %54 = vector.extract_strided_slice %49 {offsets = [0, 128], sizes = [4, 128], strides = [1, 1]} : vector<4x384xf32> to vector<4x128xf32>
    %55 = arith.mulf %53, %54 : vector<4x128xf32>
    %56 = arith.addf %52, %55 : vector<4x128xf32>
    %57 = vector.extract_strided_slice %49 {offsets = [0, 256], sizes = [4, 128], strides = [1, 1]} : vector<4x384xf32> to vector<4x128xf32>
    %58 = arith.addf %56, %57 : vector<4x128xf32>
    %59 = vector.extract_strided_slice %58 {offsets = [0, 0], sizes = [4, 96], strides = [1, 1]} : vector<4x128xf32> to vector<4x96xf32>
    %60 = arith.negf %59 : vector<4x96xf32>
    %61 = math.exp %60 : vector<4x96xf32>
    %cst_33 = arith.constant 1.000000e+00 : f32
    %62 = vector.broadcast %cst_33 : f32 to vector<4x96xf32>
    %63 = arith.addf %62, %61 : vector<4x96xf32>
    %64 = arith.divf %62, %63 : vector<4x96xf32>
    %65 = vector.extract_strided_slice %58 {offsets = [0, 96], sizes = [4, 32], strides = [1, 1]} : vector<4x128xf32> to vector<4x32xf32>
    %66 = math.tanh %65 : vector<4x32xf32>
    %67 = vector.extract_strided_slice %64 {offsets = [0, 32], sizes = [4, 32], strides = [1, 1]} : vector<4x96xf32> to vector<4x32xf32>
    %68 = arith.mulf %20, %67 : vector<4x32xf32>
    %69 = vector.extract_strided_slice %64 {offsets = [0, 0], sizes = [4, 32], strides = [1, 1]} : vector<4x96xf32> to vector<4x32xf32>
    %70 = arith.mulf %69, %66 : vector<4x32xf32>
    %71 = arith.addf %68, %70 : vector<4x32xf32>
    %72 = math.tanh %71 : vector<4x32xf32>
    %73 = vector.extract_strided_slice %64 {offsets = [0, 64], sizes = [4, 32], strides = [1, 1]} : vector<4x96xf32> to vector<4x32xf32>
    %74 = arith.mulf %72, %73 : vector<4x32xf32>
    %c1_i32 = arith.constant 1 : i32
    %75 = arith.index_cast %c1_i32 : i32 to index
    %c0_34 = arith.constant 0 : index
    %c0_35 = arith.constant 0 : index
    %76 = vector.load %arg13[%75, %c0_34, %c0_35] : memref<4x4x640xf32, #tpu.memory_space<vmem>>, vector<1x4x640xf32>
    %77 = vector.shape_cast %76 : vector<1x4x640xf32> to vector<4x640xf32>
    %cst_36 = arith.constant dense<0.000000e+00> : vector<4x640xf32>
    %78 = tpu.matmul %74, %13, %cst_36 {dimension_numbers = #tpu.dot_dimension_numbers<[1], [0], [0], [1], [0, 0, 1, 1], [], []>} : vector<4x32xf32>, vector<32x640xf32>, vector<4x640xf32> -> vector<4x640xf32>
    %79 = vector.extract_strided_slice %77 {offsets = [0, 0], sizes = [4, 512], strides = [1, 1]} : vector<4x640xf32> to vector<4x512xf32>
    %80 = vector.extract_strided_slice %78 {offsets = [0, 0], sizes = [4, 512], strides = [1, 1]} : vector<4x640xf32> to vector<4x512xf32>
    %81 = arith.addf %79, %80 : vector<4x512xf32>
    %cst_37 = arith.constant dense<0.000000e+00> : vector<4x512xf32>
    %82 = tpu.matmul %47, %14, %cst_37 {dimension_numbers = #tpu.dot_dimension_numbers<[1], [0], [0], [1], [0, 0, 1, 1], [], []>} : vector<4x128xf32>, vector<128x512xf32>, vector<4x512xf32> -> vector<4x512xf32>
    %83 = arith.addf %81, %82 : vector<4x512xf32>
    %84 = vector.extract_strided_slice %83 {offsets = [0, 0], sizes = [4, 384], strides = [1, 1]} : vector<4x512xf32> to vector<4x384xf32>
    %85 = arith.negf %84 : vector<4x384xf32>
    %86 = math.exp %85 : vector<4x384xf32>
    %cst_38 = arith.constant 1.000000e+00 : f32
    %87 = vector.broadcast %cst_38 : f32 to vector<4x384xf32>
    %88 = arith.addf %87, %86 : vector<4x384xf32>
    %89 = arith.divf %87, %88 : vector<4x384xf32>
    %90 = vector.extract_strided_slice %83 {offsets = [0, 384], sizes = [4, 128], strides = [1, 1]} : vector<4x512xf32> to vector<4x128xf32>
    %91 = math.tanh %90 : vector<4x128xf32>
    %92 = vector.extract_strided_slice %89 {offsets = [0, 128], sizes = [4, 128], strides = [1, 1]} : vector<4x384xf32> to vector<4x128xf32>
    %93 = arith.mulf %44, %92 : vector<4x128xf32>
    %94 = vector.extract_strided_slice %89 {offsets = [0, 0], sizes = [4, 128], strides = [1, 1]} : vector<4x384xf32> to vector<4x128xf32>
    %95 = arith.mulf %94, %91 : vector<4x128xf32>
    %96 = arith.addf %93, %95 : vector<4x128xf32>
    %97 = math.tanh %96 : vector<4x128xf32>
    %98 = vector.extract_strided_slice %89 {offsets = [0, 256], sizes = [4, 128], strides = [1, 1]} : vector<4x384xf32> to vector<4x128xf32>
    %99 = arith.mulf %97, %98 : vector<4x128xf32>
    %cst_39 = arith.constant dense<0.000000e+00> : vector<4x384xf32>
    %100 = tpu.matmul %99, %15, %cst_39 {dimension_numbers = #tpu.dot_dimension_numbers<[1], [0], [0], [1], [0, 0, 1, 1], [], []>} : vector<4x128xf32>, vector<128x384xf32>, vector<4x384xf32> -> vector<4x384xf32>
    %101 = arith.addf %100, %18 : vector<4x384xf32>
    %102 = vector.extract_strided_slice %77 {offsets = [0, 512], sizes = [4, 128], strides = [1, 1]} : vector<4x640xf32> to vector<4x128xf32>
    %103 = vector.extract_strided_slice %101 {offsets = [0, 0], sizes = [4, 128], strides = [1, 1]} : vector<4x384xf32> to vector<4x128xf32>
    %104 = arith.mulf %102, %103 : vector<4x128xf32>
    %105 = vector.extract_strided_slice %78 {offsets = [0, 512], sizes = [4, 128], strides = [1, 1]} : vector<4x640xf32> to vector<4x128xf32>
    %106 = vector.extract_strided_slice %101 {offsets = [0, 128], sizes = [4, 128], strides = [1, 1]} : vector<4x384xf32> to vector<4x128xf32>
    %107 = arith.mulf %105, %106 : vector<4x128xf32>
    %108 = arith.addf %104, %107 : vector<4x128xf32>
    %109 = vector.extract_strided_slice %101 {offsets = [0, 256], sizes = [4, 128], strides = [1, 1]} : vector<4x384xf32> to vector<4x128xf32>
    %110 = arith.addf %108, %109 : vector<4x128xf32>
    %111 = vector.extract_strided_slice %110 {offsets = [0, 0], sizes = [4, 96], strides = [1, 1]} : vector<4x128xf32> to vector<4x96xf32>
    %112 = arith.negf %111 : vector<4x96xf32>
    %113 = math.exp %112 : vector<4x96xf32>
    %cst_40 = arith.constant 1.000000e+00 : f32
    %114 = vector.broadcast %cst_40 : f32 to vector<4x96xf32>
    %115 = arith.addf %114, %113 : vector<4x96xf32>
    %116 = arith.divf %114, %115 : vector<4x96xf32>
    %117 = vector.extract_strided_slice %110 {offsets = [0, 96], sizes = [4, 32], strides = [1, 1]} : vector<4x128xf32> to vector<4x32xf32>
    %118 = math.tanh %117 : vector<4x32xf32>
    %119 = vector.extract_strided_slice %116 {offsets = [0, 32], sizes = [4, 32], strides = [1, 1]} : vector<4x96xf32> to vector<4x32xf32>
    %120 = arith.mulf %71, %119 : vector<4x32xf32>
    %121 = vector.extract_strided_slice %116 {offsets = [0, 0], sizes = [4, 32], strides = [1, 1]} : vector<4x96xf32> to vector<4x32xf32>
    %122 = arith.mulf %121, %118 : vector<4x32xf32>
    %123 = arith.addf %120, %122 : vector<4x32xf32>
    %124 = math.tanh %123 : vector<4x32xf32>
    %125 = vector.extract_strided_slice %116 {offsets = [0, 64], sizes = [4, 32], strides = [1, 1]} : vector<4x96xf32> to vector<4x32xf32>
    %126 = arith.mulf %124, %125 : vector<4x32xf32>
    %c2_i32 = arith.constant 2 : i32
    %127 = arith.index_cast %c2_i32 : i32 to index
    %c0_41 = arith.constant 0 : index
    %c0_42 = arith.constant 0 : index
    %128 = vector.load %arg13[%127, %c0_41, %c0_42] : memref<4x4x640xf32, #tpu.memory_space<vmem>>, vector<1x4x640xf32>
    %129 = vector.shape_cast %128 : vector<1x4x640xf32> to vector<4x640xf32>
    %cst_43 = arith.constant dense<0.000000e+00> : vector<4x640xf32>
    %130 = tpu.matmul %126, %13, %cst_43 {dimension_numbers = #tpu.dot_dimension_numbers<[1], [0], [0], [1], [0, 0, 1, 1], [], []>} : vector<4x32xf32>, vector<32x640xf32>, vector<4x640xf32> -> vector<4x640xf32>
    %131 = vector.extract_strided_slice %129 {offsets = [0, 0], sizes = [4, 512], strides = [1, 1]} : vector<4x640xf32> to vector<4x512xf32>
    %132 = vector.extract_strided_slice %130 {offsets = [0, 0], sizes = [4, 512], strides = [1, 1]} : vector<4x640xf32> to vector<4x512xf32>
    %133 = arith.addf %131, %132 : vector<4x512xf32>
    %cst_44 = arith.constant dense<0.000000e+00> : vector<4x512xf32>
    %134 = tpu.matmul %99, %14, %cst_44 {dimension_numbers = #tpu.dot_dimension_numbers<[1], [0], [0], [1], [0, 0, 1, 1], [], []>} : vector<4x128xf32>, vector<128x512xf32>, vector<4x512xf32> -> vector<4x512xf32>
    %135 = arith.addf %133, %134 : vector<4x512xf32>
    %136 = vector.extract_strided_slice %135 {offsets = [0, 0], sizes = [4, 384], strides = [1, 1]} : vector<4x512xf32> to vector<4x384xf32>
    %137 = arith.negf %136 : vector<4x384xf32>
    %138 = math.exp %137 : vector<4x384xf32>
    %cst_45 = arith.constant 1.000000e+00 : f32
    %139 = vector.broadcast %cst_45 : f32 to vector<4x384xf32>
    %140 = arith.addf %139, %138 : vector<4x384xf32>
    %141 = arith.divf %139, %140 : vector<4x384xf32>
    %142 = vector.extract_strided_slice %135 {offsets = [0, 384], sizes = [4, 128], strides = [1, 1]} : vector<4x512xf32> to vector<4x128xf32>
    %143 = math.tanh %142 : vector<4x128xf32>
    %144 = vector.extract_strided_slice %141 {offsets = [0, 128], sizes = [4, 128], strides = [1, 1]} : vector<4x384xf32> to vector<4x128xf32>
    %145 = arith.mulf %96, %144 : vector<4x128xf32>
    %146 = vector.extract_strided_slice %141 {offsets = [0, 0], sizes = [4, 128], strides = [1, 1]} : vector<4x384xf32> to vector<4x128xf32>
    %147 = arith.mulf %146, %143 : vector<4x128xf32>
    %148 = arith.addf %145, %147 : vector<4x128xf32>
    %149 = math.tanh %148 : vector<4x128xf32>
    %150 = vector.extract_strided_slice %141 {offsets = [0, 256], sizes = [4, 128], strides = [1, 1]} : vector<4x384xf32> to vector<4x128xf32>
    %151 = arith.mulf %149, %150 : vector<4x128xf32>
    %cst_46 = arith.constant dense<0.000000e+00> : vector<4x384xf32>
    %152 = tpu.matmul %151, %15, %cst_46 {dimension_numbers = #tpu.dot_dimension_numbers<[1], [0], [0], [1], [0, 0, 1, 1], [], []>} : vector<4x128xf32>, vector<128x384xf32>, vector<4x384xf32> -> vector<4x384xf32>
    %153 = arith.addf %152, %18 : vector<4x384xf32>
    %154 = vector.extract_strided_slice %129 {offsets = [0, 512], sizes = [4, 128], strides = [1, 1]} : vector<4x640xf32> to vector<4x128xf32>
    %155 = vector.extract_strided_slice %153 {offsets = [0, 0], sizes = [4, 128], strides = [1, 1]} : vector<4x384xf32> to vector<4x128xf32>
    %156 = arith.mulf %154, %155 : vector<4x128xf32>
    %157 = vector.extract_strided_slice %130 {offsets = [0, 512], sizes = [4, 128], strides = [1, 1]} : vector<4x640xf32> to vector<4x128xf32>
    %158 = vector.extract_strided_slice %153 {offsets = [0, 128], sizes = [4, 128], strides = [1, 1]} : vector<4x384xf32> to vector<4x128xf32>
    %159 = arith.mulf %157, %158 : vector<4x128xf32>
    %160 = arith.addf %156, %159 : vector<4x128xf32>
    %161 = vector.extract_strided_slice %153 {offsets = [0, 256], sizes = [4, 128], strides = [1, 1]} : vector<4x384xf32> to vector<4x128xf32>
    %162 = arith.addf %160, %161 : vector<4x128xf32>
    %163 = vector.extract_strided_slice %162 {offsets = [0, 0], sizes = [4, 96], strides = [1, 1]} : vector<4x128xf32> to vector<4x96xf32>
    %164 = arith.negf %163 : vector<4x96xf32>
    %165 = math.exp %164 : vector<4x96xf32>
    %cst_47 = arith.constant 1.000000e+00 : f32
    %166 = vector.broadcast %cst_47 : f32 to vector<4x96xf32>
    %167 = arith.addf %166, %165 : vector<4x96xf32>
    %168 = arith.divf %166, %167 : vector<4x96xf32>
    %169 = vector.extract_strided_slice %162 {offsets = [0, 96], sizes = [4, 32], strides = [1, 1]} : vector<4x128xf32> to vector<4x32xf32>
    %170 = math.tanh %169 : vector<4x32xf32>
    %171 = vector.extract_strided_slice %168 {offsets = [0, 32], sizes = [4, 32], strides = [1, 1]} : vector<4x96xf32> to vector<4x32xf32>
    %172 = arith.mulf %123, %171 : vector<4x32xf32>
    %173 = vector.extract_strided_slice %168 {offsets = [0, 0], sizes = [4, 32], strides = [1, 1]} : vector<4x96xf32> to vector<4x32xf32>
    %174 = arith.mulf %173, %170 : vector<4x32xf32>
    %175 = arith.addf %172, %174 : vector<4x32xf32>
    %176 = math.tanh %175 : vector<4x32xf32>
    %177 = vector.extract_strided_slice %168 {offsets = [0, 64], sizes = [4, 32], strides = [1, 1]} : vector<4x96xf32> to vector<4x32xf32>
    %178 = arith.mulf %176, %177 : vector<4x32xf32>
    %c3_i32 = arith.constant 3 : i32
    %179 = arith.index_cast %c3_i32 : i32 to index
    %c0_48 = arith.constant 0 : index
    %c0_49 = arith.constant 0 : index
    %180 = vector.load %arg13[%179, %c0_48, %c0_49] : memref<4x4x640xf32, #tpu.memory_space<vmem>>, vector<1x4x640xf32>
    %181 = vector.shape_cast %180 : vector<1x4x640xf32> to vector<4x640xf32>
    %cst_50 = arith.constant dense<0.000000e+00> : vector<4x640xf32>
    %182 = tpu.matmul %178, %13, %cst_50 {dimension_numbers = #tpu.dot_dimension_numbers<[1], [0], [0], [1], [0, 0, 1, 1], [], []>} : vector<4x32xf32>, vector<32x640xf32>, vector<4x640xf32> -> vector<4x640xf32>
    %183 = vector.extract_strided_slice %181 {offsets = [0, 0], sizes = [4, 512], strides = [1, 1]} : vector<4x640xf32> to vector<4x512xf32>
    %184 = vector.extract_strided_slice %182 {offsets = [0, 0], sizes = [4, 512], strides = [1, 1]} : vector<4x640xf32> to vector<4x512xf32>
    %185 = arith.addf %183, %184 : vector<4x512xf32>
    %cst_51 = arith.constant dense<0.000000e+00> : vector<4x512xf32>
    %186 = tpu.matmul %151, %14, %cst_51 {dimension_numbers = #tpu.dot_dimension_numbers<[1], [0], [0], [1], [0, 0, 1, 1], [], []>} : vector<4x128xf32>, vector<128x512xf32>, vector<4x512xf32> -> vector<4x512xf32>
    %187 = arith.addf %185, %186 : vector<4x512xf32>
    %188 = vector.extract_strided_slice %187 {offsets = [0, 0], sizes = [4, 384], strides = [1, 1]} : vector<4x512xf32> to vector<4x384xf32>
    %189 = arith.negf %188 : vector<4x384xf32>
    %190 = math.exp %189 : vector<4x384xf32>
    %cst_52 = arith.constant 1.000000e+00 : f32
    %191 = vector.broadcast %cst_52 : f32 to vector<4x384xf32>
    %192 = arith.addf %191, %190 : vector<4x384xf32>
    %193 = arith.divf %191, %192 : vector<4x384xf32>
    %194 = vector.extract_strided_slice %187 {offsets = [0, 384], sizes = [4, 128], strides = [1, 1]} : vector<4x512xf32> to vector<4x128xf32>
    %195 = math.tanh %194 : vector<4x128xf32>
    %196 = vector.extract_strided_slice %193 {offsets = [0, 128], sizes = [4, 128], strides = [1, 1]} : vector<4x384xf32> to vector<4x128xf32>
    %197 = arith.mulf %148, %196 : vector<4x128xf32>
    %198 = vector.extract_strided_slice %193 {offsets = [0, 0], sizes = [4, 128], strides = [1, 1]} : vector<4x384xf32> to vector<4x128xf32>
    %199 = arith.mulf %198, %195 : vector<4x128xf32>
    %200 = arith.addf %197, %199 : vector<4x128xf32>
    %201 = math.tanh %200 : vector<4x128xf32>
    %202 = vector.extract_strided_slice %193 {offsets = [0, 256], sizes = [4, 128], strides = [1, 1]} : vector<4x384xf32> to vector<4x128xf32>
    %203 = arith.mulf %201, %202 : vector<4x128xf32>
    %cst_53 = arith.constant dense<0.000000e+00> : vector<4x384xf32>
    %204 = tpu.matmul %203, %15, %cst_53 {dimension_numbers = #tpu.dot_dimension_numbers<[1], [0], [0], [1], [0, 0, 1, 1], [], []>} : vector<4x128xf32>, vector<128x384xf32>, vector<4x384xf32> -> vector<4x384xf32>
    %205 = arith.addf %204, %18 : vector<4x384xf32>
    %206 = vector.extract_strided_slice %181 {offsets = [0, 512], sizes = [4, 128], strides = [1, 1]} : vector<4x640xf32> to vector<4x128xf32>
    %207 = vector.extract_strided_slice %205 {offsets = [0, 0], sizes = [4, 128], strides = [1, 1]} : vector<4x384xf32> to vector<4x128xf32>
    %208 = arith.mulf %206, %207 : vector<4x128xf32>
    %209 = vector.extract_strided_slice %182 {offsets = [0, 512], sizes = [4, 128], strides = [1, 1]} : vector<4x640xf32> to vector<4x128xf32>
    %210 = vector.extract_strided_slice %205 {offsets = [0, 128], sizes = [4, 128], strides = [1, 1]} : vector<4x384xf32> to vector<4x128xf32>
    %211 = arith.mulf %209, %210 : vector<4x128xf32>
    %212 = arith.addf %208, %211 : vector<4x128xf32>
    %213 = vector.extract_strided_slice %205 {offsets = [0, 256], sizes = [4, 128], strides = [1, 1]} : vector<4x384xf32> to vector<4x128xf32>
    %214 = arith.addf %212, %213 : vector<4x128xf32>
    %215 = vector.extract_strided_slice %214 {offsets = [0, 0], sizes = [4, 96], strides = [1, 1]} : vector<4x128xf32> to vector<4x96xf32>
    %216 = arith.negf %215 : vector<4x96xf32>
    %217 = math.exp %216 : vector<4x96xf32>
    %cst_54 = arith.constant 1.000000e+00 : f32
    %218 = vector.broadcast %cst_54 : f32 to vector<4x96xf32>
    %219 = arith.addf %218, %217 : vector<4x96xf32>
    %220 = arith.divf %218, %219 : vector<4x96xf32>
    %221 = vector.extract_strided_slice %214 {offsets = [0, 96], sizes = [4, 32], strides = [1, 1]} : vector<4x128xf32> to vector<4x32xf32>
    %222 = math.tanh %221 : vector<4x32xf32>
    %223 = vector.extract_strided_slice %220 {offsets = [0, 32], sizes = [4, 32], strides = [1, 1]} : vector<4x96xf32> to vector<4x32xf32>
    %224 = arith.mulf %175, %223 : vector<4x32xf32>
    %225 = vector.extract_strided_slice %220 {offsets = [0, 0], sizes = [4, 32], strides = [1, 1]} : vector<4x96xf32> to vector<4x32xf32>
    %226 = arith.mulf %225, %222 : vector<4x32xf32>
    %227 = arith.addf %224, %226 : vector<4x32xf32>
    %228 = math.tanh %227 : vector<4x32xf32>
    %229 = vector.extract_strided_slice %220 {offsets = [0, 64], sizes = [4, 32], strides = [1, 1]} : vector<4x96xf32> to vector<4x32xf32>
    %230 = arith.mulf %228, %229 : vector<4x32xf32>
    %c4_i32 = arith.constant 4 : i32
    %c0_55 = arith.constant 0 : index
    %c0_56 = arith.constant 0 : index
    %231 = vector.load %arg9[%c0_55, %c0_56] : memref<4x32xf32, #tpu.memory_space<vmem>>, vector<4x32xf32>
    tpu.vector_store %arg9[%c0_55, %c0_56], %230 {strides = array<i32>} : memref<4x32xf32, #tpu.memory_space<vmem>>, vector<4x32xf32>,
    %c0_57 = arith.constant 0 : index
    %c0_58 = arith.constant 0 : index
    %232 = vector.load %arg10[%c0_57, %c0_58] : memref<4x32xf32, #tpu.memory_space<vmem>>, vector<4x32xf32>
    tpu.vector_store %arg10[%c0_57, %c0_58], %227 {strides = array<i32>} : memref<4x32xf32, #tpu.memory_space<vmem>>, vector<4x32xf32>,
    %c0_59 = arith.constant 0 : index
    %c0_60 = arith.constant 0 : index
    %233 = vector.load %arg11[%c0_59, %c0_60] : memref<4x128xf32, #tpu.memory_space<vmem>>, vector<4x128xf32>
    tpu.vector_store %arg11[%c0_59, %c0_60], %203 {strides = array<i32>} : memref<4x128xf32, #tpu.memory_space<vmem>>, vector<4x128xf32>,
    %c0_61 = arith.constant 0 : index
    %c0_62 = arith.constant 0 : index
    %234 = vector.load %arg12[%c0_61, %c0_62] : memref<4x128xf32, #tpu.memory_space<vmem>>, vector<4x128xf32>
    tpu.vector_store %arg12[%c0_61, %c0_62], %200 {strides = array<i32>} : memref<4x128xf32, #tpu.memory_space<vmem>>, vector<4x128xf32>,
    return
  }
  func.func @transform_0(%arg0: i32, %arg1: i32) -> (i32, i32, i32) {
    %c0_i32 = arith.constant 0 : i32
    %c0_i32_0 = arith.constant 0 : i32
    return %arg1, %arg0, %c0_i32 : i32, i32, i32
  }
  func.func @transform_1(%arg0: i32, %arg1: i32) -> (i32, i32) {
    %c0_i32 = arith.constant 0 : i32
    %c0_i32_0 = arith.constant 0 : i32
    %c0_i32_1 = arith.constant 0 : i32
    return %c0_i32, %c0_i32_0 : i32, i32
  }
  func.func @transform_2(%arg0: i32, %arg1: i32) -> (i32, i32) {
    %c0_i32 = arith.constant 0 : i32
    %c0_i32_0 = arith.constant 0 : i32
    %c0_i32_1 = arith.constant 0 : i32
    return %c0_i32, %c0_i32_0 : i32, i32
  }
  func.func @transform_3(%arg0: i32, %arg1: i32) -> (i32, i32) {
    %c0_i32 = arith.constant 0 : i32
    %c0_i32_0 = arith.constant 0 : i32
    %c0_i32_1 = arith.constant 0 : i32
    return %c0_i32, %c0_i32_0 : i32, i32
  }
  func.func @transform_4(%arg0: i32, %arg1: i32) -> (i32, i32) {
    %c0_i32 = arith.constant 0 : i32
    %c0_i32_0 = arith.constant 0 : i32
    %c0_i32_1 = arith.constant 0 : i32
    return %c0_i32, %c0_i32_0 : i32, i32
  }
  func.func @transform_5(%arg0: i32, %arg1: i32) -> (i32, i32) {
    %c0_i32 = arith.constant 0 : i32
    %c0_i32_0 = arith.constant 0 : i32
    %c0_i32_1 = arith.constant 0 : i32
    return %c0_i32, %c0_i32_0 : i32, i32
  }
  func.func @transform_6(%arg0: i32, %arg1: i32) -> (i32, i32) {
    %c0_i32 = arith.constant 0 : i32
    %c0_i32_0 = arith.constant 0 : i32
    %c0_i32_1 = arith.constant 0 : i32
    return %c0_i32, %c0_i32_0 : i32, i32
  }
  func.func @transform_7(%arg0: i32, %arg1: i32) -> (i32, i32) {
    %c0_i32 = arith.constant 0 : i32
    %c0_i32_0 = arith.constant 0 : i32
    return %arg0, %c0_i32 : i32, i32
  }
  func.func @transform_8(%arg0: i32, %arg1: i32) -> (i32, i32) {
    %c0_i32 = arith.constant 0 : i32
    %c0_i32_0 = arith.constant 0 : i32
    return %arg0, %c0_i32 : i32, i32
  }
  func.func @transform_9(%arg0: i32, %arg1: i32) -> (i32, i32) {
    %c0_i32 = arith.constant 0 : i32
    %c0_i32_0 = arith.constant 0 : i32
    return %arg0, %c0_i32 : i32, i32
  }
  func.func @transform_10(%arg0: i32, %arg1: i32) -> (i32, i32) {
    %c0_i32 = arith.constant 0 : i32
    %c0_i32_0 = arith.constant 0 : i32
    return %arg0, %c0_i32 : i32, i32
  }
}

</mosaic_0001>

<bundles_post_ra>
// kernel: tpu_custom_call.1
= control target key start
LH: loop header
LB: loop body
LE: loop exit
PB: predicated region body
PF: predicated region fallthrough
CT: control target
= control target key end

     0   :  { %s6100_s0 = inlined_call_operand.hbm [shape: f32[8,4,16], index: 0, kind: input, shape index: {}]   ;;  %s6101_s1 = inlined_call_operand.hbm [shape: f32[16,640], index: 1, kind: input, shape index: {}]   ;;  %s6102_s2 = inlined_call_operand.hbm [shape: f32[1,640], index: 2, kind: input, shape index: {}]   ;;  %s6103_s3 = inlined_call_operand.hbm [shape: f32[32,640], index: 3, kind: input, shape index: {}]   ;;  %s6104_s4 = inlined_call_operand.hbm [shape: f32[128,512], index: 4, kind: input, shape index: {}]   ;;  %s6105_s5 = inlined_call_operand.hbm [shape: f32[128,384], index: 5, kind: input, shape index: {}]   ;;  %s6106_s6 = inlined_call_operand.vmem [shape: f32[1,384], index: 6, kind: input, shape index: {}]   ;;  %s6107_s7 = inlined_call_operand.hbm [shape: f32[4,32], index: 7, kind: output, shape index: {0}]   ;;  %s6108_s8 = inlined_call_operand.hbm [shape: f32[4,32], index: 8, kind: output, shape index: {1}]   ;;  %s6109_s9 = inlined_call_operand.hbm [shape: f32[4,128], index: 9, kind: output, shape index: {2}]   ;;  %s6110_s10 = inlined_call_operand.hbm [shape: f32[4,128], index: 10, kind: output, shape index: {3}]  }
   0x1   :  { %6308 = sst [smem:[#allocation123_spill]] %s6101_s1 }
   0x2   :  { %6309 = sst [smem:[#allocation124_spill]] %s6102_s2 }
   0x3   :  { %6310 = sst [smem:[#allocation125_spill]] %s6103_s3 }
   0x4   :  { %6311 = sst [smem:[#allocation126_spill]] %s6104_s4 }
   0x5   :  { %16 = vsyncpa [#allocation4], 0 }
   0x6   :  { %18 = vsyncpa [#allocation4 + $0x1], 0 }
   0x7   :  { %19 = vsyncpa [#allocation7], 0 }
   0x8   :  { %20 = vsyncpa [#allocation10], 0 }
   0x9   :  { %21 = vsyncpa [#allocation13], 0 }
   0xa   :  { %22 = vsyncpa [#allocation5], 0 }
   0xb   :  { %23 = vsyncpa [#allocation16], 0 }
   0xc   :  { %24 = vsyncpa [#allocation19], 0  ;;  %s4576_s13 = smov 0   ;;  %s4578_s14 = smov 0  }
   0xd   :  { %s4580_s15 = smov 0   ;;  %s4582_s16 = smov 0  }
   0xe   :  { %s4584_s17 = smov 0   ;;  %s4586_s18 = smov 0  }
   0xf LB: > { %s6112_s19 = sadd.s32 4294967295, %s4495_s18   ;;  %p3459_p0 = scmp.ge.s32.totalorder %s4495_s18, 1  ;;  %s4495_s18 = sphi %s4586_s18, %s30_s18   ;;  %s4491_s17 = sphi %s4584_s17, %s6714_s17   ;;  %s4487_s16 = sphi %s4582_s16, %s6713_s16   ;;  %s4483_s15 = sphi %s4580_s15, %s6712_s15   ;;  %s4479_s14 = sphi %s4578_s14, %s6711_s14   ;;  %s4475_s13 = sphi %s4576_s13, %s6710_s13  }
  0x10   : > { %p4610_p1 = scmp.eq.s32.totalorder %s6112_s19, 0  ;;  %p305_p2 = scmp.lt.s32.totalorder %s4495_s18, 3 }
  0x11   : > { %s4497_s22 = smov [#allocation6]   ;;  %s4498_s25 = smov [#allocation9]  }
  0x12   : > { %p4615_p3 = pnand %p3459_p0, %p305_p2  ;;  %s317_s23 = sshll.u32 %s4497_s22, 4  ;;  %s318_s23 = int_to_ptr.vmem [resolvable:$true] %s317_s23 }
  0x13   : > { %s341_s26 = sshll.u32 %s4498_s25, 4  ;;  %s4499_s27 = smov [#allocation8]   ;;  %s342_s26 = int_to_ptr.vmem [resolvable:$true] %s341_s26 }
  0x14   : > { %s6313_s21 = scalar_select %p4615_p3, 1, 0 }
  0x15   : > { %p3843_p4 = pneg %p4615_p3  ;;  %s331_s28 = sshll.u32 %s4499_s27, 4  ;;  %s332_s28 = int_to_ptr.vmem [resolvable:$true] %s331_s28 }
  0x16   : > { %s4178_s30 = scalar_lea.vmem %s318_s23, 1280  ;;  %p4186_p10 = scmp.lt.s32.totalorder %s318_s23, %s318_s23 }
  0x17   : > { %p4623_p5 = pnand %p3843_p4, %p4610_p1  ;;  %p4179_p7 = scmp.ne.s32.totalorder %s318_s23, %s4178_s30 }
  0x18   : > { %p4187_p11 = scmp.lt.s32.totalorder %s4178_s30, %s4178_s30 }
  0x19   : > { %p4629_p6 = pneg %p4623_p5 }
  0x1a   : > { %p4188_p12 = por %p4187_p11, %p4186_p10 }
  0x1b   : > { %p4181_p8 = pnand %p4179_p7, %p4629_p6 }
  0x1d   : > { %p4182_p9 = pneg %p4181_p8 }
  0x1f   : > { %p4189_p13 = pnand %p4188_p12, %p4182_p9 }
  0x21   : > { %4192 = shalt.err (!%p4189_p13)
}
  0x22   : > { %s4500_s11 = smov 640   ;;  %s4501_s12 = smov 40  }
  0x23   : > { %s6316_s1 = sld [smem:[#allocation123_spill]]  ;;  %s4204_s27 = scalar_lea.vmem %s342_s26, 2560 }
  0x24   : > { %p4205_p0 = scmp.ne.s32.totalorder %s342_s26, %s4204_s27  ;;  %p4212_p7 = scmp.lt.s32.totalorder %s342_s26, %s342_s26 }
  0x25   : > { %p4213_p8 = scmp.lt.s32.totalorder %s4204_s27, %s4204_s27 }
  0x26   : > { %p4207_p2 = pnand %p4205_p0, %p4629_p6 }
  0x27   : > { %p4214_p3 = por %p4213_p8, %p4212_p7 }
  0x28   : > { %p4208_p4 = pneg %p4207_p2 }
  0x29   : > { %3846 = dma.hbm_to_vmem [thread:$0]  (!%p4623_p5), %s6316_s1, 1280, %s318_s23, [#allocation7], %s4500_s11, %s4500_s11, %s4501_s12  }
  0x2a   : > { %p4215_p10 = pnand %p4214_p3, %p4208_p4 }
  0x2c   : > { %4218 = shalt.err (!%p4215_p10)
}
  0x2d   : > { %s6317_s3 = sld [smem:[#allocation125_spill]]  ;;  %s4230_s22 = scalar_lea.vmem %s332_s28, 80 }
  0x2e   : > { %p4231_p9 = scmp.ne.s32.totalorder %s332_s28, %s4230_s22  ;;  %s4237_s23 = scalar_lea.vmem %s332_s28, 96 }
  0x2f   : > { %p4238_p13 = scmp.lt.s32.totalorder %s332_s28, %s332_s28  ;;  %p4239_p0 = scmp.lt.s32.totalorder %s4237_s23, %s4230_s22 }
  0x30   : > { %p4233_p11 = pnand %p4231_p9, %p4629_p6 }
  0x31   : > { %p4240_p2 = por %p4239_p0, %p4238_p13 }
  0x32   : > { %p4234_p12 = pneg %p4233_p11 }
  0x33   : > { %3852 = dma.hbm_to_vmem [thread:$0]  (!%p4623_p5), %s6317_s3, 2560, %s342_s26, [#allocation10], %s4500_s11, %s4500_s11, %s4501_s12  }
  0x34   : > { %p4241_p7 = pnand %p4240_p2, %p4234_p12 }
  0x36   : > { %4244 = shalt.err (!%p4241_p7)
}
  0x37   : > { %s6318_s2 = sld [smem:[#allocation124_spill]]  ;;  %s4502_s19 = smov [#allocation11]  }
  0x38   : > { %s354_s26 = sshll.u32 %s4502_s19, 4  ;;  %s355_s26 = int_to_ptr.vmem [resolvable:$true] %s354_s26 }
  0x39   : > { %s4256_s11 = scalar_lea.vmem %s355_s26, 8192  ;;  %p4264_p10 = scmp.lt.s32.totalorder %s355_s26, %s355_s26 }
  0x3a   : > { %p4257_p3 = scmp.ne.s32.totalorder %s355_s26, %s4256_s11  ;;  %p4265_p9 = scmp.lt.s32.totalorder %s4256_s11, %s4256_s11 }
  0x3c   : > { %p4259_p4 = pnand %p4257_p3, %p4629_p6  ;;  %p4266_p11 = por %p4265_p9, %p4264_p10 }
  0x3d   : > { %3849 = dma.hbm_to_vmem [thread:$0]  (!%p4623_p5), %s6318_s2, 80, %s332_s28, [#allocation7]  }
  0x3e   : > { %p4260_p8 = pneg %p4259_p4 }
  0x40   : > { %p4267_p12 = pnand %p4266_p11, %p4260_p8 }
  0x42   : > { %4270 = shalt.err (!%p4267_p12)
}
  0x43   : > { %s4503_s12 = smov 512   ;;  %s4504_s30 = smov 32  }
  0x44   : > { %s6319_s4 = sld [smem:[#allocation126_spill]]  ;;  %s4505_s23 = smov [#allocation12]  }
  0x45   : > { %s367_s25 = sshll.u32 %s4505_s23, 4  ;;  %s368_s25 = int_to_ptr.vmem [resolvable:$true] %s367_s25 }
  0x46   : > { %s4282_s27 = scalar_lea.vmem %s368_s25, 6144  ;;  %p4290_p7 = scmp.lt.s32.totalorder %s368_s25, %s368_s25 }
  0x47   : > { %p4283_p13 = scmp.ne.s32.totalorder %s368_s25, %s4282_s27  ;;  %p4291_p3 = scmp.lt.s32.totalorder %s4282_s27, %s4282_s27 }
  0x49   : > { %p4285_p0 = pnand %p4283_p13, %p4629_p6  ;;  %p4292_p4 = por %p4291_p3, %p4290_p7 }
  0x4a   : > { %3855 = dma.hbm_to_vmem [thread:$0]  (!%p4623_p5), %s6319_s4, 8192, %s355_s26, [#allocation10], %s4503_s12, %s4503_s12, %s4504_s30  }
  0x4b   : > { %p4286_p2 = pneg %p4285_p0 }
  0x4d   : > { %p4293_p8 = pnand %p4292_p4, %p4286_p2 }
  0x4f   : > { %4296 = shalt.err (!%p4293_p8)
}
  0x50   : > { %s4506_s19 = smov 384   ;;  %s4507_s29 = smov 24  }
  0x51   : > { %3858 = dma.hbm_to_vmem [thread:$0]  (!%p4623_p5), %s6105_s5, 6144, %s368_s25, [#allocation13], %s4506_s19, %s4506_s19, %s4507_s29  }
  0x52   : > { %s39_s12 = sadd.s32 1, %s4491_s17  ;;  %s51_s30 = sadd.s32 1, %s4483_s15 }
  0x53   : > { %p40_p6 = scmp.ge.s32.totalorder %s39_s12, 2  ;;  %p58_p10 = scmp.ne.s32.totalorder %s4483_s15, %s4479_s14 }
  0x54   : > { %p59_p9 = scmp.eq.s32.totalorder %s4495_s18, 0  ;;  %p64_p12 = scmp.ne.s32.totalorder %s4479_s14, %s4475_s13 }
  0x55   : > { %s6716_s12 = smov (%p40_p6, %s39_s12), 0  ;;  %p3868_p13 = scmp.lt.s32.totalorder %s4495_s18, 2 }
  0x56   : > { %p4675_p11 = por %p59_p9, %p58_p10  ;;  %s46_s24 = ssub.s32 %s4491_s17, %s6716_s12 }
  0x57   : > { %p49_p0 = scmp.eq.s32.totalorder %s46_s24, 0  ;;  %p4686_p2 = por %p4610_p1, %p64_p12 }
  0x58   : > { %s384_s23 = sand.u32 1, %s4483_s15   ;;  %s3517_s25 = sshll.u32 %s4491_s17, 8 }
  0x59   : > { %s4693_s27 = scalar_select %p49_p0, %s4483_s15, %s51_s30  }
  0x5a   : > { %s3466_s19 = sshll.u32 %s384_s23, 4  ;;  %s395_s11 = scalar_lea.hbm %s6100_s0, %s3517_s25 }
  0x5b   : > { %s388_s1 = scalar_lea.vmem [#allocation3], %s3466_s19  ;;  %p4700_p5 = pnand %p3868_p13, %p4675_p11 }
  0x5c   : > { %s396_s2 = sshll.u32 %s388_s1, 4  ;;  %s385_s24 = scalar_lea.sflag [#allocation4], %s384_s23  ;;  %s397_s2 = int_to_ptr.vmem [resolvable:$true] %s396_s2 }
  0x5d   : > { %p4299_p7 = pneg %p4700_p5  ;;  %s4310_s3 = scalar_lea.vmem %s397_s2, 256 }
  0x5e   : > { %p4311_p3 = scmp.ne.s32.totalorder %s397_s2, %s4310_s3  ;;  %s4508_s30 = smov [#allocation3]  }
  0x5f   : > { %s4315_s4 = sshll.u32 %s4508_s30, 4  ;;  %s4316_s4 = int_to_ptr.vmem [resolvable:$false] %s4315_s4 }
  0x60   : > { %p4313_p4 = pnand %p4311_p3, %p4299_p7  ;;  %s4317_s25 = scalar_lea.vmem %s4316_s4, 512 }
  0x61   : > { %p4318_p6 = scmp.lt.s32.totalorder %s397_s2, %s4316_s4  ;;  %p4319_p10 = scmp.lt.s32.totalorder %s4317_s25, %s4310_s3 }
  0x62   : > { %p4314_p8 = pneg %p4313_p4 }
  0x63   : > { %p4320_p9 = por %p4319_p10, %p4318_p6 }
  0x65   : > { %p4321_p11 = pnand %p4320_p9, %p4314_p8 }
  0x67   : > { %4324 = shalt.err (!%p4321_p11)
}
  0x68   : > { %s4509_s1 = smov 64   ;;  %s4510_s22 = smov 4  }
  0x69   : > { %3862 = dma.hbm_to_vmem [thread:$0]  (!%p4700_p5), %s395_s11, 256, %s397_s2, %s385_s24, %s4509_s1, %s4509_s1, %s4510_s22  }
  0x6a   : > { %p6323_p12 = scmp.ne.s32.totalorder %s6313_s21, 0 }
  0x6c   : > { %408 = sbr.rel (%p6323_p12) target bundleno = 2802 (0xaf2), region = 48 }
  0x71   : > { %s410_s23 = sand.u32 1, %s4479_s14  }
  0x72   : > { %s4711_s19 = sshll.u32 %s410_s23, 4  ;;  %s411_s29 = scalar_lea.sflag [#allocation4], %s410_s23 }
  0x73   : > { %s414_s4 = scalar_lea.vmem [#allocation3], %s4711_s19 }
  0x74   : > { %4446 = dma.done.wait (%p4686_p2), %s411_s29, 256  }
  0x75   : > { %4448 = vsyncadd (%p4686_p2), %s411_s29, 4294967040 }
  0x76   : > { %4450 = dma.done.wait (%p4610_p1), [#allocation7], 1360  }
  0x77   : > { %4452 = vsyncadd (%p4610_p1), [#allocation7], 4294965936 }
  0x78   : > { %4454 = dma.done.wait (%p4610_p1), [#allocation10], 10752  }
  0x79   : > { %4456 = vsyncadd (%p4610_p1), [#allocation10], 4294956544 }
  0x7a   : > { %4458 = dma.done.wait (%p4610_p1), [#allocation13], 6144  }
  0x7b   : > { %4460 = vsyncadd (%p4610_p1), [#allocation13], 4294961152  ;;  %p3476_p13 = scmp.ne.s32.totalorder %s4487_s16, 0 }
  0x7d   : > { %470 = sbr.rel (%p3476_p13) target bundleno = 133 (0x85), region = 76 }
  0x82   : > { %vm471_vm0 = vcmask 257024   ;;  %v4511_v0 = vmov 0.0  }
  0x83   : > { %472 = vst.msk [vmem:[#allocation14] sm:$0xf] %vm471_vm0, %v4511_v0  ;;  %473 = vst.msk [vmem:[#allocation15] sm:$0xf] %vm471_vm0, %v4511_v0 }
  0x84   : > { %474 = vst [vmem:[#allocation17] sm:$0xf] %v4511_v0  ;;  %475 = vst [vmem:[#allocation18] sm:$0xf] %v4511_v0 }
  0x85 PF: > { %v486_v1 = vld [vmem:[#allocation6 + $0x30] sm:$0xff]  ;;  %v485_v2 = vld [vmem:[#allocation6 + $0x28] sm:$0xff]  ;;  %v480_v4 = vld [vmem:[#allocation6] sm:$0xff]  ;;  %vm496_vm1 = vcmask 130048   ;;  %v6113_v9 = vmov 0.0   ;;  %vm967_vm2 = vcmask 261120  }
  0x86   : > { %v481_v3 = vld [vmem:[#allocation6 + $0x8] sm:$0xff]  ;;  %529 = vmatprep.subr.mxu0 %v486_v1  ;;  %3801 = vmatprep.subr.mxu1 %v486_v1  ;;  %v3953_v5 = vld [vmem:[%s414_s4] sm:$0xff]   ;;  %v487_v10 = vld [vmem:[#allocation6 + $0x38] sm:$0xff]  ;;  %vm4513_vm3 = vmmov 0   ;;  %s4514_s16 = smov 64   ;;  %s4515_s20 = smov 96  }
  0x87   : > { %530 = vmatpush1.msra.mxu0 %v485_v2  ;;  %3803 = vmatpush1.msra.mxu1 %v485_v2  ;;  %v3954_v6 = vld [vmem:[%s414_s4 + $0x8] sm:$0xff]   ;;  %v488_v7 = vld [vmem:[#allocation6 + $0x40] sm:$0xff]  ;;  %v482_v13 = vld [vmem:[#allocation6 + $0x10] sm:$0xff]  ;;  %s4516_s21 = smov 32   ;;  %s6708_s28 = sadd.s32 4294967295, %s4495_s18  }
  0x88   : > { %531 = vmatprep.subr.mxu0 %v481_v3  ;;  %3802 = vmatprep.subr.mxu1 %v481_v3  ;;  %v489_v8 = vld [vmem:[#allocation6 + $0x48] sm:$0xff]  ;;  %v483_v11 = vld [vmem:[#allocation6 + $0x18] sm:$0xff]  ;;  %v484_v12 = vld [vmem:[#allocation6 + $0x20] sm:$0xff]  ;;  %p6035_p1 = scmp.eq.s32.totalorder %s6708_s28, 1  ;;  %s4517_s11 = smov [#allocation18]  }
  0x89   : > { %532 = vmatpush1.msra.mxu0 %v480_v4  ;;  %3804 = vmatpush1.msra.mxu1 %v480_v4  ;;  %v4736_v14 = vld [vmem:[#allocation9 + $0x80] sm:$0xff]  ;;  %v4738_v15 = vld [vmem:[#allocation9 + $0x90] sm:$0xff]  ;;  %v4741_v16 = vld [vmem:[#allocation9 + $0x78] sm:$0xff]  ;;  %s3309_s13 = sshll.u32 %s4517_s11, 4  ;;  %s3310_s13 = int_to_ptr.vmem [resolvable:$true] %s3309_s13 }
  0x8a   : > { %565 = vmatprep.mubr.f32.mxu0 %v6113_v9  ;;  %571 = vmatprep.mubr.f32.mxu1 %v6113_v9  ;;  %v4743_v17 = vld [vmem:[#allocation9 + $0x88] sm:$0xff]  ;;  %v4747_v18 = vld [vmem:[#allocation9 + $0x58] sm:$0xff]  ;;  %v4753_v20 = vld [vmem:[#allocation9 + $0x50] sm:$0xff]  ;;  %s4325_s24 = scalar_lea.vmem %s3310_s13, 64  ;;  %p4332_p7 = scmp.lt.s32.totalorder %s3310_s13, %s3310_s13 }
  0x8b   : > { %3477 = vmatmul.mubr.msk.f32.vlgmr.msra.gmra.mxu0 %vm496_vm1, %v3953_v5  ;;  %3478 = vmatmul.mubr.msk.f32.vlgmr.msra.gmra.mxu1 %vm496_vm1, %v3954_v6  ;;  %v4749_v19 = vld [vmem:[#allocation9 + $0x68] sm:$0xff]  ;;  %v4757_v21 = vld [vmem:[#allocation9 + $0x60] sm:$0xff]  ;;  %v4761_v22 = vld [vmem:[#allocation9 + $0x30] sm:$0xff]  ;;  %p4326_p0 = scmp.ne.s32.totalorder %s3310_s13, %s4325_s24  ;;  %p4333_p3 = scmp.lt.s32.totalorder %s4325_s24, %s4325_s24 }
  0x8c   : > { %606 = vmatprep.subr.mxu1 %v488_v7  ;;  %3610 = vmatprep.subr.mxu0 %v489_v8  ;;  %v4763_v23 = vld [vmem:[#allocation9 + $0x40] sm:$0xff]  ;;  %v4767_v24 = vld [vmem:[#allocation9 + $0x28] sm:$0xff]  ;;  %v4769_v25 = vld [vmem:[#allocation9 + $0x38] sm:$0xff] }
  0x8d   : > { %607 = vmatpush1.msra.mxu1 %v487_v10  ;;  %3611 = vmatpush3.msra.mxu0 %v489_v8  ;;  %v4773_v26 = vld [vmem:[#allocation9 + $0x8] sm:$0xff]  ;;  %v4775_v27 = vld [vmem:[#allocation9 + $0x18] sm:$0xff]  ;;  %v4779_v28 = vld [vmem:[#allocation9] sm:$0xff]  ;;  %p4327_p2 = pnand %p4326_p0, %p6035_p1  ;;  %p4334_p4 = por %p4333_p3, %p4332_p7 }
  0x8e   : > { %608 = vmatprep.subr.mxu1 %v483_v11  ;;  %3612 = vmatprep.subr.mxu0 %v484_v12  ;;  %v4783_v29 = vld [vmem:[#allocation9 + $0x10] sm:$0xff]  ;;  %v960_v30 = vld [vmem:[#allocation14] sm:$0xf]  ;;  %v4789_v31 = vld [vmem:[#allocation11 + $0x1e8] sm:$0xff] }
  0x8f   : > { %609 = vmatpush1.msra.mxu1 %v482_v13  ;;  %642 = vmatprep.mubr.f32.mxu1 %v6113_v9  ;;  %v4793_v32 = vld [vmem:[#allocation9 + $0x98] sm:$0xff]  ;;  %v4795_v33 = vld [vmem:[#allocation11 + $0x1e0] sm:$0xff]  ;;  %v4799_v34 = vld [vmem:[#allocation11 + $0x1c8] sm:$0xff]  ;;  %p4328_p5 = pneg %p4327_p2 }
  0x90   : > { %3613 = vmatpush3.msra.mxu0 %v484_v12  ;;  %3614 = vmatprep.mubr.msk.f32.mxu0 %vm496_vm1, %v3953_v5  ;;  %v4803_v35 = vld [vmem:[#allocation9 + $0x70] sm:$0xff]  ;;  %v4805_v36 = vld [vmem:[#allocation11 + $0x1c0] sm:$0xff]  ;;  %v4809_v37 = vld [vmem:[#allocation11 + $0x1a8] sm:$0xff] }
  0x91   : > { %3479 = vmatmul.mubr.msk.f32.vlgmr.msra.gmra.mxu1 %vm496_vm1, %v3953_v5  ;;  %3615 = vmatmul.mubr.msk.f32.vlgmr.msra.gmra.mxu0 %vm496_vm1, %v3954_v6  ;;  %v4813_v38 = vld [vmem:[#allocation9 + $0x48] sm:$0xff]  ;;  %v4815_v39 = vld [vmem:[#allocation11 + $0x1a0] sm:$0xff]  ;;  %v4833_v44 = vld [vmem:[#allocation11 + $0x1f8] sm:$0xff]  ;;  %p4335_p8 = pnand %p4334_p4, %p4328_p5 }
  0x92   : > { %995 = vmatprep.subr.mxu1 %v4736_v14  ;;  %1066 = vmatprep.subr.mxu0 %v4738_v15  ;;  %v4819_v40 = vld [vmem:[#allocation11 + $0x188] sm:$0xff]  ;;  %v4823_v41 = vld [vmem:[#allocation9 + $0x20] sm:$0xff]  ;;  %v4839_v46 = vld [vmem:[#allocation11 + $0x1f0] sm:$0xff] }
  0x93   : > { %996 = vmatpush1.msra.mxu1 %v4741_v16  ;;  %1067 = vmatpush1.msra.mxu0 %v4743_v17  ;;  %v4825_v42 = vld [vmem:[#allocation11 + $0x180] sm:$0xff]  ;;  %v4829_v43 = vld [vmem:[#allocation11 + $0x168] sm:$0xff]  ;;  %v4846_v48 = vld [vmem:[#allocation11 + $0x1d8] sm:$0xff] }
  0x94   : > { %997 = vmatprep.subr.mxu1 %v4747_v18  ;;  %1068 = vmatprep.subr.mxu0 %v4749_v19  ;;  %v4837_v45 = vld [vmem:[#allocation11 + $0x160] sm:$0xff]  ;;  %v4844_v47 = vld [vmem:[#allocation11 + $0x148] sm:$0xff]  ;;  %v4852_v50 = vld [vmem:[#allocation11 + $0x1d0] sm:$0xff] }
  0x95   : > { %648 = vmatprep.mubr.f32.mxu1 %v6113_v9  ;;  %998 = vmatpush1.msra.mxu1 %v4753_v20  ;;  %v4850_v49 = vld [vmem:[#allocation11 + $0x140] sm:$0xff]  ;;  %v4856_v51 = vld [vmem:[#allocation11 + $0x128] sm:$0xff]  ;;  %v4858_v52 = vld [vmem:[#allocation11 + $0x1b8] sm:$0xff] }
  0x96   : > { %1069 = vmatpush1.msra.mxu0 %v4757_v21  ;;  %3480 = vmatmul.mubr.msk.f32.gmra.mxu1 %vm496_vm1, %v3954_v6  ;;  %v4862_v53 = vld [vmem:[#allocation11 + $0x120] sm:$0xff]  ;;  %v4864_v54 = vld [vmem:[#allocation11 + $0x1b0] sm:$0xff]  ;;  %v4868_v55 = vld [vmem:[#allocation11 + $0x108] sm:$0xff] }
  0x97   : > { %999 = vmatprep.subr.mxu1 %v4761_v22  ;;  %1070 = vmatprep.subr.mxu0 %v4763_v23  ;;  %6324 = vst [vmem:[#allocation27_spill] sm:$0xff] %v4862_v53  ;;  %6325 = vst [vmem:[#allocation28_spill] sm:$0xff] %v4864_v54  ;;  %v4870_v56 = vld [vmem:[#allocation11 + $0x198] sm:$0xff]  ;;  %v4874_v57 = vld [vmem:[#allocation11 + $0x100] sm:$0xff] }
  0x98   : > { %1000 = vmatpush1.msra.mxu1 %v4767_v24  ;;  %1071 = vmatpush1.msra.mxu0 %v4769_v25  ;;  %6326 = vst [vmem:[#allocation29_spill] sm:$0xff] %v4868_v55  ;;  %6327 = vst [vmem:[#allocation30_spill] sm:$0xff] %v4870_v56  ;;  %v4876_v58 = vld [vmem:[#allocation11 + $0x190] sm:$0xff]  ;;  %v4880_v59 = vld [vmem:[#allocation11 + $0xe8] sm:$0xff] }
  0x99   : > { %1001 = vmatprep.subr.mxu1 %v4773_v26  ;;  %1072 = vmatprep.subr.mxu0 %v4775_v27  ;;  %6328 = vst [vmem:[#allocation31_spill] sm:$0xff] %v4874_v57  ;;  %6329 = vst [vmem:[#allocation32_spill] sm:$0xff] %v4876_v58  ;;  %v4882_v60 = vld [vmem:[#allocation11 + $0x178] sm:$0xff]  ;;  %v4886_v61 = vld [vmem:[#allocation11 + $0xe0] sm:$0xff] }
  0x9a   : > { %1002 = vmatpush1.msra.mxu1 %v4779_v28  ;;  %1035 = vmatprep.mubr.f32.mxu1 %v6113_v9  ;;  %6330 = vst [vmem:[#allocation33_spill] sm:$0xff] %v4880_v59  ;;  %6331 = vst [vmem:[#allocation34_spill] sm:$0xff] %v4882_v60  ;;  %v4888_v62 = vld [vmem:[#allocation11 + $0x170] sm:$0xff]  ;;  %v4892_v63 = vld [vmem:[#allocation11 + $0xc8] sm:$0xff] }
  0x9b   : > { %1073 = vmatpush1.msra.mxu0 %v4783_v29  ;;  %1106 = vmatprep.mubr.f32.mxu0 %v6113_v9  ;;  %6332 = vst [vmem:[#allocation35_spill] sm:$0xff] %v4886_v61  ;;  %6333 = vst [vmem:[#allocation36_spill] sm:$0xff] %v4888_v62  ;;  %v4894_v0 = vld [vmem:[#allocation11 + $0x158] sm:$0xff]  ;;  %v4898_v1 = vld [vmem:[#allocation11 + $0xc0] sm:$0xff] }
  0x9c   : > { %3483 = vmatmul.mubr.msk.f32.vlgmr.msra.gmra.mxu1 %vm967_vm2, %v960_v30  ;;  %3484 = vmatmul.mubr.msk.f32.vlgmr.msra.gmra.mxu0 %vm967_vm2, %v960_v30  ;;  %6334 = vst [vmem:[#allocation37_spill] sm:$0xff] %v4892_v63  ;;  %6335 = vst [vmem:[#allocation38_spill] sm:$0xff] %v4894_v0  ;;  %v4900_v2 = vld [vmem:[#allocation11 + $0x150] sm:$0xff]  ;;  %v4904_v3 = vld [vmem:[#allocation11 + $0xa8] sm:$0xff] }
  0x9d   : > { %3617 = vmatprep.subr.mxu1 %v6113_v9  ;;  %1193 = vmatprep.subr.mxu0 %v4789_v31  ;;  %6336 = vst [vmem:[#allocation39_spill] sm:$0xff] %v4898_v1  ;;  %6337 = vst [vmem:[#allocation40_spill] sm:$0xff] %v4900_v2  ;;  %v4906_v4 = vld [vmem:[#allocation11 + $0x138] sm:$0xff]  ;;  %v4910_v5 = vld [vmem:[#allocation11 + $0xa0] sm:$0xff] }
  0x9e   : > { %3618 = vmatpush3.msra.mxu1 %v4793_v32  ;;  %1194 = vmatpush1.msra.mxu0 %v4795_v33  ;;  %6338 = vst [vmem:[#allocation41_spill] sm:$0xff] %v4904_v3  ;;  %6339 = vst [vmem:[#allocation42_spill] sm:$0xff] %v4906_v4  ;;  %v4912_v6 = vld [vmem:[#allocation11 + $0x130] sm:$0xff]  ;;  %v4916_v7 = vld [vmem:[#allocation11 + $0x88] sm:$0xff] }
  0x9f   : > { %3619 = vmatprep.subr.mxu1 %v6113_v9  ;;  %1195 = vmatprep.subr.mxu0 %v4799_v34  ;;  %6340 = vst [vmem:[#allocation43_spill] sm:$0xff] %v4910_v5  ;;  %6341 = vst [vmem:[#allocation44_spill] sm:$0xff] %v4912_v6  ;;  %v4918_v8 = vld [vmem:[#allocation11 + $0x118] sm:$0xff]  ;;  %v4922_v10 = vld [vmem:[#allocation11 + $0x80] sm:$0xff] }
  0xa0   : > { %3620 = vmatpush3.msra.mxu1 %v4803_v35  ;;  %1196 = vmatpush1.msra.mxu0 %v4805_v36  ;;  %6342 = vst [vmem:[#allocation45_spill] sm:$0xff] %v4916_v7  ;;  %6343 = vst [vmem:[#allocation46_spill] sm:$0xff] %v4918_v8  ;;  %v4924_v11 = vld [vmem:[#allocation11 + $0x110] sm:$0xff]  ;;  %v4928_v12 = vld [vmem:[#allocation11 + $0x68] sm:$0xff] }
  0xa1   : > { %3621 = vmatprep.subr.mxu1 %v6113_v9  ;;  %1197 = vmatprep.subr.mxu0 %v4809_v37  ;;  %6344 = vst [vmem:[#allocation47_spill] sm:$0xff] %v4922_v10  ;;  %6345 = vst [vmem:[#allocation48_spill] sm:$0xff] %v4924_v11  ;;  %v4930_v13 = vld [vmem:[#allocation11 + $0xf8] sm:$0xff] }
  0xa2   : > { %3622 = vmatpush3.msra.mxu1 %v4813_v38  ;;  %1198 = vmatpush1.msra.mxu0 %v4815_v39  ;;  %6346 = vst [vmem:[#allocation49_spill] sm:$0xff] %v4928_v12  ;;  %6347 = vst [vmem:[#allocation50_spill] sm:$0xff] %v4930_v13 }
  0xa3   : > { %3623 = vmatprep.subr.mxu1 %v6113_v9  ;;  %1199 = vmatprep.subr.mxu0 %v4819_v40 }
  0xa4   : > { %3624 = vmatpush3.msra.mxu1 %v4823_v41  ;;  %1200 = vmatpush1.msra.mxu0 %v4825_v42 }
  0xa5   : > { %3625 = vmatprep.mubr.msk.f32.mxu1 %vm4513_vm3, %v6113_v9  ;;  %1201 = vmatprep.subr.mxu0 %v4829_v43  ;;  %v4936_v9 = vld [vmem:[#allocation11 + $0xf0] sm:$0xff] }
  0xa6   : > { %1264 = vmatprep.subr.mxu1 %v4833_v44  ;;  %3626 = vmatmul.mubr.msk.f32.vlgmr.msra.gmra.mxu1 %vm967_vm2, %v960_v30  ;;  %v4934_v30 = vld [vmem:[#allocation11 + $0x60] sm:$0xff]  ;;  %6349 = vst [vmem:[#allocation52_spill] sm:$0xff] %v4936_v9 }
  0xa7   : > { %1202 = vmatpush1.msra.mxu0 %v4837_v45  ;;  %1265 = vmatpush1.msra.mxu1 %v4839_v46  ;;  %6348 = vst [vmem:[#allocation51_spill] sm:$0xff] %v4934_v30 }
  0xa8   : > { %1203 = vmatprep.subr.mxu0 %v4844_v47  ;;  %1266 = vmatprep.subr.mxu1 %v4846_v48 }
  0xa9   : > { %1204 = vmatpush1.msra.mxu0 %v4850_v49  ;;  %1267 = vmatpush1.msra.mxu1 %v4852_v50 }
  0xaa   : > { %1205 = vmatprep.subr.mxu0 %v4856_v51  ;;  %1268 = vmatprep.subr.mxu1 %v4858_v52 }
  0xab   : > { %1206 = vmatpush1.msra.mxu0 %v4862_v53  ;;  %1269 = vmatpush1.msra.mxu1 %v4864_v54 }
  0xac   : > { %1207 = vmatprep.subr.mxu0 %v4868_v55  ;;  %1270 = vmatprep.subr.mxu1 %v4870_v56 }
  0xad   : > { %1208 = vmatpush1.msra.mxu0 %v4874_v57  ;;  %1271 = vmatpush1.msra.mxu1 %v4876_v58 }
  0xae   : > { %1209 = vmatprep.subr.mxu0 %v4880_v59  ;;  %1272 = vmatprep.subr.mxu1 %v4882_v60 }
  0xaf   : > { %1210 = vmatpush1.msra.mxu0 %v4886_v61  ;;  %1273 = vmatpush1.msra.mxu1 %v4888_v62 }
  0xb0   : > { %1211 = vmatprep.subr.mxu0 %v4892_v63  ;;  %1274 = vmatprep.subr.mxu1 %v4894_v0 }
  0xb1   : > { %1212 = vmatpush1.msra.mxu0 %v4898_v1  ;;  %1275 = vmatpush1.msra.mxu1 %v4900_v2 }
  0xb2   : > { %1213 = vmatprep.subr.mxu0 %v4904_v3  ;;  %1276 = vmatprep.subr.mxu1 %v4906_v4  ;;  %v4940_v4 = vld [vmem:[#allocation11 + $0x48] sm:$0xff] }
  0xb3   : > { %1214 = vmatpush1.msra.mxu0 %v4910_v5  ;;  %1277 = vmatpush1.msra.mxu1 %v4912_v6  ;;  %6350 = vst [vmem:[#allocation53_spill] sm:$0xff] %v4940_v4  ;;  %v4942_v5 = vld [vmem:[#allocation11 + $0xd8] sm:$0xff]  ;;  %v4946_v6 = vld [vmem:[#allocation11 + $0x40] sm:$0xff] }
  0xb4   : > { %1215 = vmatprep.subr.mxu0 %v4916_v7  ;;  %1278 = vmatprep.subr.mxu1 %v4918_v8  ;;  %6351 = vst [vmem:[#allocation54_spill] sm:$0xff] %v4942_v5  ;;  %6352 = vst [vmem:[#allocation55_spill] sm:$0xff] %v4946_v6  ;;  %v4948_v7 = vld [vmem:[#allocation11 + $0xd0] sm:$0xff]  ;;  %v4952_v8 = vld [vmem:[#allocation11 + $0x28] sm:$0xff] }
  0xb5   : > { %1216 = vmatpush1.msra.mxu0 %v4922_v10  ;;  %1279 = vmatpush1.msra.mxu1 %v4924_v11  ;;  %6353 = vst [vmem:[#allocation56_spill] sm:$0xff] %v4948_v7  ;;  %6354 = vst [vmem:[#allocation57_spill] sm:$0xff] %v4952_v8  ;;  %v4954_v10 = vld [vmem:[#allocation11 + $0xb8] sm:$0xff]  ;;  %v4958_v11 = vld [vmem:[#allocation11 + $0x20] sm:$0xff] }
  0xb6   : > { %1217 = vmatprep.subr.mxu0 %v4928_v12  ;;  %1280 = vmatprep.subr.mxu1 %v4930_v13  ;;  %6355 = vst [vmem:[#allocation58_spill] sm:$0xff] %v4954_v10  ;;  %6356 = vst [vmem:[#allocation59_spill] sm:$0xff] %v4958_v11  ;;  %v4960_v12 = vld [vmem:[#allocation11 + $0xb0] sm:$0xff]  ;;  %v4964_v13 = vld [vmem:[#allocation11 + $0x8] sm:$0xff] }
  0xb7   : > { %1218 = vmatpush1.msra.mxu0 %v4934_v30  ;;  %1281 = vmatpush1.msra.mxu1 %v4936_v9  ;;  %6357 = vst [vmem:[#allocation60_spill] sm:$0xff] %v4960_v12  ;;  %6358 = vst [vmem:[#allocation61_spill] sm:$0xff] %v4964_v13  ;;  %v4966_v30 = vld [vmem:[#allocation11 + $0x98] sm:$0xff]  ;;  %v4970_v9 = vld [vmem:[#allocation11] sm:$0xff] }
  0xb8   : > { %1219 = vmatprep.subr.mxu0 %v4940_v4  ;;  %1282 = vmatprep.subr.mxu1 %v4942_v5  ;;  %6359 = vst [vmem:[#allocation62_spill] sm:$0xff] %v4966_v30  ;;  %6360 = vst [vmem:[#allocation63_spill] sm:$0xff] %v4970_v9  ;;  %v4974_v5 = vld [vmem:[#allocation11 + $0x90] sm:$0xff]  ;;  %v962_v4 = vld [vmem:[#allocation17] sm:$0xf] }
  0xb9   : > { %1220 = vmatpush1.msra.mxu0 %v4946_v6  ;;  %1283 = vmatpush1.msra.mxu1 %v4948_v7  ;;  %6361 = vst [vmem:[#allocation64_spill] sm:$0xff] %v4974_v5  ;;  %v4978_v7 = vld [vmem:[#allocation11 + $0x78] sm:$0xff] }
  0xba   : > { %1221 = vmatprep.subr.mxu0 %v4952_v8  ;;  %1284 = vmatprep.subr.mxu1 %v4954_v10  ;;  %6362 = vst [vmem:[#allocation65_spill] sm:$0xff] %v4978_v7  ;;  %v6363_v8 = vmov 0.0   ;;  %v4982_v10 = vld [vmem:[#allocation11 + $0x70] sm:$0xff] }
  0xbb   : > { %1222 = vmatpush1.msra.mxu0 %v4958_v11  ;;  %1285 = vmatpush1.msra.mxu1 %v4960_v12  ;;  %6364 = vst [vmem:[#allocation66_spill] sm:$0xff] %v4982_v10  ;;  %v4985_v11 = vld [vmem:[#allocation11 + $0x58] sm:$0xff]  ;;  %v4988_v12 = vld [vmem:[#allocation11 + $0x50] sm:$0xff] }
  0xbc   : > { %1223 = vmatprep.subr.mxu0 %v4964_v13  ;;  %1286 = vmatprep.subr.mxu1 %v4966_v30  ;;  %6365 = vst [vmem:[#allocation67_spill] sm:$0xff] %v4985_v11  ;;  %6366 = vst [vmem:[#allocation68_spill] sm:$0xff] %v4988_v12  ;;  %v4992_v30 = vld [vmem:[#allocation11 + $0x38] sm:$0xff]  ;;  %v5101_v13 = vld [vmem:[#allocation12 + $0xa0] sm:$0xff] }
  0xbd   : > { %1224 = vmatpush1.msra.mxu0 %v4970_v9  ;;  %1257 = vmatprep.mubr.f32.mxu0 %v6363_v8  ;;  %6367 = vst [vmem:[#allocation69_spill] sm:$0xff] %v4992_v30  ;;  %v4996_v9 = vld [vmem:[#allocation11 + $0x30] sm:$0xff]  ;;  %6400 = vst [vmem:[#allocation102_spill] sm:$0xff] %v5101_v13 }
  0xbe   : > { %1287 = vmatpush1.msra.mxu1 %v4974_v5  ;;  %1258 = vmatmul.mubr.f32.vlgmr.msra.gmra.mxu0 %v962_v4  ;;  %6368 = vst [vmem:[#allocation70_spill] sm:$0xff] %v4996_v9  ;;  %v4999_v5 = vld [vmem:[#allocation11 + $0x18] sm:$0xff] }
  0xbf   : > { %1288 = vmatprep.subr.mxu1 %v4978_v7  ;;  %1328 = vmatprep.mubr.f32.mxu1 %v6363_v8  ;;  %6369 = vst [vmem:[#allocation71_spill] sm:$0xff] %v4999_v5  ;;  %v5002_v7 = vld [vmem:[#allocation11 + $0x10] sm:$0xff] }
  0xc0   : > { %1289 = vmatpush1.msra.mxu1 %v4982_v10  ;;  %1433 = vmatprep.mubr.f32.mxu0 %v6363_v8  ;;  %6370 = vst [vmem:[#allocation72_spill] sm:$0xff] %v5002_v7  ;;  %v5091_v10 = vld [vmem:[#allocation12 + $0xb8] sm:$0xff] }
  0xc1   : > { %1290 = vmatprep.subr.mxu1 %v4985_v11  ;;  %v5010_v11 = vld [vmem:[#allocation12 + $0x170] sm:$0xff]  ;;  %6397 = vst [vmem:[#allocation99_spill] sm:$0xff] %v5091_v10 }
  0xc2   : > { %1291 = vmatpush1.msra.mxu1 %v4988_v12  ;;  %6371 = vst [vmem:[#allocation73_spill] sm:$0xff] %v5010_v11  ;;  %1369 = vmatprep.subr.mxu0 %v5010_v11  ;;  %v5013_v12 = vld [vmem:[#allocation12 + $0x168] sm:$0xff]  ;;  %v5081_v11 = vld [vmem:[#allocation12 + $0xc0] sm:$0xff] }
  0xc3   : > { %1292 = vmatprep.subr.mxu1 %v4992_v30  ;;  %6372 = vst [vmem:[#allocation74_spill] sm:$0xff] %v5013_v12  ;;  %v5015_v30 = vld [vmem:[#allocation12 + $0x178] sm:$0xff]  ;;  %1370 = vmatpush1.msra.mxu0 %v5013_v12  ;;  %v5035_v12 = vld [vmem:[#allocation12 + $0x148] sm:$0xff]  ;;  %6393 = vst [vmem:[#allocation95_spill] sm:$0xff] %v5081_v11 }
  0xc4   : > { %1293 = vmatpush1.msra.mxu1 %v4996_v9  ;;  %6373 = vst [vmem:[#allocation75_spill] sm:$0xff] %v5015_v30  ;;  %v5029_v9 = vld [vmem:[#allocation12 + $0x140] sm:$0xff]  ;;  %6379 = vst [vmem:[#allocation81_spill] sm:$0xff] %v5035_v12 }
  0xc5   : > { %1294 = vmatprep.subr.mxu1 %v4999_v5  ;;  %v5019_v5 = vld [vmem:[#allocation12 + $0x158] sm:$0xff]  ;;  %6377 = vst [vmem:[#allocation79_spill] sm:$0xff] %v5029_v9 }
  0xc6   : > { %1295 = vmatpush1.msra.mxu1 %v5002_v7  ;;  %6374 = vst [vmem:[#allocation76_spill] sm:$0xff] %v5019_v5  ;;  %1371 = vmatprep.subr.mxu0 %v5019_v5  ;;  %v5025_v7 = vld [vmem:[#allocation12 + $0x160] sm:$0xff]  ;;  %v5039_v5 = vld [vmem:[#allocation12 + $0x128] sm:$0xff] }
  0xc7   : > { %1329 = vmatmul.mubr.f32.vlgmr.msra.gmra.mxu1 %v962_v4  ;;  %3628 = vmatprep.subr.mxu1 %v6363_v8  ;;  %v5023_v4 = vld [vmem:[#allocation12 + $0x150] sm:$0xff]  ;;  %6376 = vst [vmem:[#allocation78_spill] sm:$0xff] %v5025_v7  ;;  %6380 = vst [vmem:[#allocation82_spill] sm:$0xff] %v5039_v5 }
  0xc8   : > { %3660 = vmatprep.mubr.msk.f32.mxu1 %vm4513_vm3, %v6363_v8  ;;  %3629 = vmatpush3.msra.mxu1 %v5015_v30  ;;  %6375 = vst [vmem:[#allocation77_spill] sm:$0xff] %v5023_v4  ;;  %v5033_v30 = vld [vmem:[#allocation12 + $0x138] sm:$0xff] }
  0xc9   : > { %3630 = vmatprep.subr.mxu1 %v6363_v8  ;;  %1372 = vmatpush1.msra.mxu0 %v5023_v4  ;;  %6378 = vst [vmem:[#allocation80_spill] sm:$0xff] %v5033_v30  ;;  %v5045_v4 = vld [vmem:[#allocation12 + $0x130] sm:$0xff] }
  0xca   : > { %3631 = vmatpush3.msra.mxu1 %v5025_v7  ;;  %1373 = vmatprep.subr.mxu0 %v5029_v9  ;;  %v5043_v7 = vld [vmem:[#allocation12 + $0x120] sm:$0xff]  ;;  %6382 = vst [vmem:[#allocation84_spill] sm:$0xff] %v5045_v4  ;;  %v5049_v9 = vld [vmem:[#allocation12 + $0x110] sm:$0xff] }
  0xcb   : > { %3632 = vmatprep.subr.mxu1 %v6363_v8  ;;  %1374 = vmatpush1.msra.mxu0 %v5033_v30  ;;  %6381 = vst [vmem:[#allocation83_spill] sm:$0xff] %v5043_v7  ;;  %6383 = vst [vmem:[#allocation85_spill] sm:$0xff] %v5049_v9  ;;  %v5055_v30 = vld [vmem:[#allocation12 + $0x118] sm:$0xff] }
  0xcc   : > { %3633 = vmatpush3.msra.mxu1 %v5035_v12  ;;  %1375 = vmatprep.subr.mxu0 %v5039_v5  ;;  %v5053_v12 = vld [vmem:[#allocation12 + $0x108] sm:$0xff]  ;;  %6385 = vst [vmem:[#allocation87_spill] sm:$0xff] %v5055_v30  ;;  %v5059_v5 = vld [vmem:[#allocation12 + $0xf8] sm:$0xff] }
  0xcd   : > { %3634 = vmatprep.subr.mxu1 %v6363_v8  ;;  %1376 = vmatpush1.msra.mxu0 %v5043_v7  ;;  %6384 = vst [vmem:[#allocation86_spill] sm:$0xff] %v5053_v12  ;;  %6386 = vst [vmem:[#allocation88_spill] sm:$0xff] %v5059_v5  ;;  %v5065_v7 = vld [vmem:[#allocation12 + $0x100] sm:$0xff] }
  0xce   : > { %3635 = vmatpush3.msra.mxu1 %v5045_v4  ;;  %1377 = vmatprep.subr.mxu0 %v5049_v9  ;;  %v5063_v4 = vld [vmem:[#allocation12 + $0xf0] sm:$0xff]  ;;  %6388 = vst [vmem:[#allocation90_spill] sm:$0xff] %v5065_v7  ;;  %v5069_v9 = vld [vmem:[#allocation12 + $0xe0] sm:$0xff] }
  0xcf   : > { %3636 = vmatprep.subr.mxu1 %v6363_v8  ;;  %1378 = vmatpush1.msra.mxu0 %v5053_v12  ;;  %6387 = vst [vmem:[#allocation89_spill] sm:$0xff] %v5063_v4  ;;  %6389 = vst [vmem:[#allocation91_spill] sm:$0xff] %v5069_v9  ;;  %v5075_v12 = vld [vmem:[#allocation12 + $0xe8] sm:$0xff] }
  0xd0   : > { %3637 = vmatpush3.msra.mxu1 %v5055_v30  ;;  %1379 = vmatprep.subr.mxu0 %v5059_v5  ;;  %v5073_v30 = vld [vmem:[#allocation12 + $0xd8] sm:$0xff]  ;;  %6391 = vst [vmem:[#allocation93_spill] sm:$0xff] %v5075_v12  ;;  %v5077_v5 = vld [vmem:[#allocation12 + $0xc8] sm:$0xff] }
  0xd1   : > { %3638 = vmatprep.subr.mxu1 %v6363_v8  ;;  %1380 = vmatpush1.msra.mxu0 %v5063_v4  ;;  %6390 = vst [vmem:[#allocation92_spill] sm:$0xff] %v5073_v30  ;;  %6392 = vst [vmem:[#allocation94_spill] sm:$0xff] %v5077_v5  ;;  %v5083_v4 = vld [vmem:[#allocation12 + $0xd0] sm:$0xff] }
  0xd2   : > { %3639 = vmatpush3.msra.mxu1 %v5065_v7  ;;  %1381 = vmatprep.subr.mxu0 %v5069_v9  ;;  %6394 = vst [vmem:[#allocation96_spill] sm:$0xff] %v5083_v4  ;;  %v5085_v7 = vld [vmem:[#allocation12 + $0xb0] sm:$0xff]  ;;  %v5089_v9 = vld [vmem:[#allocation12 + $0xa8] sm:$0xff] }
  0xd3   : > { %3640 = vmatprep.subr.mxu1 %v6363_v8  ;;  %1382 = vmatpush1.msra.mxu0 %v5073_v30  ;;  %6395 = vst [vmem:[#allocation97_spill] sm:$0xff] %v5085_v7  ;;  %6396 = vst [vmem:[#allocation98_spill] sm:$0xff] %v5089_v9  ;;  %v5095_v30 = vld [vmem:[#allocation12 + $0x98] sm:$0xff] }
  0xd4   : > { %3641 = vmatpush3.msra.mxu1 %v5075_v12  ;;  %1383 = vmatprep.subr.mxu0 %v5077_v5  ;;  %6398 = vst [vmem:[#allocation100_spill] sm:$0xff] %v5095_v30  ;;  %v5099_v12 = vld [vmem:[#allocation12 + $0x90] sm:$0xff]  ;;  %v5105_v5 = vld [vmem:[#allocation12 + $0x80] sm:$0xff] }
  0xd5   : > { %3642 = vmatprep.subr.mxu1 %v6363_v8  ;;  %1384 = vmatpush1.msra.mxu0 %v5081_v11  ;;  %6399 = vst [vmem:[#allocation101_spill] sm:$0xff] %v5099_v12  ;;  %6401 = vst [vmem:[#allocation103_spill] sm:$0xff] %v5105_v5  ;;  %v5111_v11 = vld [vmem:[#allocation12 + $0x88] sm:$0xff] }
  0xd6   : > { %3643 = vmatpush3.msra.mxu1 %v5083_v4  ;;  %1385 = vmatprep.subr.mxu0 %v5085_v7  ;;  %v5109_v4 = vld [vmem:[#allocation12 + $0x78] sm:$0xff]  ;;  %6403 = vst [vmem:[#allocation105_spill] sm:$0xff] %v5111_v11  ;;  %v5115_v7 = vld [vmem:[#allocation12 + $0x68] sm:$0xff] }
  0xd7   : > { %3644 = vmatprep.subr.mxu1 %v6363_v8  ;;  %1386 = vmatpush1.msra.mxu0 %v5089_v9  ;;  %6402 = vst [vmem:[#allocation104_spill] sm:$0xff] %v5109_v4  ;;  %6404 = vst [vmem:[#allocation106_spill] sm:$0xff] %v5115_v7  ;;  %v5121_v9 = vld [vmem:[#allocation12 + $0x70] sm:$0xff] }
  0xd8   : > { %3645 = vmatpush3.msra.mxu1 %v5091_v10  ;;  %1387 = vmatprep.subr.mxu0 %v5095_v30  ;;  %v5119_v10 = vld [vmem:[#allocation12 + $0x60] sm:$0xff]  ;;  %6406 = vst [vmem:[#allocation108_spill] sm:$0xff] %v5121_v9  ;;  %v5125_v30 = vld [vmem:[#allocation12 + $0x50] sm:$0xff] }
  0xd9   : > { %3646 = vmatprep.subr.mxu1 %v6363_v8  ;;  %1388 = vmatpush1.msra.mxu0 %v5099_v12  ;;  %6405 = vst [vmem:[#allocation107_spill] sm:$0xff] %v5119_v10  ;;  %6407 = vst [vmem:[#allocation109_spill] sm:$0xff] %v5125_v30  ;;  %v5131_v12 = vld [vmem:[#allocation12 + $0x58] sm:$0xff] }
  0xda   : > { %3647 = vmatpush3.msra.mxu1 %v5101_v13  ;;  %1389 = vmatprep.subr.mxu0 %v5105_v5  ;;  %v5129_v13 = vld [vmem:[#allocation12 + $0x48] sm:$0xff]  ;;  %6409 = vst [vmem:[#allocation111_spill] sm:$0xff] %v5131_v12  ;;  %v5135_v5 = vld [vmem:[#allocation12 + $0x38] sm:$0xff] }
  0xdb   : > { %3648 = vmatprep.subr.mxu1 %v6363_v8  ;;  %1390 = vmatpush1.msra.mxu0 %v5109_v4  ;;  %6408 = vst [vmem:[#allocation110_spill] sm:$0xff] %v5129_v13  ;;  %6410 = vst [vmem:[#allocation112_spill] sm:$0xff] %v5135_v5  ;;  %v5141_v4 = vld [vmem:[#allocation12 + $0x40] sm:$0xff] }
  0xdc   : > { %3649 = vmatpush3.msra.mxu1 %v5111_v11  ;;  %1391 = vmatprep.subr.mxu0 %v5115_v7  ;;  %v5139_v11 = vld [vmem:[#allocation12 + $0x30] sm:$0xff]  ;;  %6412 = vst [vmem:[#allocation114_spill] sm:$0xff] %v5141_v4  ;;  %v5145_v7 = vld [vmem:[#allocation12 + $0x20] sm:$0xff] }
  0xdd   : > { %3650 = vmatprep.subr.mxu1 %v6363_v8  ;;  %1392 = vmatpush1.msra.mxu0 %v5119_v10  ;;  %6411 = vst [vmem:[#allocation113_spill] sm:$0xff] %v5139_v11  ;;  %6413 = vst [vmem:[#allocation115_spill] sm:$0xff] %v5145_v7  ;;  %v5151_v10 = vld [vmem:[#allocation12 + $0x28] sm:$0xff] }
  0xde   : > { %3651 = vmatpush3.msra.mxu1 %v5121_v9  ;;  %1393 = vmatprep.subr.mxu0 %v5125_v30  ;;  %v5149_v9 = vld [vmem:[#allocation12 + $0x18] sm:$0xff]  ;;  %6415 = vst [vmem:[#allocation117_spill] sm:$0xff] %v5151_v10  ;;  %v5155_v30 = vld [vmem:[#allocation12 + $0x8] sm:$0xff] }
  0xdf   : > { %3652 = vmatprep.subr.mxu1 %v6363_v8  ;;  %1394 = vmatpush1.msra.mxu0 %v5129_v13  ;;  %6414 = vst [vmem:[#allocation116_spill] sm:$0xff] %v5149_v9  ;;  %6416 = vst [vmem:[#allocation118_spill] sm:$0xff] %v5155_v30  ;;  %v5161_v13 = vld [vmem:[#allocation12 + $0x10] sm:$0xff] }
  0xe0   : > { %3653 = vmatpush3.msra.mxu1 %v5131_v12  ;;  %1395 = vmatprep.subr.mxu0 %v5135_v5  ;;  %v5159_v12 = vld [vmem:[#allocation12] sm:$0xff]  ;;  %6418 = vst [vmem:[#allocation120_spill] sm:$0xff] %v5161_v13 }
  0xe1   : > { %3654 = vmatprep.subr.mxu1 %v6363_v8  ;;  %1396 = vmatpush1.msra.mxu0 %v5139_v11  ;;  %6417 = vst [vmem:[#allocation119_spill] sm:$0xff] %v5159_v12  ;;  %v762_v11 = vlaneseq }
  0xe2   : > { %3655 = vmatpush3.msra.mxu1 %v5141_v4  ;;  %1397 = vmatprep.subr.mxu0 %v5145_v7 }
  0xe3   : > { %3656 = vmatprep.subr.mxu1 %v6363_v8  ;;  %1398 = vmatpush1.msra.mxu0 %v5149_v9  ;;  %v5171_v4 = vshrl.u32 %v762_v11, 7 }
  0xe4   : > { %3657 = vmatpush3.msra.mxu1 %v5151_v10  ;;  %1399 = vmatprep.subr.mxu0 %v5155_v30  ;;  %v760_v10 = vld [vmem:[#allocation8] sm:$0x1f] }
  0xe5   : > { %3658 = vmatprep.subr.mxu1 %v6363_v8  ;;  %1400 = vmatpush1.msra.mxu0 %v5159_v12  ;;  %v6199_v7 = vsub.s32 0, %v5171_v4  ;;  %v6202_v9 = vsub.s32 1, %v5171_v4  ;;  %v780_v12 = vsub.s32 4, %v5171_v4 }
  0xe6   : > { %3659 = vmatpush3.msra.mxu1 %v5161_v13  ;;  %1568 = vmatprep.subr.mxu0 %v4736_v14  ;;  %v6211_v13 = vsub.s32 2, %v5171_v4  ;;  %v776_v14 = vsub.s32 3, %v5171_v4 }
  0xe7   : > { %1639 = vmatprep.subr.mxu1 %v4738_v15  ;;  %v765_v30 = vrot.slane %v760_v10, %v6199_v7  ;;  %v769_v5 = vrot.slane %v760_v10, %v6202_v9  ;;  %v781_v1 = vrot.slane %v760_v10, %v780_v12 }
  0xe8   : > { %v773_v0 = vrot.slane %v760_v10, %v6211_v13  ;;  %v777_v63 = vrot.slane %v760_v10, %v776_v14 }
  0xe9   : > { %v783_v6 = vcombine.low %v765_v30, %v769_v5 }
  0xea   : > { %v784_v12 = vcombine.low %v773_v0, %v777_v63 }
 0x14b   : > { %v567_v15 = vpop.f32.mrf.mxu0  ;;  %v573_v11 = vpop.f32.mrf.mxu1 }
 0x14d   : > { %v569_v3 = vpop.f32.mrf.mxu0  ;;  %v575_v2 = vpop.f32.mrf.mxu1 }
 0x14e   : > { %v740_v7 = vcombine.low %v567_v15, %v569_v3  ;;  %v741_v62 = vcombine.high %v567_v15, %v569_v3  ;;  %v745_v61 = vcombine.low %v573_v11, %v575_v2  ;;  %v746_v9 = vcombine.high %v573_v11, %v575_v2 }
 0x150   : > { %v787_v60 = vadd.f32 %v783_v6, %v740_v7  ;;  %v5184_v59 = vadd.f32 %v783_v6, %v741_v62  ;;  %v793_v58 = vadd.f32 %v783_v6, %v745_v61  ;;  %v796_v57 = vadd.f32 %v783_v6, %v746_v9 }
 0x151   : > { %v644_v56 = vpop.f32.mrf.mxu1  ;;  %v3616_v55 = vpop.f32.mrf.mxu0 }
 0x152   : > { %805 = vst [vmem:[#allocation2 + $0x28] sm:$0xff] %v793_v58  ;;  %808 = vst [vmem:[#allocation2 + $0x3c] sm:$0xff] %v796_v57  ;;  %v749_v5 = vcombine.high %v3616_v55, %v3616_v55  ;;  %v795_v30 = vadd.f32 %v3616_v55, %v781_v1 }
 0x153   : > { %v646_v54 = vpop.f32.mrf.mxu1  ;;  %v721_v53 = vpop.f32.mrf.mxu0 }
 0x154   : > { %v798_v13 = vadd.f32 %v781_v1, %v749_v5  ;;  %807 = vst [vmem:[#allocation2 + $0x38] sm:$0xf] %v795_v30  ;;  %v742_v10 = vcombine.low %v644_v56, %v646_v54  ;;  %v743_v3 = vcombine.high %v644_v56, %v646_v54  ;;  %v744_v14 = vcombine.high %v721_v53, %v721_v53 }
 0x155   : > { %v789_v2 = vadd.f32 %v781_v1, %v721_v53 }
 0x156   : > { %810 = vst [vmem:[#allocation2 + $0x4c] sm:$0xf] %v798_v13  ;;  %v788_v62 = vadd.f32 %v784_v12, %v742_v10  ;;  %v5186_v7 = vadd.f32 %v784_v12, %v743_v3  ;;  %v792_v9 = vadd.f32 %v781_v1, %v744_v14  ;;  %v650_v61 = vpop.f32.mrf.mxu1 }
 0x157   : > { %801 = vst [vmem:[#allocation2 + $0x10] sm:$0xf] %v789_v2 }
 0x158   : > { %804 = vst [vmem:[#allocation2 + $0x24] sm:$0xf] %v792_v9  ;;  %v652_v57 = vpop.f32.mrf.mxu1 }
 0x159   : > { %v747_v58 = vcombine.low %v650_v61, %v652_v57  ;;  %v748_v55 = vcombine.high %v650_v61, %v652_v57 }
 0x15b   : > { %v794_v63 = vadd.f32 %v784_v12, %v747_v58  ;;  %v797_v0 = vadd.f32 %v784_v12, %v748_v55 }
 0x15c   : > { %v1037_v6 = vpop.f32.mrf.mxu1  ;;  %v1108_v56 = vpop.f32.mrf.mxu0 }
 0x15d   : > { %806 = vst [vmem:[#allocation2 + $0x30] sm:$0xff] %v794_v63  ;;  %809 = vst [vmem:[#allocation2 + $0x44] sm:$0xff] %v797_v0 }
 0x15e   : > { %v1039_v15 = vpop.f32.mrf.mxu1  ;;  %v1110_v13 = vpop.f32.mrf.mxu0 }
 0x15f   : > { %v1187_v11 = vcombine.low %v1037_v6, %v1039_v15  ;;  %v1188_v9 = vcombine.low %v1108_v56, %v1110_v13 }
 0x161   : > { %v1191_v30 = vadd.f32 %v1187_v11, %v787_v60  ;;  %v1192_v57 = vadd.f32 %v1188_v9, %v788_v62  ;;  %v963_v60 = vld [vmem:[#allocation18] sm:$0xf] }
 0x166   : > { %v5188_v54 = vpop.f32.mrf.mxu1 }
 0x168   : > { %v3627_v53 = vpop.f32.mrf.mxu1 }
 0x17e   : > { %v1259_v5 = vpop.f32.mrf.mxu0 }
 0x180   : > { %v1261_v1 = vpop.f32.mrf.mxu0 }
 0x181   : > { %v1339_v10 = vcombine.low %v1259_v5, %v1261_v1 }
 0x183   : > { %v1343_v3 = vadd.f32 %v1339_v10, %v1191_v30 }
 0x185   : > { %v3486_v14 = vmul.f32 -1.442695, %v1343_v3 }
 0x187   : > { %3955 = vpow2.f32 %v3486_v14  ;;  %v1330_v2 = vpop.f32.mrf.mxu1 }
 0x189   : > { %v1332_v12 = vpop.f32.mrf.mxu1 }
 0x18a   : > { %v1340_v61 = vcombine.low %v1330_v2, %v1332_v12 }
 0x18c   : > { %v1344_v58 = vadd.f32 %v1340_v61, %v1192_v57 }
 0x18e   : > { %v3487_v55 = vmul.f32 -1.442695, %v1344_v58  ;;  %v1358_v53 = vrot.slane %v1344_v58, 4 }
 0x190   : > { %3957 = vpow2.f32 %v3487_v55 }
 0x194   : > { %v3956_v63 = vpop.eup %3955 }
 0x195   : > { %v1351_v0 = vadd.f32 1.0, %v3956_v63  ;;  %v961_v63 = vld [vmem:[#allocation15] sm:$0xf] }
 0x197   : > { %3959 = vrcp.f32 %v1351_v0 }
 0x198   : > { %3961 = vtanh.f32 %v1358_v53 }
 0x19d   : > { %v3958_v6 = vpop.eup %3957 }
 0x19e   : > { %v1352_v1 = vadd.f32 1.0, %v3958_v6 }
 0x1a0   : > { %3963 = vrcp.f32 %v1352_v1  ;;  %v6443_v1 = vld [vmem:[#allocation48_spill] sm:$0xff] }
 0x1a4   : > { %v3960_v15 = vpop.eup %3959 }
 0x1a5   : > { %v1362_v11 = vcombine.high %v3960_v15, %v3960_v15  ;;  %v3962_v5 = vpop.eup %3961 }
 0x1a6   : > { %v1365_v10 = vmul.f32 %v3962_v5, %v3960_v15 }
 0x1a7   : > { %v1364_v30 = vmul.f32 %v1362_v11, %v963_v60 }
 0x1a9   : > { %v5190_v56 = vadd.f32 %v1365_v10, %v1364_v30  ;;  %v6444_v30 = vld [vmem:[#allocation49_spill] sm:$0xff]  ;;  %v6445_v10 = vld [vmem:[#allocation50_spill] sm:$0xff] }
 0x1ab   : > { %3965 = vtanh.f32 %v5190_v56 }
 0x1ad   : > { %v3964_v62 = vpop.eup %3963 }
 0x1b8   : > { %v3966_v13 = vpop.eup %3965 }
 0x1b9   : > { %v5193_v3 = vmul.f32 %v3966_v13, %v3964_v62  ;;  %v6446_v62 = vld [vmem:[#allocation51_spill] sm:$0xff]  ;;  %v6447_v13 = vld [vmem:[#allocation52_spill] sm:$0xff] }
 0x1bb   : > { %1434 = vmatmul.mubr.f32.vlgmr.msra.gmra.mxu0 %v5193_v3  ;;  %3661 = vmatmul.mubr.f32.vlgmr.msra.gmra.mxu1 %v5193_v3 }
 0x1bc   : > { %1569 = vmatpush1.msra.mxu0 %v4741_v16  ;;  %1640 = vmatpush1.msra.mxu1 %v4743_v17  ;;  %v943_v16 = vld [vmem:[%s6106_s6] sm:$0x7]  ;;  %v6419_v17 = vsub.s32 0, %v5171_v4 }
 0x1bd   : > { %1570 = vmatprep.subr.mxu0 %v4747_v18  ;;  %1641 = vmatprep.subr.mxu1 %v4749_v19  ;;  %v6420_v19 = vsub.s32 1, %v5171_v4 }
 0x1be   : > { %1571 = vmatpush1.msra.mxu0 %v4753_v20  ;;  %1642 = vmatpush1.msra.mxu1 %v4757_v21  ;;  %v5220_v18 = vrot.slane %v943_v16, %v6419_v17  ;;  %v6449_v17 = vld [vmem:[#allocation54_spill] sm:$0xff] }
 0x1bf   : > { %1572 = vmatprep.subr.mxu0 %v4761_v22  ;;  %1643 = vmatprep.subr.mxu1 %v4763_v23  ;;  %v5224_v20 = vrot.slane %v943_v16, %v6420_v19  ;;  %v6450_v19 = vld [vmem:[#allocation55_spill] sm:$0xff] }
 0x1c0   : > { %1573 = vmatpush1.msra.mxu0 %v4767_v24  ;;  %1644 = vmatpush1.msra.mxu1 %v4769_v25 }
 0x1c1   : > { %1574 = vmatprep.subr.mxu0 %v4773_v26  ;;  %1645 = vmatprep.subr.mxu1 %v4775_v27  ;;  %v6421_v26 = vsub.s32 2, %v5171_v4 }
 0x1c2   : > { %1575 = vmatpush1.msra.mxu0 %v4779_v28  ;;  %1646 = vmatpush1.msra.mxu1 %v4783_v29  ;;  %v966_v29 = vld [vmem:[#allocation2 + $0x10] sm:$0xf] }
 0x1c3   : > { %1608 = vmatprep.mubr.f32.mxu0 %v6363_v8  ;;  %1679 = vmatprep.mubr.f32.mxu1 %v6363_v8  ;;  %v5229_v27 = vrot.slane %v943_v16, %v6421_v26  ;;  %v6448_v16 = vld [vmem:[#allocation53_spill] sm:$0xff] }
 0x1c4   : > { %3663 = vmatprep.subr.mxu0 %v6363_v8  ;;  %1766 = vmatprep.subr.mxu1 %v4789_v31  ;;  %v6456_v26 = vld [vmem:[#allocation61_spill] sm:$0xff] }
 0x27b   : > { %v1435_v21 = vpop.f32.mrf.mxu0  ;;  %v1506_v22 = vpop.f32.mrf.mxu1 }
 0x27c   : > { %v1436_v23 = vadd.f32 %v1435_v21, %v5220_v18  ;;  %v1507_v2 = vadd.f32 %v1506_v22, %v5229_v27  ;;  %v6451_v21 = vld [vmem:[#allocation56_spill] sm:$0xff]  ;;  %v6452_v22 = vld [vmem:[#allocation57_spill] sm:$0xff] }
 0x27d   : > { %v1437_v24 = vpop.f32.mrf.mxu0  ;;  %v3662_v25 = vpop.f32.mrf.mxu1 }
 0x27e   : > { %v1438_v28 = vadd.f32 %v1437_v24, %v5224_v20  ;;  %v1510_v31 = vmul.f32 %v1436_v23, %v966_v29  ;;  %v6453_v23 = vld [vmem:[#allocation58_spill] sm:$0xff]  ;;  %v6454_v24 = vld [vmem:[#allocation59_spill] sm:$0xff]  ;;  %v6455_v25 = vld [vmem:[#allocation60_spill] sm:$0xff] }
 0x27f   : > { %v6458_v29 = vld [vmem:[#allocation63_spill] sm:$0xff] }
 0x280   : > { %v1511_v14 = vmul.f32 %v1438_v28, %v5188_v54  ;;  %v6457_v28 = vld [vmem:[#allocation62_spill] sm:$0xff] }
 0x282   : > { %v1512_v9 = vadd.f32 %v1511_v14, %v1510_v31  ;;  %v6459_v31 = vld [vmem:[#allocation64_spill] sm:$0xff]  ;;  %v6460_v14 = vld [vmem:[#allocation65_spill] sm:$0xff] }
 0x284   : > { %v1513_v12 = vadd.f32 %v1512_v9, %v1507_v2  ;;  %v6461_v2 = vld [vmem:[#allocation66_spill] sm:$0xff]  ;;  %v6462_v9 = vld [vmem:[#allocation73_spill] sm:$0xff] }
 0x286   : > { %v3488_v61 = vmul.f32 -1.442695, %v1513_v12 }
 0x288   : > { %3967 = vpow2.f32 %v3488_v61  ;;  %v6464_v61 = vld [vmem:[#allocation74_spill] sm:$0xff] }
 0x295   : > { %v3968_v57 = vpop.eup %3967 }
 0x296   : > { %v1517_v58 = vadd.f32 1.0, %v3968_v57  ;;  %v6465_v57 = vld [vmem:[#allocation68_spill] sm:$0xff] }
 0x298   : > { %3969 = vrcp.f32 %v1517_v58  ;;  %v6466_v58 = vld [vmem:[#allocation76_spill] sm:$0xff] }
 0x299   : > { %3971 = vtanh.f32 %v1513_v12  ;;  %v6463_v12 = vld [vmem:[#allocation67_spill] sm:$0xff] }
 0x2a5   : > { %v3970_v55 = vpop.eup %3969 }
 0x2a6   : > { %1533 = vrot.lane.b32.xlu1 %v3970_v55, %s4514_s16  ;;  %1522 = vrot.lane.b32.xlu0 %v3970_v55, %s4515_s20  ;;  %v3972_v4 = vpop.eup %3971 }
 0x2aa   : > { %1527 = vrot.lane.b32.xlu0 %v3972_v4, %s4516_s21  ;;  %v6468_v4 = vld [vmem:[#allocation77_spill] sm:$0xff] }
 0x318   : > { %v1523_v54 = vpop.permute.xlu0 %1522  ;;  %v1534_v11 = vpop.permute.xlu1 %1533 }
 0x319   : > { %v1525_v53 = vmul.f32 %v1523_v54, %v961_v63  ;;  %v6469_v54 = vld [vmem:[#allocation70_spill] sm:$0xff]  ;;  %v6470_v63 = vld [vmem:[#allocation79_spill] sm:$0xff] }
 0x31c   : > { %v1528_v0 = vpop.permute.xlu0 %1527 }
 0x31d   : > { %v1530_v6 = vmul.f32 %v3970_v55, %v1528_v0  ;;  %v6467_v55 = vld [vmem:[#allocation69_spill] sm:$0xff]  ;;  %v6471_v0 = vld [vmem:[#allocation71_spill] sm:$0xff] }
 0x31f   : > { %v5237_v15 = vadd.f32 %v1530_v6, %v1525_v53  ;;  %v6472_v53 = vld [vmem:[#allocation80_spill] sm:$0xff] }
 0x320   : > { %v6473_v6 = vld [vmem:[#allocation72_spill] sm:$0xff] }
 0x321   : > { %3973 = vtanh.f32 %v5237_v15 }
 0x32e   : > { %v3974_v60 = vpop.eup %3973 }
 0x32f   : > { %v1536_v5 = vmul.f32 %v3974_v60, %v1534_v11  ;;  %v6474_v60 = vld [vmem:[#allocation82_spill] sm:$0xff]  ;;  %v6475_v11 = vld [vmem:[#allocation75_spill] sm:$0xff] }
 0x331   : > { %3489 = vmatmul.mubr.msk.f32.vlgmr.msra.gmra.mxu0 %vm967_vm2, %v1536_v5  ;;  %3490 = vmatmul.mubr.msk.f32.vlgmr.msra.gmra.mxu1 %vm967_vm2, %v1536_v5 }
 0x332   : > { %3664 = vmatpush3.msra.mxu0 %v4793_v32  ;;  %1767 = vmatpush1.msra.mxu1 %v4795_v33  ;;  %v6422_v32 = vld [vmem:[#allocation27_spill] sm:$0xff]  ;;  %v6423_v33 = vld [vmem:[#allocation28_spill] sm:$0xff] }
 0x333   : > { %3665 = vmatprep.subr.mxu0 %v6363_v8  ;;  %1768 = vmatprep.subr.mxu1 %v4799_v34  ;;  %v6424_v34 = vld [vmem:[#allocation29_spill] sm:$0xff] }
 0x334   : > { %3666 = vmatpush3.msra.mxu0 %v4803_v35  ;;  %1769 = vmatpush1.msra.mxu1 %v4805_v36  ;;  %v6425_v35 = vld [vmem:[#allocation30_spill] sm:$0xff]  ;;  %v6426_v36 = vld [vmem:[#allocation31_spill] sm:$0xff] }
 0x335   : > { %3667 = vmatprep.subr.mxu0 %v6363_v8  ;;  %1770 = vmatprep.subr.mxu1 %v4809_v37  ;;  %v6427_v37 = vld [vmem:[#allocation32_spill] sm:$0xff] }
 0x336   : > { %3668 = vmatpush3.msra.mxu0 %v4813_v38  ;;  %1771 = vmatpush1.msra.mxu1 %v4815_v39  ;;  %v6428_v38 = vld [vmem:[#allocation33_spill] sm:$0xff]  ;;  %v6429_v39 = vld [vmem:[#allocation34_spill] sm:$0xff] }
 0x337   : > { %3669 = vmatprep.subr.mxu0 %v6363_v8  ;;  %1772 = vmatprep.subr.mxu1 %v4819_v40  ;;  %v6430_v40 = vld [vmem:[#allocation35_spill] sm:$0xff] }
 0x338   : > { %3670 = vmatpush3.msra.mxu0 %v4823_v41  ;;  %3671 = vmatprep.mubr.msk.f32.mxu0 %vm4513_vm3, %v6363_v8  ;;  %v6431_v41 = vld [vmem:[#allocation36_spill] sm:$0xff] }
 0x339   : > { %1773 = vmatpush1.msra.mxu1 %v4825_v42  ;;  %3672 = vmatmul.mubr.msk.f32.vlgmr.msra.gmra.mxu0 %vm967_vm2, %v1536_v5  ;;  %v6432_v42 = vld [vmem:[#allocation37_spill] sm:$0xff]  ;;  %v6476_v5 = vld [vmem:[#allocation83_spill] sm:$0xff] }
 0x33a   : > { %1774 = vmatprep.subr.mxu1 %v4829_v43  ;;  %1837 = vmatprep.subr.mxu0 %v4833_v44  ;;  %v6433_v43 = vld [vmem:[#allocation38_spill] sm:$0xff]  ;;  %v6434_v44 = vld [vmem:[#allocation39_spill] sm:$0xff] }
 0x33b   : > { %1775 = vmatpush1.msra.mxu1 %v4837_v45  ;;  %1838 = vmatpush1.msra.mxu0 %v4839_v46  ;;  %v6435_v45 = vld [vmem:[#allocation40_spill] sm:$0xff]  ;;  %v6436_v46 = vld [vmem:[#allocation41_spill] sm:$0xff] }
 0x33c   : > { %1776 = vmatprep.subr.mxu1 %v4844_v47  ;;  %1839 = vmatprep.subr.mxu0 %v4846_v48  ;;  %v6437_v47 = vld [vmem:[#allocation42_spill] sm:$0xff]  ;;  %v6438_v48 = vld [vmem:[#allocation43_spill] sm:$0xff] }
 0x33d   : > { %1777 = vmatpush1.msra.mxu1 %v4850_v49  ;;  %1840 = vmatpush1.msra.mxu0 %v4852_v50  ;;  %v6439_v49 = vld [vmem:[#allocation44_spill] sm:$0xff]  ;;  %v6440_v50 = vld [vmem:[#allocation45_spill] sm:$0xff] }
 0x33e   : > { %1778 = vmatprep.subr.mxu1 %v4856_v51  ;;  %1841 = vmatprep.subr.mxu0 %v4858_v52  ;;  %v6441_v51 = vld [vmem:[#allocation46_spill] sm:$0xff]  ;;  %v6442_v52 = vld [vmem:[#allocation47_spill] sm:$0xff] }
 0x33f   : > { %1779 = vmatpush1.msra.mxu1 %v6422_v32  ;;  %1842 = vmatpush1.msra.mxu0 %v6423_v33  ;;  %v6477_v32 = vld [vmem:[#allocation85_spill] sm:$0xff]  ;;  %v6478_v33 = vld [vmem:[#allocation78_spill] sm:$0xff] }
 0x340   : > { %1780 = vmatprep.subr.mxu1 %v6424_v34  ;;  %1843 = vmatprep.subr.mxu0 %v6425_v35  ;;  %v6479_v34 = vld [vmem:[#allocation86_spill] sm:$0xff]  ;;  %v6480_v35 = vld [vmem:[#allocation88_spill] sm:$0xff] }
 0x341   : > { %1781 = vmatpush1.msra.mxu1 %v6426_v36  ;;  %1844 = vmatpush1.msra.mxu0 %v6427_v37  ;;  %v6481_v36 = vld [vmem:[#allocation81_spill] sm:$0xff]  ;;  %v6483_v37 = vld [vmem:[#allocation91_spill] sm:$0xff] }
 0x342   : > { %1782 = vmatprep.subr.mxu1 %v6428_v38  ;;  %1845 = vmatprep.subr.mxu0 %v6429_v39  ;;  %v6484_v38 = vld [vmem:[#allocation84_spill] sm:$0xff] }
 0x343   : > { %1783 = vmatpush1.msra.mxu1 %v6430_v40  ;;  %1846 = vmatpush1.msra.mxu0 %v6431_v41  ;;  %v6485_v39 = vld [vmem:[#allocation92_spill] sm:$0xff]  ;;  %v6486_v40 = vld [vmem:[#allocation94_spill] sm:$0xff]  ;;  %v6487_v41 = vld [vmem:[#allocation87_spill] sm:$0xff] }
 0x344   : > { %1784 = vmatprep.subr.mxu1 %v6432_v42  ;;  %1847 = vmatprep.subr.mxu0 %v6433_v43  ;;  %v6488_v42 = vld [vmem:[#allocation95_spill] sm:$0xff]  ;;  %v6489_v43 = vld [vmem:[#allocation97_spill] sm:$0xff] }
 0x345   : > { %1785 = vmatpush1.msra.mxu1 %v6434_v44  ;;  %1848 = vmatpush1.msra.mxu0 %v6435_v45  ;;  %v6490_v44 = vld [vmem:[#allocation90_spill] sm:$0xff] }
 0x346   : > { %1786 = vmatprep.subr.mxu1 %v6436_v46  ;;  %1849 = vmatprep.subr.mxu0 %v6437_v47  ;;  %v6491_v45 = vld [vmem:[#allocation98_spill] sm:$0xff]  ;;  %v6492_v46 = vld [vmem:[#allocation100_spill] sm:$0xff]  ;;  %v6493_v47 = vld [vmem:[#allocation93_spill] sm:$0xff] }
 0x347   : > { %1787 = vmatpush1.msra.mxu1 %v6438_v48  ;;  %1850 = vmatpush1.msra.mxu0 %v6439_v49  ;;  %v6494_v48 = vld [vmem:[#allocation101_spill] sm:$0xff]  ;;  %v6495_v49 = vld [vmem:[#allocation103_spill] sm:$0xff] }
 0x348   : > { %1788 = vmatprep.subr.mxu1 %v6440_v50  ;;  %1851 = vmatprep.subr.mxu0 %v6441_v51  ;;  %v6496_v50 = vld [vmem:[#allocation96_spill] sm:$0xff] }
 0x349   : > { %1789 = vmatpush1.msra.mxu1 %v6442_v52  ;;  %1852 = vmatpush1.msra.mxu0 %v6443_v1  ;;  %v6497_v51 = vld [vmem:[#allocation104_spill] sm:$0xff]  ;;  %v6498_v52 = vld [vmem:[#allocation106_spill] sm:$0xff]  ;;  %v6499_v1 = vld [vmem:[#allocation99_spill] sm:$0xff] }
 0x34a   : > { %1790 = vmatprep.subr.mxu1 %v6444_v30  ;;  %1853 = vmatprep.subr.mxu0 %v6445_v10  ;;  %v6500_v30 = vld [vmem:[#allocation107_spill] sm:$0xff]  ;;  %v6501_v10 = vld [vmem:[#allocation109_spill] sm:$0xff] }
 0x34b   : > { %1791 = vmatpush1.msra.mxu1 %v6446_v62  ;;  %1854 = vmatpush1.msra.mxu0 %v6447_v13  ;;  %v6502_v62 = vld [vmem:[#allocation102_spill] sm:$0xff] }
 0x34c   : > { %1792 = vmatprep.subr.mxu1 %v6448_v16  ;;  %1855 = vmatprep.subr.mxu0 %v6449_v17  ;;  %v6503_v13 = vld [vmem:[#allocation110_spill] sm:$0xff]  ;;  %v6504_v16 = vld [vmem:[#allocation112_spill] sm:$0xff]  ;;  %v6505_v17 = vld [vmem:[#allocation105_spill] sm:$0xff] }
 0x34d   : > { %1793 = vmatpush1.msra.mxu1 %v6450_v19  ;;  %1856 = vmatpush1.msra.mxu0 %v6451_v21  ;;  %v6506_v19 = vld [vmem:[#allocation113_spill] sm:$0xff]  ;;  %v6507_v21 = vld [vmem:[#allocation115_spill] sm:$0xff] }
 0x34e   : > { %1794 = vmatprep.subr.mxu1 %v6452_v22  ;;  %1857 = vmatprep.subr.mxu0 %v6453_v23  ;;  %v6508_v22 = vld [vmem:[#allocation108_spill] sm:$0xff] }
 0x34f   : > { %1795 = vmatpush1.msra.mxu1 %v6454_v24  ;;  %1858 = vmatpush1.msra.mxu0 %v6455_v25  ;;  %v6509_v23 = vld [vmem:[#allocation116_spill] sm:$0xff]  ;;  %v6510_v24 = vld [vmem:[#allocation118_spill] sm:$0xff]  ;;  %v6511_v25 = vld [vmem:[#allocation111_spill] sm:$0xff] }
 0x350   : > { %1796 = vmatprep.subr.mxu1 %v6456_v26  ;;  %1859 = vmatprep.subr.mxu0 %v6457_v28  ;;  %v6512_v26 = vld [vmem:[#allocation119_spill] sm:$0xff]  ;;  %v6513_v28 = vld [vmem:[#allocation114_spill] sm:$0xff] }
 0x351   : > { %1797 = vmatpush1.msra.mxu1 %v6458_v29  ;;  %1830 = vmatprep.mubr.f32.mxu1 %v6363_v8  ;;  %v5383_v29 = vld [vmem:[#allocation9 + $0x80] sm:$0xff] }
 0x352   : > { %1860 = vmatpush1.msra.mxu0 %v6459_v31  ;;  %1831 = vmatmul.mubr.f32.vlgmr.msra.gmra.mxu1 %v5193_v3  ;;  %v6514_v31 = vld [vmem:[#allocation117_spill] sm:$0xff] }
 0x353   : > { %1861 = vmatprep.subr.mxu0 %v6460_v14  ;;  %1901 = vmatprep.mubr.f32.mxu0 %v6363_v8  ;;  %v6515_v14 = vld [vmem:[#allocation120_spill] sm:$0xff] }
 0x354   : > { %1862 = vmatpush1.msra.mxu0 %v6461_v2  ;;  %1942 = vmatprep.subr.mxu1 %v6462_v9  ;;  %v5389_v2 = vld [vmem:[#allocation9 + $0x90] sm:$0xff] }
 0x355   : > { %1863 = vmatprep.subr.mxu0 %v6463_v12  ;;  %1943 = vmatpush1.msra.mxu1 %v6464_v61 }
 0x356   : > { %1864 = vmatpush1.msra.mxu0 %v6465_v57  ;;  %1944 = vmatprep.subr.mxu1 %v6466_v58 }
 0x357   : > { %1865 = vmatprep.subr.mxu0 %v6467_v55  ;;  %1945 = vmatpush1.msra.mxu1 %v6468_v4 }
 0x358   : > { %1866 = vmatpush1.msra.mxu0 %v6469_v54  ;;  %1946 = vmatprep.subr.mxu1 %v6470_v63 }
 0x359   : > { %1867 = vmatprep.subr.mxu0 %v6471_v0  ;;  %1947 = vmatpush1.msra.mxu1 %v6472_v53 }
 0x35a   : > { %1868 = vmatpush1.msra.mxu0 %v6473_v6  ;;  %1948 = vmatprep.subr.mxu1 %v6474_v60 }
 0x35b   : > { %1902 = vmatmul.mubr.f32.vlgmr.msra.gmra.mxu0 %v5193_v3  ;;  %3674 = vmatprep.subr.mxu0 %v6363_v8  ;;  %v6482_v3 = vld [vmem:[#allocation89_spill] sm:$0xff] }
 0x35c   : > { %3675 = vmatpush3.msra.mxu0 %v6475_v11  ;;  %1949 = vmatpush1.msra.mxu1 %v6476_v5 }
 0x35d   : > { %3676 = vmatprep.subr.mxu0 %v6363_v8  ;;  %1950 = vmatprep.subr.mxu1 %v6477_v32 }
 0x35e   : > { %3677 = vmatpush3.msra.mxu0 %v6478_v33  ;;  %1951 = vmatpush1.msra.mxu1 %v6479_v34 }
 0x35f   : > { %3678 = vmatprep.subr.mxu0 %v6363_v8  ;;  %1952 = vmatprep.subr.mxu1 %v6480_v35 }
 0x360   : > { %3679 = vmatpush3.msra.mxu0 %v6481_v36  ;;  %1953 = vmatpush1.msra.mxu1 %v6482_v3 }
 0x361   : > { %3680 = vmatprep.subr.mxu0 %v6363_v8  ;;  %1954 = vmatprep.subr.mxu1 %v6483_v37 }
 0x362   : > { %3681 = vmatpush3.msra.mxu0 %v6484_v38  ;;  %1955 = vmatpush1.msra.mxu1 %v6485_v39 }
 0x363   : > { %3682 = vmatprep.subr.mxu0 %v6363_v8  ;;  %1956 = vmatprep.subr.mxu1 %v6486_v40 }
 0x364   : > { %3683 = vmatpush3.msra.mxu0 %v6487_v41  ;;  %1957 = vmatpush1.msra.mxu1 %v6488_v42 }
 0x365   : > { %3684 = vmatprep.subr.mxu0 %v6363_v8  ;;  %1958 = vmatprep.subr.mxu1 %v6489_v43 }
 0x366   : > { %3685 = vmatpush3.msra.mxu0 %v6490_v44  ;;  %1959 = vmatpush1.msra.mxu1 %v6491_v45 }
 0x367   : > { %3686 = vmatprep.subr.mxu0 %v6363_v8  ;;  %1960 = vmatprep.subr.mxu1 %v6492_v46 }
 0x368   : > { %3687 = vmatpush3.msra.mxu0 %v6493_v47  ;;  %1961 = vmatpush1.msra.mxu1 %v6494_v48  ;;  %v5404_v48 = vld [vmem:[#allocation9 + $0x78] sm:$0xff] }
 0x369   : > { %3688 = vmatprep.subr.mxu0 %v6363_v8  ;;  %1962 = vmatprep.subr.mxu1 %v6495_v49  ;;  %v5407_v49 = vld [vmem:[#allocation9 + $0x88] sm:$0xff] }
 0x36a   : > { %3689 = vmatpush3.msra.mxu0 %v6496_v50  ;;  %1963 = vmatpush1.msra.mxu1 %v6497_v51  ;;  %v5413_v50 = vld [vmem:[#allocation9 + $0x68] sm:$0xff]  ;;  %v5416_v51 = vld [vmem:[#allocation9 + $0x50] sm:$0xff] }
 0x36b   : > { %3690 = vmatprep.subr.mxu0 %v6363_v8  ;;  %1964 = vmatprep.subr.mxu1 %v6498_v52  ;;  %v5419_v52 = vld [vmem:[#allocation9 + $0x60] sm:$0xff] }
 0x36c   : > { %3691 = vmatpush3.msra.mxu0 %v6499_v1  ;;  %1965 = vmatpush1.msra.mxu1 %v6500_v30  ;;  %v5422_v1 = vld [vmem:[#allocation9 + $0x30] sm:$0xff]  ;;  %v5425_v30 = vld [vmem:[#allocation9 + $0x40] sm:$0xff] }
 0x36d   : > { %3692 = vmatprep.subr.mxu0 %v6363_v8  ;;  %1966 = vmatprep.subr.mxu1 %v6501_v10  ;;  %v5428_v10 = vld [vmem:[#allocation9 + $0x28] sm:$0xff] }
 0x36e   : > { %3693 = vmatpush3.msra.mxu0 %v6502_v62  ;;  %1967 = vmatpush1.msra.mxu1 %v6503_v13  ;;  %v5431_v62 = vld [vmem:[#allocation9 + $0x38] sm:$0xff]  ;;  %v5434_v13 = vld [vmem:[#allocation9 + $0x8] sm:$0xff] }
 0x36f   : > { %3694 = vmatprep.subr.mxu0 %v6363_v8  ;;  %1968 = vmatprep.subr.mxu1 %v6504_v16  ;;  %v5437_v16 = vld [vmem:[#allocation9 + $0x18] sm:$0xff] }
 0x370   : > { %3695 = vmatpush3.msra.mxu0 %v6505_v17  ;;  %1969 = vmatpush1.msra.mxu1 %v6506_v19  ;;  %v5440_v17 = vld [vmem:[#allocation9] sm:$0xff]  ;;  %v5443_v19 = vld [vmem:[#allocation9 + $0x10] sm:$0xff] }
 0x371   : > { %3696 = vmatprep.subr.mxu0 %v6363_v8  ;;  %1970 = vmatprep.subr.mxu1 %v6507_v21  ;;  %v5449_v21 = vld [vmem:[#allocation11 + $0x1e8] sm:$0xff] }
 0x372   : > { %3697 = vmatpush3.msra.mxu0 %v6508_v22  ;;  %1971 = vmatpush1.msra.mxu1 %v6509_v23 }
 0x373   : > { %3698 = vmatprep.subr.mxu0 %v6363_v8  ;;  %1972 = vmatprep.subr.mxu1 %v6510_v24 }
 0x374   : > { %3699 = vmatpush3.msra.mxu0 %v6511_v25  ;;  %1973 = vmatpush1.msra.mxu1 %v6512_v26 }
 0x375   : > { %3700 = vmatprep.subr.mxu0 %v6363_v8  ;;  %2006 = vmatprep.mubr.f32.mxu1 %v6363_v8 }
 0x376   : > { %3701 = vmatpush3.msra.mxu0 %v6513_v28  ;;  %3706 = vmatprep.mubr.msk.f32.mxu0 %vm4513_vm3, %v6363_v8 }
 0x377   : > { %3702 = vmatprep.subr.mxu0 %v6363_v8  ;;  %2141 = vmatprep.subr.mxu1 %v5383_v29 }
 0x378   : > { %3703 = vmatpush3.msra.mxu0 %v6514_v31  ;;  %v1540_v31 = vld [vmem:[#allocation2 + $0x24] sm:$0xf] }
 0x379   : > { %3704 = vmatprep.subr.mxu0 %v6363_v8 }
 0x37a   : > { %3705 = vmatpush3.msra.mxu0 %v6515_v14 }
 0x37b   : > { %2212 = vmatprep.subr.mxu0 %v5389_v2 }
 0x3f1   : > { %v1610_v9 = vpop.f32.mrf.mxu0  ;;  %v1681_v58 = vpop.f32.mrf.mxu1 }
 0x3f3   : > { %v1612_v12 = vpop.f32.mrf.mxu0  ;;  %v1683_v55 = vpop.f32.mrf.mxu1 }
 0x3f4   : > { %v1760_v4 = vcombine.low %v1610_v9, %v1612_v12  ;;  %v1761_v5 = vcombine.low %v1681_v58, %v1683_v55 }
 0x3f6   : > { %v1764_v0 = vadd.f32 %v1760_v4, %v5184_v59  ;;  %v1765_v34 = vadd.f32 %v1761_v5, %v5186_v7 }
 0x3f9   : > { %v5392_v61 = vpop.f32.mrf.mxu0 }
 0x3fb   : > { %v3673_v57 = vpop.f32.mrf.mxu0 }
 0x412   : > { %v1832_v54 = vpop.f32.mrf.mxu1 }
 0x414   : > { %v1834_v63 = vpop.f32.mrf.mxu1 }
 0x415   : > { %v1912_v53 = vcombine.low %v1832_v54, %v1834_v63 }
 0x417   : > { %v1916_v6 = vadd.f32 %v1912_v53, %v1764_v0 }
 0x419   : > { %v3492_v60 = vmul.f32 -1.442695, %v1916_v6 }
 0x41b   : > { %3975 = vpow2.f32 %v3492_v60  ;;  %v1903_v11 = vpop.f32.mrf.mxu0 }
 0x41d   : > { %v1905_v32 = vpop.f32.mrf.mxu0 }
 0x41e   : > { %v1913_v33 = vcombine.low %v1903_v11, %v1905_v32 }
 0x420   : > { %v1917_v35 = vadd.f32 %v1913_v33, %v1765_v34  ;;  %v5465_v34 = vld [vmem:[#allocation9 + $0x98] sm:$0xff] }
 0x422   : > { %v3493_v36 = vmul.f32 -1.442695, %v1917_v35  ;;  %v1931_v38 = vrot.slane %v1917_v35, 4  ;;  %v5468_v35 = vld [vmem:[#allocation11 + $0x1e0] sm:$0xff] }
 0x424   : > { %3977 = vpow2.f32 %v3493_v36  ;;  %v5475_v36 = vld [vmem:[#allocation9 + $0x70] sm:$0xff] }
 0x428   : > { %v3976_v3 = vpop.eup %3975 }
 0x429   : > { %v1924_v37 = vadd.f32 1.0, %v3976_v3  ;;  %v5478_v3 = vld [vmem:[#allocation11 + $0x1c0] sm:$0xff] }
 0x42b   : > { %3979 = vrcp.f32 %v1924_v37  ;;  %v5482_v37 = vld [vmem:[#allocation11 + $0x1a8] sm:$0xff] }
 0x42c   : > { %3981 = vtanh.f32 %v1931_v38  ;;  %v5485_v38 = vld [vmem:[#allocation9 + $0x48] sm:$0xff] }
 0x431   : > { %v3978_v39 = vpop.eup %3977 }
 0x432   : > { %v1925_v42 = vadd.f32 1.0, %v3978_v39  ;;  %v5488_v39 = vld [vmem:[#allocation11 + $0x1a0] sm:$0xff] }
 0x434   : > { %3983 = vrcp.f32 %v1925_v42  ;;  %v5504_v42 = vld [vmem:[#allocation11 + $0x168] sm:$0xff] }
 0x438   : > { %v3980_v59 = vpop.eup %3979 }
 0x439   : > { %v1935_v40 = vcombine.high %v3980_v59, %v3980_v59  ;;  %v3982_v41 = vpop.eup %3981 }
 0x43a   : > { %v1938_v44 = vmul.f32 %v3982_v41, %v3980_v59  ;;  %v5492_v59 = vld [vmem:[#allocation11 + $0x188] sm:$0xff]  ;;  %v5500_v41 = vld [vmem:[#allocation11 + $0x180] sm:$0xff] }
 0x43b   : > { %v1937_v43 = vmul.f32 %v1935_v40, %v5190_v56  ;;  %v5410_v56 = vld [vmem:[#allocation9 + $0x58] sm:$0xff]  ;;  %v5495_v40 = vld [vmem:[#allocation9 + $0x20] sm:$0xff] }
 0x43d   : > { %v5397_v45 = vadd.f32 %v1938_v44, %v1937_v43  ;;  %v5507_v43 = vld [vmem:[#allocation11 + $0x1f8] sm:$0xff]  ;;  %v5510_v44 = vld [vmem:[#allocation11 + $0x160] sm:$0xff] }
 0x43f   : > { %3985 = vtanh.f32 %v5397_v45 }
 0x441   : > { %v3984_v7 = vpop.eup %3983 }
 0x44c   : > { %v3986_v46 = vpop.eup %3985 }
 0x44d   : > { %v5400_v47 = vmul.f32 %v3986_v46, %v3984_v7  ;;  %v5513_v7 = vld [vmem:[#allocation11 + $0x1f0] sm:$0xff]  ;;  %v5516_v46 = vld [vmem:[#allocation11 + $0x148] sm:$0xff] }
 0x44f   : > { %2007 = vmatmul.mubr.f32.vlgmr.msra.gmra.mxu1 %v5400_v47  ;;  %3707 = vmatmul.mubr.f32.vlgmr.msra.gmra.mxu0 %v5400_v47 }
 0x450   : > { %2142 = vmatpush1.msra.mxu1 %v5404_v48  ;;  %2213 = vmatpush1.msra.mxu0 %v5407_v49 }
 0x451   : > { %2143 = vmatprep.subr.mxu1 %v5410_v56  ;;  %2214 = vmatprep.subr.mxu0 %v5413_v50 }
 0x452   : > { %2144 = vmatpush1.msra.mxu1 %v5416_v51  ;;  %2215 = vmatpush1.msra.mxu0 %v5419_v52 }
 0x453   : > { %2145 = vmatprep.subr.mxu1 %v5422_v1  ;;  %2216 = vmatprep.subr.mxu0 %v5425_v30 }
 0x454   : > { %2146 = vmatpush1.msra.mxu1 %v5428_v10  ;;  %2217 = vmatpush1.msra.mxu0 %v5431_v62 }
 0x455   : > { %2147 = vmatprep.subr.mxu1 %v5434_v13  ;;  %2218 = vmatprep.subr.mxu0 %v5437_v16 }
 0x456   : > { %2148 = vmatpush1.msra.mxu1 %v5440_v17  ;;  %2219 = vmatpush1.msra.mxu0 %v5443_v19 }
 0x457   : > { %2181 = vmatprep.mubr.f32.mxu1 %v6363_v8  ;;  %2252 = vmatprep.mubr.f32.mxu0 %v6363_v8 }
 0x458   : > { %3709 = vmatprep.subr.mxu1 %v6363_v8  ;;  %2339 = vmatprep.subr.mxu0 %v5449_v21 }
 0x50f   : > { %v2008_v22 = vpop.f32.mrf.mxu1  ;;  %v2079_v23 = vpop.f32.mrf.mxu0 }
 0x510   : > { %v2009_v24 = vadd.f32 %v2008_v22, %v5220_v18  ;;  %v2080_v12 = vadd.f32 %v2079_v23, %v5229_v27  ;;  %v5519_v22 = vld [vmem:[#allocation11 + $0x1d8] sm:$0xff]  ;;  %v5522_v23 = vld [vmem:[#allocation11 + $0x140] sm:$0xff] }
 0x511   : > { %v2010_v25 = vpop.f32.mrf.mxu1  ;;  %v3708_v26 = vpop.f32.mrf.mxu0 }
 0x512   : > { %v2011_v28 = vadd.f32 %v2010_v25, %v5224_v20  ;;  %v2083_v14 = vmul.f32 %v2009_v24, %v1540_v31  ;;  %v5525_v24 = vld [vmem:[#allocation11 + $0x1d0] sm:$0xff]  ;;  %v5528_v25 = vld [vmem:[#allocation11 + $0x128] sm:$0xff]  ;;  %v5531_v26 = vld [vmem:[#allocation11 + $0x1b8] sm:$0xff] }
 0x513   : > { %6516 = vst [vmem:[#allocation27_spill] sm:$0xff] %v5528_v25  ;;  %6517 = vst [vmem:[#allocation28_spill] sm:$0xff] %v5531_v26  ;;  %v5537_v31 = vld [vmem:[#allocation11 + $0x1b0] sm:$0xff] }
 0x514   : > { %v2084_v9 = vmul.f32 %v2011_v28, %v5392_v61  ;;  %v5534_v28 = vld [vmem:[#allocation11 + $0x120] sm:$0xff]  ;;  %6519 = vst [vmem:[#allocation30_spill] sm:$0xff] %v5537_v31 }
 0x515   : > { %6518 = vst [vmem:[#allocation29_spill] sm:$0xff] %v5534_v28 }
 0x516   : > { %v2085_v57 = vadd.f32 %v2084_v9, %v2083_v14  ;;  %v5540_v14 = vld [vmem:[#allocation11 + $0x108] sm:$0xff]  ;;  %v5543_v9 = vld [vmem:[#allocation11 + $0x198] sm:$0xff] }
 0x517   : > { %6520 = vst [vmem:[#allocation31_spill] sm:$0xff] %v5540_v14  ;;  %6521 = vst [vmem:[#allocation32_spill] sm:$0xff] %v5543_v9 }
 0x518   : > { %v2086_v58 = vadd.f32 %v2085_v57, %v2080_v12  ;;  %v5546_v12 = vld [vmem:[#allocation11 + $0x100] sm:$0xff]  ;;  %v5549_v57 = vld [vmem:[#allocation11 + $0x190] sm:$0xff] }
 0x519   : > { %6522 = vst [vmem:[#allocation33_spill] sm:$0xff] %v5546_v12  ;;  %6523 = vst [vmem:[#allocation34_spill] sm:$0xff] %v5549_v57 }
 0x51a   : > { %v3494_v55 = vmul.f32 -1.442695, %v2086_v58  ;;  %3987 = vtanh.f32 %v2086_v58  ;;  %v5552_v58 = vld [vmem:[#allocation11 + $0xe8] sm:$0xff] }
 0x51b   : > { %6524 = vst [vmem:[#allocation35_spill] sm:$0xff] %v5552_v58 }
 0x51c   : > { %3989 = vpow2.f32 %v3494_v55  ;;  %v5555_v55 = vld [vmem:[#allocation11 + $0x178] sm:$0xff] }
 0x51d   : > { %6525 = vst [vmem:[#allocation36_spill] sm:$0xff] %v5555_v55 }
 0x527   : > { %v3988_v4 = vpop.eup %3987 }
 0x528   : > { %2100 = vrot.lane.b32.xlu0 %v3988_v4, %s4516_s21  ;;  %v5558_v4 = vld [vmem:[#allocation11 + $0xe0] sm:$0xff] }
 0x529   : > { %v3990_v54 = vpop.eup %3989  ;;  %6526 = vst [vmem:[#allocation37_spill] sm:$0xff] %v5558_v4 }
 0x52a   : > { %v2090_v63 = vadd.f32 1.0, %v3990_v54  ;;  %v5561_v54 = vld [vmem:[#allocation11 + $0x170] sm:$0xff] }
 0x52b   : > { %6527 = vst [vmem:[#allocation38_spill] sm:$0xff] %v5561_v54 }
 0x52c   : > { %3991 = vrcp.f32 %v2090_v63  ;;  %v5564_v63 = vld [vmem:[#allocation11 + $0xc8] sm:$0xff] }
 0x52d   : > { %6528 = vst [vmem:[#allocation39_spill] sm:$0xff] %v5564_v63 }
 0x539   : > { %v3992_v0 = vpop.eup %3991 }
 0x53a   : > { %2095 = vrot.lane.b32.xlu1 %v3992_v0, %s4515_s20 }
 0x53e   : > { %2106 = vrot.lane.b32.xlu1 %v3992_v0, %s4514_s16 }
 0x59a   : > { %v2101_v53 = vpop.permute.xlu0 %2100 }
 0x59b   : > { %v2103_v6 = vmul.f32 %v3992_v0, %v2101_v53  ;;  %v5567_v0 = vld [vmem:[#allocation11 + $0x158] sm:$0xff]  ;;  %v5570_v53 = vld [vmem:[#allocation11 + $0xc0] sm:$0xff] }
 0x59c   : > { %6529 = vst [vmem:[#allocation40_spill] sm:$0xff] %v5567_v0  ;;  %6530 = vst [vmem:[#allocation41_spill] sm:$0xff] %v5570_v53 }
 0x5ac   : > { %v2096_v61 = vpop.permute.xlu1 %2095 }
 0x5ad   : > { %v2098_v60 = vmul.f32 %v2096_v61, %v5237_v15  ;;  %v5472_v15 = vld [vmem:[#allocation11 + $0x1c8] sm:$0xff]  ;;  %v5573_v61 = vld [vmem:[#allocation11 + $0x150] sm:$0xff] }
 0x5ae   : > { %6531 = vst [vmem:[#allocation42_spill] sm:$0xff] %v5573_v61 }
 0x5af   : > { %v5460_v11 = vadd.f32 %v2103_v6, %v2098_v60  ;;  %v5576_v6 = vld [vmem:[#allocation11 + $0xa8] sm:$0xff]  ;;  %v5579_v60 = vld [vmem:[#allocation11 + $0x138] sm:$0xff] }
 0x5b0   : > { %v2107_v32 = vpop.permute.xlu1 %2106  ;;  %6532 = vst [vmem:[#allocation43_spill] sm:$0xff] %v5576_v6  ;;  %6533 = vst [vmem:[#allocation44_spill] sm:$0xff] %v5579_v60 }
 0x5b1   : > { %3993 = vtanh.f32 %v5460_v11 }
 0x5be   : > { %v3994_v5 = vpop.eup %3993 }
 0x5bf   : > { %v2109_v33 = vmul.f32 %v3994_v5, %v2107_v32  ;;  %v5582_v5 = vld [vmem:[#allocation11 + $0xa0] sm:$0xff]  ;;  %v5585_v32 = vld [vmem:[#allocation11 + $0x130] sm:$0xff] }
 0x5c0   : > { %6534 = vst [vmem:[#allocation45_spill] sm:$0xff] %v5582_v5  ;;  %6535 = vst [vmem:[#allocation46_spill] sm:$0xff] %v5585_v32 }
 0x5c1   : > { %3495 = vmatmul.mubr.msk.f32.vlgmr.msra.gmra.mxu1 %vm967_vm2, %v2109_v33  ;;  %3496 = vmatmul.mubr.msk.f32.vlgmr.msra.gmra.mxu0 %vm967_vm2, %v2109_v33 }
 0x5c2   : > { %3710 = vmatpush3.msra.mxu1 %v5465_v34  ;;  %2340 = vmatpush1.msra.mxu0 %v5468_v35 }
 0x5c3   : > { %3711 = vmatprep.subr.mxu1 %v6363_v8  ;;  %2341 = vmatprep.subr.mxu0 %v5472_v15 }
 0x5c4   : > { %3712 = vmatpush3.msra.mxu1 %v5475_v36  ;;  %2342 = vmatpush1.msra.mxu0 %v5478_v3 }
 0x5c5   : > { %3713 = vmatprep.subr.mxu1 %v6363_v8  ;;  %2343 = vmatprep.subr.mxu0 %v5482_v37 }
 0x5c6   : > { %3714 = vmatpush3.msra.mxu1 %v5485_v38  ;;  %2344 = vmatpush1.msra.mxu0 %v5488_v39 }
 0x5c7   : > { %3715 = vmatprep.subr.mxu1 %v6363_v8  ;;  %2345 = vmatprep.subr.mxu0 %v5492_v59 }
 0x5c8   : > { %3716 = vmatpush3.msra.mxu1 %v5495_v40  ;;  %3717 = vmatprep.mubr.msk.f32.mxu1 %vm4513_vm3, %v6363_v8 }
 0x5c9   : > { %2346 = vmatpush1.msra.mxu0 %v5500_v41  ;;  %3718 = vmatmul.mubr.msk.f32.vlgmr.msra.gmra.mxu1 %vm967_vm2, %v2109_v33  ;;  %v5588_v33 = vld [vmem:[#allocation11 + $0x88] sm:$0xff] }
 0x5ca   : > { %2347 = vmatprep.subr.mxu0 %v5504_v42  ;;  %2410 = vmatprep.subr.mxu1 %v5507_v43  ;;  %6536 = vst [vmem:[#allocation47_spill] sm:$0xff] %v5588_v33 }
 0x5cb   : > { %2348 = vmatpush1.msra.mxu0 %v5510_v44  ;;  %2411 = vmatpush1.msra.mxu1 %v5513_v7 }
 0x5cc   : > { %2349 = vmatprep.subr.mxu0 %v5516_v46  ;;  %2412 = vmatprep.subr.mxu1 %v5519_v22 }
 0x5cd   : > { %2350 = vmatpush1.msra.mxu0 %v5522_v23  ;;  %2413 = vmatpush1.msra.mxu1 %v5525_v24 }
 0x5ce   : > { %2351 = vmatprep.subr.mxu0 %v5528_v25  ;;  %2414 = vmatprep.subr.mxu1 %v5531_v26 }
 0x5cf   : > { %2352 = vmatpush1.msra.mxu0 %v5534_v28  ;;  %2415 = vmatpush1.msra.mxu1 %v5537_v31 }
 0x5d0   : > { %2353 = vmatprep.subr.mxu0 %v5540_v14  ;;  %2416 = vmatprep.subr.mxu1 %v5543_v9  ;;  %v2112_v9 = vld [vmem:[#allocation2 + $0x30] sm:$0xff] }
 0x5d1   : > { %2354 = vmatpush1.msra.mxu0 %v5546_v12  ;;  %2417 = vmatpush1.msra.mxu1 %v5549_v57 }
 0x5d2   : > { %2355 = vmatprep.subr.mxu0 %v5552_v58  ;;  %2418 = vmatprep.subr.mxu1 %v5555_v55 }
 0x5d3   : > { %2356 = vmatpush1.msra.mxu0 %v5558_v4  ;;  %2419 = vmatpush1.msra.mxu1 %v5561_v54 }
 0x5d4   : > { %2357 = vmatprep.subr.mxu0 %v5564_v63  ;;  %2420 = vmatprep.subr.mxu1 %v5567_v0  ;;  %v2111_v63 = vld [vmem:[#allocation2 + $0x28] sm:$0xff] }
 0x5d5   : > { %2358 = vmatpush1.msra.mxu0 %v5570_v53  ;;  %2421 = vmatpush1.msra.mxu1 %v5573_v61  ;;  %v5591_v61 = vld [vmem:[#allocation11 + $0x118] sm:$0xff] }
 0x5d6   : > { %2359 = vmatprep.subr.mxu0 %v5576_v6  ;;  %2422 = vmatprep.subr.mxu1 %v5579_v60  ;;  %6537 = vst [vmem:[#allocation48_spill] sm:$0xff] %v5591_v61  ;;  %v5594_v6 = vld [vmem:[#allocation11 + $0x80] sm:$0xff]  ;;  %v5597_v60 = vld [vmem:[#allocation11 + $0x110] sm:$0xff] }
 0x5d7   : > { %2360 = vmatpush1.msra.mxu0 %v5582_v5  ;;  %2423 = vmatpush1.msra.mxu1 %v5585_v32  ;;  %6538 = vst [vmem:[#allocation49_spill] sm:$0xff] %v5594_v6  ;;  %6539 = vst [vmem:[#allocation50_spill] sm:$0xff] %v5597_v60  ;;  %v5600_v5 = vld [vmem:[#allocation11 + $0x68] sm:$0xff]  ;;  %v5603_v32 = vld [vmem:[#allocation11 + $0xf8] sm:$0xff] }
 0x5d8   : > { %2361 = vmatprep.subr.mxu0 %v5588_v33  ;;  %2424 = vmatprep.subr.mxu1 %v5591_v61  ;;  %6540 = vst [vmem:[#allocation51_spill] sm:$0xff] %v5600_v5  ;;  %6541 = vst [vmem:[#allocation52_spill] sm:$0xff] %v5603_v32  ;;  %v5606_v33 = vld [vmem:[#allocation11 + $0x60] sm:$0xff]  ;;  %v5609_v61 = vld [vmem:[#allocation11 + $0xf0] sm:$0xff] }
 0x5d9   : > { %2362 = vmatpush1.msra.mxu0 %v5594_v6  ;;  %2425 = vmatpush1.msra.mxu1 %v5597_v60  ;;  %6542 = vst [vmem:[#allocation53_spill] sm:$0xff] %v5606_v33  ;;  %6543 = vst [vmem:[#allocation54_spill] sm:$0xff] %v5609_v61  ;;  %v5612_v6 = vld [vmem:[#allocation11 + $0x48] sm:$0xff]  ;;  %v5615_v60 = vld [vmem:[#allocation11 + $0xd8] sm:$0xff] }
 0x5da   : > { %2363 = vmatprep.subr.mxu0 %v5600_v5  ;;  %2426 = vmatprep.subr.mxu1 %v5603_v32  ;;  %6544 = vst [vmem:[#allocation55_spill] sm:$0xff] %v5612_v6  ;;  %6545 = vst [vmem:[#allocation56_spill] sm:$0xff] %v5615_v60  ;;  %v5618_v5 = vld [vmem:[#allocation11 + $0x40] sm:$0xff]  ;;  %v5621_v32 = vld [vmem:[#allocation11 + $0xd0] sm:$0xff] }
 0x5db   : > { %2364 = vmatpush1.msra.mxu0 %v5606_v33  ;;  %2427 = vmatpush1.msra.mxu1 %v5609_v61  ;;  %6546 = vst [vmem:[#allocation57_spill] sm:$0xff] %v5618_v5  ;;  %6547 = vst [vmem:[#allocation58_spill] sm:$0xff] %v5621_v32  ;;  %v5624_v33 = vld [vmem:[#allocation11 + $0x28] sm:$0xff]  ;;  %v5627_v61 = vld [vmem:[#allocation11 + $0xb8] sm:$0xff] }
 0x5dc   : > { %2365 = vmatprep.subr.mxu0 %v5612_v6  ;;  %2428 = vmatprep.subr.mxu1 %v5615_v60  ;;  %6548 = vst [vmem:[#allocation59_spill] sm:$0xff] %v5624_v33  ;;  %6549 = vst [vmem:[#allocation60_spill] sm:$0xff] %v5627_v61  ;;  %v5630_v6 = vld [vmem:[#allocation11 + $0x20] sm:$0xff]  ;;  %v5633_v60 = vld [vmem:[#allocation11 + $0xb0] sm:$0xff] }
 0x5dd   : > { %2366 = vmatpush1.msra.mxu0 %v5618_v5  ;;  %2429 = vmatpush1.msra.mxu1 %v5621_v32  ;;  %6550 = vst [vmem:[#allocation61_spill] sm:$0xff] %v5630_v6  ;;  %6551 = vst [vmem:[#allocation62_spill] sm:$0xff] %v5633_v60  ;;  %v5636_v5 = vld [vmem:[#allocation11 + $0x8] sm:$0xff]  ;;  %v5639_v32 = vld [vmem:[#allocation11 + $0x98] sm:$0xff] }
 0x5de   : > { %2367 = vmatprep.subr.mxu0 %v5624_v33  ;;  %2430 = vmatprep.subr.mxu1 %v5627_v61  ;;  %6552 = vst [vmem:[#allocation63_spill] sm:$0xff] %v5636_v5  ;;  %6553 = vst [vmem:[#allocation64_spill] sm:$0xff] %v5639_v32  ;;  %v5642_v33 = vld [vmem:[#allocation11] sm:$0xff]  ;;  %v5646_v61 = vld [vmem:[#allocation11 + $0x90] sm:$0xff] }
 0x5df   : > { %2368 = vmatpush1.msra.mxu0 %v5630_v6  ;;  %2431 = vmatpush1.msra.mxu1 %v5633_v60  ;;  %6554 = vst [vmem:[#allocation65_spill] sm:$0xff] %v5642_v33  ;;  %6555 = vst [vmem:[#allocation66_spill] sm:$0xff] %v5646_v61  ;;  %v5650_v60 = vld [vmem:[#allocation11 + $0x78] sm:$0xff]  ;;  %v5666_v6 = vld [vmem:[#allocation11 + $0x50] sm:$0xff] }
 0x5e0   : > { %2369 = vmatprep.subr.mxu0 %v5636_v5  ;;  %2432 = vmatprep.subr.mxu1 %v5639_v32  ;;  %6556 = vst [vmem:[#allocation73_spill] sm:$0xff] %v5650_v60  ;;  %v5654_v5 = vld [vmem:[#allocation11 + $0x70] sm:$0xff]  ;;  %6561 = vst [vmem:[#allocation69_spill] sm:$0xff] %v5666_v6 }
 0x5e1   : > { %2370 = vmatpush1.msra.mxu0 %v5642_v33  ;;  %2403 = vmatprep.mubr.f32.mxu0 %v6363_v8  ;;  %6557 = vst [vmem:[#allocation67_spill] sm:$0xff] %v5654_v5  ;;  %v5657_v32 = vld [vmem:[#allocation12 + $0x170] sm:$0xff]  ;;  %v5660_v33 = vld [vmem:[#allocation11 + $0x58] sm:$0xff] }
 0x5e2   : > { %2433 = vmatpush1.msra.mxu1 %v5646_v61  ;;  %2404 = vmatmul.mubr.f32.vlgmr.msra.gmra.mxu0 %v5400_v47  ;;  %6558 = vst [vmem:[#allocation74_spill] sm:$0xff] %v5657_v32  ;;  %6559 = vst [vmem:[#allocation68_spill] sm:$0xff] %v5660_v33  ;;  %v5663_v61 = vld [vmem:[#allocation12 + $0x168] sm:$0xff] }
 0x5e3   : > { %2434 = vmatprep.subr.mxu1 %v5650_v60  ;;  %2474 = vmatprep.mubr.f32.mxu1 %v6363_v8  ;;  %6560 = vst [vmem:[#allocation76_spill] sm:$0xff] %v5663_v61  ;;  %v5669_v60 = vld [vmem:[#allocation12 + $0x158] sm:$0xff] }
 0x5e4   : > { %2435 = vmatpush1.msra.mxu1 %v5654_v5  ;;  %2515 = vmatprep.subr.mxu0 %v5657_v32  ;;  %6562 = vst [vmem:[#allocation77_spill] sm:$0xff] %v5669_v60  ;;  %v5672_v5 = vld [vmem:[#allocation11 + $0x38] sm:$0xff]  ;;  %v5675_v32 = vld [vmem:[#allocation12 + $0x150] sm:$0xff] }
 0x5e5   : > { %2436 = vmatprep.subr.mxu1 %v5660_v33  ;;  %2516 = vmatpush1.msra.mxu0 %v5663_v61  ;;  %6563 = vst [vmem:[#allocation70_spill] sm:$0xff] %v5672_v5  ;;  %6564 = vst [vmem:[#allocation79_spill] sm:$0xff] %v5675_v32  ;;  %v5678_v33 = vld [vmem:[#allocation11 + $0x30] sm:$0xff]  ;;  %v5681_v61 = vld [vmem:[#allocation12 + $0x140] sm:$0xff] }
 0x5e6   : > { %2437 = vmatpush1.msra.mxu1 %v5666_v6  ;;  %2517 = vmatprep.subr.mxu0 %v5669_v60  ;;  %6565 = vst [vmem:[#allocation71_spill] sm:$0xff] %v5678_v33  ;;  %6566 = vst [vmem:[#allocation80_spill] sm:$0xff] %v5681_v61  ;;  %v5684_v6 = vld [vmem:[#allocation11 + $0x18] sm:$0xff] }
 0x5e7   : > { %2438 = vmatprep.subr.mxu1 %v5672_v5  ;;  %2518 = vmatpush1.msra.mxu0 %v5675_v32  ;;  %6567 = vst [vmem:[#allocation72_spill] sm:$0xff] %v5684_v6  ;;  %v5687_v60 = vld [vmem:[#allocation12 + $0x138] sm:$0xff]  ;;  %v5690_v5 = vld [vmem:[#allocation11 + $0x10] sm:$0xff]  ;;  %v5693_v32 = vld [vmem:[#allocation12 + $0x128] sm:$0xff] }
 0x5e8   : > { %2439 = vmatpush1.msra.mxu1 %v5678_v33  ;;  %2519 = vmatprep.subr.mxu0 %v5681_v61  ;;  %6568 = vst [vmem:[#allocation82_spill] sm:$0xff] %v5687_v60  ;;  %6569 = vst [vmem:[#allocation75_spill] sm:$0xff] %v5690_v5  ;;  %v5698_v61 = vld [vmem:[#allocation12 + $0x178] sm:$0xff] }
 0x5e9   : > { %2440 = vmatprep.subr.mxu1 %v5684_v6  ;;  %2520 = vmatpush1.msra.mxu0 %v5687_v60  ;;  %6570 = vst [vmem:[#allocation83_spill] sm:$0xff] %v5693_v32  ;;  %6571 = vst [vmem:[#allocation85_spill] sm:$0xff] %v5698_v61  ;;  %v5701_v6 = vld [vmem:[#allocation12 + $0x120] sm:$0xff]  ;;  %v5705_v60 = vld [vmem:[#allocation12 + $0x110] sm:$0xff] }
 0x5ea   : > { %2441 = vmatpush1.msra.mxu1 %v5690_v5  ;;  %2521 = vmatprep.subr.mxu0 %v5693_v32  ;;  %6572 = vst [vmem:[#allocation78_spill] sm:$0xff] %v5701_v6  ;;  %6573 = vst [vmem:[#allocation86_spill] sm:$0xff] %v5705_v60  ;;  %v5708_v5 = vld [vmem:[#allocation12 + $0x160] sm:$0xff]  ;;  %v5721_v32 = vld [vmem:[#allocation12 + $0xf0] sm:$0xff] }
 0x5eb   : > { %2475 = vmatmul.mubr.f32.vlgmr.msra.gmra.mxu1 %v5400_v47  ;;  %3720 = vmatprep.subr.mxu1 %v6363_v8  ;;  %6574 = vst [vmem:[#allocation88_spill] sm:$0xff] %v5708_v5  ;;  %v5711_v47 = vld [vmem:[#allocation12 + $0x108] sm:$0xff]  ;;  %6578 = vst [vmem:[#allocation84_spill] sm:$0xff] %v5721_v32 }
 0x5ec   : > { %3721 = vmatpush3.msra.mxu1 %v5698_v61  ;;  %2522 = vmatpush1.msra.mxu0 %v5701_v6  ;;  %6575 = vst [vmem:[#allocation81_spill] sm:$0xff] %v5711_v47  ;;  %v5715_v61 = vld [vmem:[#allocation12 + $0xf8] sm:$0xff]  ;;  %v5718_v6 = vld [vmem:[#allocation12 + $0x148] sm:$0xff] }
 0x5ed   : > { %3722 = vmatprep.subr.mxu1 %v6363_v8  ;;  %2523 = vmatprep.subr.mxu0 %v5705_v60  ;;  %6576 = vst [vmem:[#allocation89_spill] sm:$0xff] %v5715_v61  ;;  %6577 = vst [vmem:[#allocation91_spill] sm:$0xff] %v5718_v6  ;;  %v5731_v60 = vld [vmem:[#allocation12 + $0xd8] sm:$0xff] }
 0x5ee   : > { %3723 = vmatpush3.msra.mxu1 %v5708_v5  ;;  %2524 = vmatpush1.msra.mxu0 %v5711_v47  ;;  %v5725_v5 = vld [vmem:[#allocation12 + $0xe0] sm:$0xff]  ;;  %v5728_v47 = vld [vmem:[#allocation12 + $0x130] sm:$0xff]  ;;  %6581 = vst [vmem:[#allocation87_spill] sm:$0xff] %v5731_v60 }
 0x5ef   : > { %3724 = vmatprep.subr.mxu1 %v6363_v8  ;;  %2525 = vmatprep.subr.mxu0 %v5715_v61  ;;  %6579 = vst [vmem:[#allocation92_spill] sm:$0xff] %v5725_v5  ;;  %6580 = vst [vmem:[#allocation94_spill] sm:$0xff] %v5728_v47  ;;  %v5741_v61 = vld [vmem:[#allocation12 + $0xc0] sm:$0xff] }
 0x5f0   : > { %3725 = vmatpush3.msra.mxu1 %v5718_v6  ;;  %2526 = vmatpush1.msra.mxu0 %v5721_v32  ;;  %v5735_v6 = vld [vmem:[#allocation12 + $0xc8] sm:$0xff]  ;;  %v5738_v32 = vld [vmem:[#allocation12 + $0x118] sm:$0xff]  ;;  %6584 = vst [vmem:[#allocation90_spill] sm:$0xff] %v5741_v61 }
 0x5f1   : > { %3726 = vmatprep.subr.mxu1 %v6363_v8  ;;  %2527 = vmatprep.subr.mxu0 %v5725_v5  ;;  %6582 = vst [vmem:[#allocation95_spill] sm:$0xff] %v5735_v6  ;;  %6583 = vst [vmem:[#allocation97_spill] sm:$0xff] %v5738_v32  ;;  %v5751_v5 = vld [vmem:[#allocation12 + $0xa8] sm:$0xff] }
 0x5f2   : > { %3727 = vmatpush3.msra.mxu1 %v5728_v47  ;;  %2528 = vmatpush1.msra.mxu0 %v5731_v60  ;;  %v5745_v47 = vld [vmem:[#allocation12 + $0xb0] sm:$0xff]  ;;  %v5748_v60 = vld [vmem:[#allocation12 + $0x100] sm:$0xff]  ;;  %6587 = vst [vmem:[#allocation93_spill] sm:$0xff] %v5751_v5 }
 0x5f3   : > { %3728 = vmatprep.subr.mxu1 %v6363_v8  ;;  %2529 = vmatprep.subr.mxu0 %v5735_v6  ;;  %6585 = vst [vmem:[#allocation98_spill] sm:$0xff] %v5745_v47  ;;  %6586 = vst [vmem:[#allocation100_spill] sm:$0xff] %v5748_v60  ;;  %v5761_v6 = vld [vmem:[#allocation12 + $0x90] sm:$0xff] }
 0x5f4   : > { %3729 = vmatpush3.msra.mxu1 %v5738_v32  ;;  %2530 = vmatpush1.msra.mxu0 %v5741_v61  ;;  %v5755_v32 = vld [vmem:[#allocation12 + $0x98] sm:$0xff]  ;;  %v5758_v61 = vld [vmem:[#allocation12 + $0xe8] sm:$0xff]  ;;  %6590 = vst [vmem:[#allocation96_spill] sm:$0xff] %v5761_v6 }
 0x5f5   : > { %3730 = vmatprep.subr.mxu1 %v6363_v8  ;;  %2531 = vmatprep.subr.mxu0 %v5745_v47  ;;  %6588 = vst [vmem:[#allocation101_spill] sm:$0xff] %v5755_v32  ;;  %6589 = vst [vmem:[#allocation103_spill] sm:$0xff] %v5758_v61  ;;  %v5771_v47 = vld [vmem:[#allocation12 + $0x78] sm:$0xff] }
 0x5f6   : > { %3731 = vmatpush3.msra.mxu1 %v5748_v60  ;;  %2532 = vmatpush1.msra.mxu0 %v5751_v5  ;;  %v5765_v60 = vld [vmem:[#allocation12 + $0x80] sm:$0xff]  ;;  %v5768_v5 = vld [vmem:[#allocation12 + $0xd0] sm:$0xff]  ;;  %6593 = vst [vmem:[#allocation99_spill] sm:$0xff] %v5771_v47 }
 0x5f7   : > { %3732 = vmatprep.subr.mxu1 %v6363_v8  ;;  %2533 = vmatprep.subr.mxu0 %v5755_v32  ;;  %6591 = vst [vmem:[#allocation104_spill] sm:$0xff] %v5765_v60  ;;  %6592 = vst [vmem:[#allocation106_spill] sm:$0xff] %v5768_v5  ;;  %v5781_v32 = vld [vmem:[#allocation12 + $0x60] sm:$0xff] }
 0x5f8   : > { %3733 = vmatpush3.msra.mxu1 %v5758_v61  ;;  %2534 = vmatpush1.msra.mxu0 %v5761_v6  ;;  %v5775_v61 = vld [vmem:[#allocation12 + $0x68] sm:$0xff]  ;;  %v5778_v6 = vld [vmem:[#allocation12 + $0xb8] sm:$0xff]  ;;  %6596 = vst [vmem:[#allocation102_spill] sm:$0xff] %v5781_v32 }
 0x5f9   : > { %3734 = vmatprep.subr.mxu1 %v6363_v8  ;;  %2535 = vmatprep.subr.mxu0 %v5765_v60  ;;  %6594 = vst [vmem:[#allocation107_spill] sm:$0xff] %v5775_v61  ;;  %6595 = vst [vmem:[#allocation109_spill] sm:$0xff] %v5778_v6  ;;  %v5791_v60 = vld [vmem:[#allocation12 + $0x48] sm:$0xff] }
 0x5fa   : > { %3735 = vmatpush3.msra.mxu1 %v5768_v5  ;;  %2536 = vmatpush1.msra.mxu0 %v5771_v47  ;;  %v5785_v5 = vld [vmem:[#allocation12 + $0x50] sm:$0xff]  ;;  %v5788_v47 = vld [vmem:[#allocation12 + $0xa0] sm:$0xff]  ;;  %6599 = vst [vmem:[#allocation105_spill] sm:$0xff] %v5791_v60 }
 0x5fb   : > { %3736 = vmatprep.subr.mxu1 %v6363_v8  ;;  %2537 = vmatprep.subr.mxu0 %v5775_v61  ;;  %6597 = vst [vmem:[#allocation110_spill] sm:$0xff] %v5785_v5  ;;  %6598 = vst [vmem:[#allocation112_spill] sm:$0xff] %v5788_v47  ;;  %v5801_v61 = vld [vmem:[#allocation12 + $0x30] sm:$0xff] }
 0x5fc   : > { %3737 = vmatpush3.msra.mxu1 %v5778_v6  ;;  %2538 = vmatpush1.msra.mxu0 %v5781_v32  ;;  %v5795_v6 = vld [vmem:[#allocation12 + $0x38] sm:$0xff]  ;;  %v5798_v32 = vld [vmem:[#allocation12 + $0x88] sm:$0xff]  ;;  %6602 = vst [vmem:[#allocation108_spill] sm:$0xff] %v5801_v61 }
 0x5fd   : > { %3738 = vmatprep.subr.mxu1 %v6363_v8  ;;  %2539 = vmatprep.subr.mxu0 %v5785_v5  ;;  %6600 = vst [vmem:[#allocation113_spill] sm:$0xff] %v5795_v6  ;;  %6601 = vst [vmem:[#allocation115_spill] sm:$0xff] %v5798_v32  ;;  %v5811_v5 = vld [vmem:[#allocation12 + $0x18] sm:$0xff] }
 0x5fe   : > { %3739 = vmatpush3.msra.mxu1 %v5788_v47  ;;  %2540 = vmatpush1.msra.mxu0 %v5791_v60  ;;  %v5805_v47 = vld [vmem:[#allocation12 + $0x20] sm:$0xff]  ;;  %v5808_v60 = vld [vmem:[#allocation12 + $0x70] sm:$0xff]  ;;  %6605 = vst [vmem:[#allocation111_spill] sm:$0xff] %v5811_v5 }
 0x5ff   : > { %3740 = vmatprep.subr.mxu1 %v6363_v8  ;;  %2541 = vmatprep.subr.mxu0 %v5795_v6  ;;  %6603 = vst [vmem:[#allocation116_spill] sm:$0xff] %v5805_v47  ;;  %6604 = vst [vmem:[#allocation118_spill] sm:$0xff] %v5808_v60  ;;  %v5821_v6 = vld [vmem:[#allocation12] sm:$0xff] }
 0x600   : > { %3741 = vmatpush3.msra.mxu1 %v5798_v32  ;;  %2542 = vmatpush1.msra.mxu0 %v5801_v61  ;;  %v5815_v32 = vld [vmem:[#allocation12 + $0x8] sm:$0xff]  ;;  %v5818_v61 = vld [vmem:[#allocation12 + $0x58] sm:$0xff]  ;;  %6608 = vst [vmem:[#allocation117_spill] sm:$0xff] %v5821_v6 }
 0x601   : > { %3742 = vmatprep.subr.mxu1 %v6363_v8  ;;  %2543 = vmatprep.subr.mxu0 %v5805_v47  ;;  %6606 = vst [vmem:[#allocation119_spill] sm:$0xff] %v5815_v32  ;;  %6607 = vst [vmem:[#allocation114_spill] sm:$0xff] %v5818_v61 }
 0x602   : > { %3743 = vmatpush3.msra.mxu1 %v5808_v60  ;;  %2544 = vmatpush1.msra.mxu0 %v5811_v5  ;;  %v5826_v60 = vld [vmem:[#allocation12 + $0x40] sm:$0xff] }
 0x603   : > { %3744 = vmatprep.subr.mxu1 %v6363_v8  ;;  %2545 = vmatprep.subr.mxu0 %v5815_v32  ;;  %6609 = vst [vmem:[#allocation120_spill] sm:$0xff] %v5826_v60 }
 0x604   : > { %3745 = vmatpush3.msra.mxu1 %v5818_v61  ;;  %2546 = vmatpush1.msra.mxu0 %v5821_v6  ;;  %v5833_v61 = vld [vmem:[#allocation12 + $0x28] sm:$0xff]  ;;  %v5837_v6 = vld [vmem:[#allocation12 + $0x10] sm:$0xff] }
 0x605   : > { %3746 = vmatprep.subr.mxu1 %v6363_v8  ;;  %2579 = vmatprep.mubr.f32.mxu0 %v6363_v8  ;;  %6610 = vst [vmem:[#allocation121_spill] sm:$0xff] %v5833_v61  ;;  %6611 = vst [vmem:[#allocation122_spill] sm:$0xff] %v5837_v6 }
 0x606   : > { %3747 = vmatpush3.msra.mxu1 %v5826_v60  ;;  %3752 = vmatprep.mubr.msk.f32.mxu1 %vm4513_vm3, %v6363_v8 }
 0x607   : > { %3748 = vmatprep.subr.mxu1 %v6363_v8  ;;  %2714 = vmatprep.subr.mxu0 %v5383_v29 }
 0x608   : > { %3749 = vmatpush3.msra.mxu1 %v5833_v61 }
 0x609   : > { %3750 = vmatprep.subr.mxu1 %v6363_v8 }
 0x60a   : > { %3751 = vmatpush3.msra.mxu1 %v5837_v6 }
 0x60b   : > { %2785 = vmatprep.subr.mxu1 %v5389_v2 }
 0x681   : > { %v2183_v60 = vpop.f32.mrf.mxu1  ;;  %v2254_v33 = vpop.f32.mrf.mxu0 }
 0x683   : > { %v2185_v32 = vpop.f32.mrf.mxu1  ;;  %v2256_v53 = vpop.f32.mrf.mxu0 }
 0x684   : > { %v2333_v29 = vcombine.low %v2183_v60, %v2185_v32  ;;  %v2334_v6 = vcombine.low %v2254_v33, %v2256_v53  ;;  %v6632_v33 = vld [vmem:[#allocation47_spill] sm:$0xff] }
 0x686   : > { %v2337_v61 = vadd.f32 %v2333_v29, %v2111_v63  ;;  %v2338_v14 = vadd.f32 %v2334_v6, %v2112_v9  ;;  %v6633_v29 = vld [vmem:[#allocation48_spill] sm:$0xff] }
 0x689   : > { %v5841_v5 = vpop.f32.mrf.mxu1 }
 0x68b   : > { %v3719_v47 = vpop.f32.mrf.mxu1 }
 0x6a2   : > { %v2405_v0 = vpop.f32.mrf.mxu0 }
 0x6a4   : > { %v2407_v54 = vpop.f32.mrf.mxu0 }
 0x6a5   : > { %v2485_v4 = vcombine.low %v2405_v0, %v2407_v54 }
 0x6a7   : > { %v2489_v55 = vadd.f32 %v2485_v4, %v2337_v61 }
 0x6a9   : > { %v3498_v58 = vmul.f32 -1.442695, %v2489_v55 }
 0x6ab   : > { %3995 = vpow2.f32 %v3498_v58  ;;  %v2476_v57 = vpop.f32.mrf.mxu1 }
 0x6ad   : > { %v2478_v12 = vpop.f32.mrf.mxu1 }
 0x6ae   : > { %v2486_v2 = vcombine.low %v2476_v57, %v2478_v12 }
 0x6b0   : > { %v2490_v31 = vadd.f32 %v2486_v2, %v2338_v14  ;;  %v6634_v2 = vld [vmem:[#allocation49_spill] sm:$0xff] }
 0x6b2   : > { %v3499_v28 = vmul.f32 -1.442695, %v2490_v31  ;;  %v2504_v25 = vrot.slane %v2490_v31, 4 }
 0x6b4   : > { %3997 = vpow2.f32 %v3499_v28 }
 0x6b8   : > { %v3996_v47 = vpop.eup %3995 }
 0x6b9   : > { %v2497_v26 = vadd.f32 1.0, %v3996_v47  ;;  %v6635_v47 = vld [vmem:[#allocation50_spill] sm:$0xff] }
 0x6bb   : > { %3999 = vrcp.f32 %v2497_v26 }
 0x6bc   : > { %4001 = vtanh.f32 %v2504_v25 }
 0x6c1   : > { %v3998_v60 = vpop.eup %3997 }
 0x6c2   : > { %v2498_v55 = vadd.f32 1.0, %v3998_v60  ;;  %v6636_v60 = vld [vmem:[#allocation51_spill] sm:$0xff] }
 0x6c4   : > { %4003 = vrcp.f32 %v2498_v55  ;;  %v6640_v55 = vld [vmem:[#allocation55_spill] sm:$0xff] }
 0x6c8   : > { %v4000_v63 = vpop.eup %3999 }
 0x6c9   : > { %v2508_v54 = vcombine.high %v4000_v63, %v4000_v63  ;;  %v4002_v4 = vpop.eup %4001 }
 0x6ca   : > { %v2511_v0 = vmul.f32 %v4002_v4, %v4000_v63  ;;  %v6637_v63 = vld [vmem:[#allocation52_spill] sm:$0xff]  ;;  %v6639_v4 = vld [vmem:[#allocation54_spill] sm:$0xff] }
 0x6cb   : > { %v2510_v58 = vmul.f32 %v2508_v54, %v5397_v45  ;;  %v6638_v54 = vld [vmem:[#allocation53_spill] sm:$0xff] }
 0x6cd   : > { %v5844_v53 = vadd.f32 %v2511_v0, %v2510_v58  ;;  %v6641_v58 = vld [vmem:[#allocation56_spill] sm:$0xff]  ;;  %v6642_v0 = vld [vmem:[#allocation57_spill] sm:$0xff] }
 0x6cf   : > { %4005 = vtanh.f32 %v5844_v53 }
 0x6d1   : > { %v4004_v14 = vpop.eup %4003 }
 0x6dc   : > { %v4006_v9 = vpop.eup %4005 }
 0x6dd   : > { %v5847_v12 = vmul.f32 %v4006_v9, %v4004_v14  ;;  %v6643_v14 = vld [vmem:[#allocation58_spill] sm:$0xff]  ;;  %v6644_v9 = vld [vmem:[#allocation59_spill] sm:$0xff] }
 0x6df   : > { %2580 = vmatmul.mubr.f32.vlgmr.msra.gmra.mxu0 %v5847_v12  ;;  %3753 = vmatmul.mubr.f32.vlgmr.msra.gmra.mxu1 %v5847_v12 }
 0x6e0   : > { %2715 = vmatpush1.msra.mxu0 %v5404_v48  ;;  %2786 = vmatpush1.msra.mxu1 %v5407_v49 }
 0x6e1   : > { %2716 = vmatprep.subr.mxu0 %v5410_v56  ;;  %2787 = vmatprep.subr.mxu1 %v5413_v50 }
 0x6e2   : > { %2717 = vmatpush1.msra.mxu0 %v5416_v51  ;;  %2788 = vmatpush1.msra.mxu1 %v5419_v52  ;;  %v2113_v52 = vld [vmem:[#allocation2 + $0x38] sm:$0xf] }
 0x6e3   : > { %2718 = vmatprep.subr.mxu0 %v5422_v1  ;;  %2789 = vmatprep.subr.mxu1 %v5425_v30 }
 0x6e4   : > { %2719 = vmatpush1.msra.mxu0 %v5428_v10  ;;  %2790 = vmatpush1.msra.mxu1 %v5431_v62 }
 0x6e5   : > { %2720 = vmatprep.subr.mxu0 %v5434_v13  ;;  %2791 = vmatprep.subr.mxu1 %v5437_v16 }
 0x6e6   : > { %2721 = vmatpush1.msra.mxu0 %v5440_v17  ;;  %2792 = vmatpush1.msra.mxu1 %v5443_v19 }
 0x6e7   : > { %2754 = vmatprep.mubr.f32.mxu0 %v6363_v8  ;;  %2825 = vmatprep.mubr.f32.mxu1 %v6363_v8 }
 0x6e8   : > { %3755 = vmatprep.subr.mxu0 %v6363_v8  ;;  %2912 = vmatprep.subr.mxu1 %v5449_v21 }
 0x79f   : > { %v2581_v45 = vpop.f32.mrf.mxu0  ;;  %v2652_v48 = vpop.f32.mrf.mxu1 }
 0x7a0   : > { %v2582_v49 = vadd.f32 %v2581_v45, %v5220_v18  ;;  %v2653_v10 = vadd.f32 %v2652_v48, %v5229_v27  ;;  %v6645_v45 = vld [vmem:[#allocation60_spill] sm:$0xff]  ;;  %v6646_v48 = vld [vmem:[#allocation61_spill] sm:$0xff] }
 0x7a1   : > { %v2583_v56 = vpop.f32.mrf.mxu0  ;;  %v3754_v50 = vpop.f32.mrf.mxu1 }
 0x7a2   : > { %v2584_v51 = vadd.f32 %v2583_v56, %v5224_v20  ;;  %v2656_v1 = vmul.f32 %v2582_v49, %v2113_v52  ;;  %v6647_v49 = vld [vmem:[#allocation62_spill] sm:$0xff]  ;;  %v6648_v56 = vld [vmem:[#allocation63_spill] sm:$0xff]  ;;  %v6649_v50 = vld [vmem:[#allocation64_spill] sm:$0xff] }
 0x7a3   : > { %v6651_v52 = vld [vmem:[#allocation66_spill] sm:$0xff] }
 0x7a4   : > { %v2657_v30 = vmul.f32 %v2584_v51, %v5841_v5  ;;  %v6650_v51 = vld [vmem:[#allocation65_spill] sm:$0xff] }
 0x7a6   : > { %v2658_v62 = vadd.f32 %v2657_v30, %v2656_v1  ;;  %v6652_v1 = vld [vmem:[#allocation73_spill] sm:$0xff]  ;;  %v6653_v30 = vld [vmem:[#allocation67_spill] sm:$0xff] }
 0x7a8   : > { %v2659_v13 = vadd.f32 %v2658_v62, %v2653_v10  ;;  %v6654_v10 = vld [vmem:[#allocation74_spill] sm:$0xff]  ;;  %v6655_v62 = vld [vmem:[#allocation68_spill] sm:$0xff] }
 0x7aa   : > { %v3500_v16 = vmul.f32 -1.442695, %v2659_v13  ;;  %4007 = vtanh.f32 %v2659_v13  ;;  %v6656_v13 = vld [vmem:[#allocation76_spill] sm:$0xff] }
 0x7ac   : > { %4009 = vpow2.f32 %v3500_v16  ;;  %v6657_v16 = vld [vmem:[#allocation69_spill] sm:$0xff] }
 0x7b7   : > { %v4008_v17 = vpop.eup %4007 }
 0x7b8   : > { %2673 = vrot.lane.b32.xlu1 %v4008_v17, %s4516_s21  ;;  %v6658_v17 = vld [vmem:[#allocation77_spill] sm:$0xff] }
 0x7b9   : > { %v4010_v19 = vpop.eup %4009 }
 0x7ba   : > { %v2663_v21 = vadd.f32 1.0, %v4010_v19  ;;  %v6659_v19 = vld [vmem:[#allocation70_spill] sm:$0xff] }
 0x7bc   : > { %4011 = vrcp.f32 %v2663_v21  ;;  %v6660_v21 = vld [vmem:[#allocation79_spill] sm:$0xff] }
 0x7c9   : > { %v4012_v25 = vpop.eup %4011 }
 0x7ca   : > { %2668 = vrot.lane.b32.xlu0 %v4012_v25, %s4515_s20 }
 0x7ce   : > { %2679 = vrot.lane.b32.xlu0 %v4012_v25, %s4514_s16 }
 0x82a   : > { %v2674_v26 = vpop.permute.xlu1 %2673 }
 0x82b   : > { %v2676_v31 = vmul.f32 %v4012_v25, %v2674_v26  ;;  %v6661_v25 = vld [vmem:[#allocation71_spill] sm:$0xff]  ;;  %v6662_v26 = vld [vmem:[#allocation80_spill] sm:$0xff] }
 0x83c   : > { %v2669_v28 = vpop.permute.xlu0 %2668 }
 0x83d   : > { %v2671_v57 = vmul.f32 %v2669_v28, %v5460_v11  ;;  %v6612_v11 = vld [vmem:[#allocation27_spill] sm:$0xff]  ;;  %v6663_v28 = vld [vmem:[#allocation72_spill] sm:$0xff] }
 0x83f   : > { %v5877_v61 = vadd.f32 %v2676_v31, %v2671_v57  ;;  %v6664_v31 = vld [vmem:[#allocation82_spill] sm:$0xff]  ;;  %v6665_v57 = vld [vmem:[#allocation75_spill] sm:$0xff] }
 0x840   : > { %v2680_v5 = vpop.permute.xlu0 %2679 }
 0x841   : > { %4013 = vtanh.f32 %v5877_v61 }
 0x84e   : > { %v4014_v6 = vpop.eup %4013 }
 0x84f   : > { %v2682_v32 = vmul.f32 %v4014_v6, %v2680_v5  ;;  %v6666_v6 = vld [vmem:[#allocation83_spill] sm:$0xff]  ;;  %v6667_v5 = vld [vmem:[#allocation85_spill] sm:$0xff] }
 0x851   : > { %3501 = vmatmul.mubr.msk.f32.vlgmr.msra.gmra.mxu0 %vm967_vm2, %v2682_v32  ;;  %3502 = vmatmul.mubr.msk.f32.vlgmr.msra.gmra.mxu1 %vm967_vm2, %v2682_v32 }
 0x852   : > { %3756 = vmatpush3.msra.mxu0 %v5465_v34  ;;  %2913 = vmatpush1.msra.mxu1 %v5468_v35  ;;  %v6613_v34 = vld [vmem:[#allocation28_spill] sm:$0xff]  ;;  %v6614_v35 = vld [vmem:[#allocation29_spill] sm:$0xff] }
 0x853   : > { %3757 = vmatprep.subr.mxu0 %v6363_v8  ;;  %2914 = vmatprep.subr.mxu1 %v5472_v15  ;;  %v6615_v15 = vld [vmem:[#allocation30_spill] sm:$0xff] }
 0x854   : > { %3758 = vmatpush3.msra.mxu0 %v5475_v36  ;;  %2915 = vmatpush1.msra.mxu1 %v5478_v3  ;;  %v6616_v36 = vld [vmem:[#allocation31_spill] sm:$0xff]  ;;  %v6617_v3 = vld [vmem:[#allocation32_spill] sm:$0xff] }
 0x855   : > { %3759 = vmatprep.subr.mxu0 %v6363_v8  ;;  %2916 = vmatprep.subr.mxu1 %v5482_v37  ;;  %v6618_v37 = vld [vmem:[#allocation33_spill] sm:$0xff] }
 0x856   : > { %3760 = vmatpush3.msra.mxu0 %v5485_v38  ;;  %2917 = vmatpush1.msra.mxu1 %v5488_v39  ;;  %v6619_v38 = vld [vmem:[#allocation34_spill] sm:$0xff]  ;;  %v6620_v39 = vld [vmem:[#allocation35_spill] sm:$0xff] }
 0x857   : > { %3761 = vmatprep.subr.mxu0 %v6363_v8  ;;  %2918 = vmatprep.subr.mxu1 %v5492_v59  ;;  %v6621_v59 = vld [vmem:[#allocation36_spill] sm:$0xff] }
 0x858   : > { %3762 = vmatpush3.msra.mxu0 %v5495_v40  ;;  %3763 = vmatprep.mubr.msk.f32.mxu0 %vm4513_vm3, %v6363_v8  ;;  %v6622_v40 = vld [vmem:[#allocation37_spill] sm:$0xff] }
 0x859   : > { %2919 = vmatpush1.msra.mxu1 %v5500_v41  ;;  %3764 = vmatmul.mubr.msk.f32.vlgmr.msra.gmra.mxu0 %vm967_vm2, %v2682_v32  ;;  %v6623_v41 = vld [vmem:[#allocation38_spill] sm:$0xff] }
 0x85a   : > { %2920 = vmatprep.subr.mxu1 %v5504_v42  ;;  %2983 = vmatprep.subr.mxu0 %v5507_v43  ;;  %v6624_v42 = vld [vmem:[#allocation39_spill] sm:$0xff]  ;;  %v6625_v43 = vld [vmem:[#allocation40_spill] sm:$0xff]  ;;  %v6668_v32 = vld [vmem:[#allocation78_spill] sm:$0xff] }
 0x85b   : > { %2921 = vmatpush1.msra.mxu1 %v5510_v44  ;;  %2984 = vmatpush1.msra.mxu0 %v5513_v7  ;;  %v6626_v44 = vld [vmem:[#allocation41_spill] sm:$0xff]  ;;  %v6627_v7 = vld [vmem:[#allocation42_spill] sm:$0xff] }
 0x85c   : > { %2922 = vmatprep.subr.mxu1 %v5516_v46  ;;  %2985 = vmatprep.subr.mxu0 %v5519_v22  ;;  %v6628_v46 = vld [vmem:[#allocation43_spill] sm:$0xff]  ;;  %v6629_v22 = vld [vmem:[#allocation44_spill] sm:$0xff] }
 0x85d   : > { %2923 = vmatpush1.msra.mxu1 %v5522_v23  ;;  %2986 = vmatpush1.msra.mxu0 %v5525_v24  ;;  %v6630_v23 = vld [vmem:[#allocation45_spill] sm:$0xff]  ;;  %v6631_v24 = vld [vmem:[#allocation46_spill] sm:$0xff] }
 0x85e   : > { %2924 = vmatprep.subr.mxu1 %v6612_v11  ;;  %2987 = vmatprep.subr.mxu0 %v6613_v34  ;;  %v6669_v11 = vld [vmem:[#allocation86_spill] sm:$0xff]  ;;  %v6670_v34 = vld [vmem:[#allocation88_spill] sm:$0xff] }
 0x85f   : > { %2925 = vmatpush1.msra.mxu1 %v6614_v35  ;;  %2988 = vmatpush1.msra.mxu0 %v6615_v15  ;;  %v6671_v35 = vld [vmem:[#allocation81_spill] sm:$0xff] }
 0x860   : > { %2926 = vmatprep.subr.mxu1 %v6616_v36  ;;  %2989 = vmatprep.subr.mxu0 %v6617_v3  ;;  %v6672_v15 = vld [vmem:[#allocation89_spill] sm:$0xff]  ;;  %v6673_v36 = vld [vmem:[#allocation91_spill] sm:$0xff]  ;;  %v6675_v3 = vld [vmem:[#allocation92_spill] sm:$0xff] }
 0x861   : > { %2927 = vmatpush1.msra.mxu1 %v6618_v37  ;;  %2990 = vmatpush1.msra.mxu0 %v6619_v38  ;;  %v6676_v37 = vld [vmem:[#allocation94_spill] sm:$0xff]  ;;  %v6677_v38 = vld [vmem:[#allocation87_spill] sm:$0xff] }
 0x862   : > { %2928 = vmatprep.subr.mxu1 %v6620_v39  ;;  %2991 = vmatprep.subr.mxu0 %v6621_v59  ;;  %v6678_v39 = vld [vmem:[#allocation95_spill] sm:$0xff]  ;;  %v6679_v59 = vld [vmem:[#allocation97_spill] sm:$0xff] }
 0x863   : > { %2929 = vmatpush1.msra.mxu1 %v6622_v40  ;;  %2992 = vmatpush1.msra.mxu0 %v6623_v41  ;;  %v6680_v40 = vld [vmem:[#allocation90_spill] sm:$0xff] }
 0x864   : > { %2930 = vmatprep.subr.mxu1 %v6624_v42  ;;  %2993 = vmatprep.subr.mxu0 %v6625_v43  ;;  %v6681_v41 = vld [vmem:[#allocation98_spill] sm:$0xff]  ;;  %v6682_v42 = vld [vmem:[#allocation100_spill] sm:$0xff]  ;;  %v6683_v43 = vld [vmem:[#allocation93_spill] sm:$0xff] }
 0x865   : > { %2931 = vmatpush1.msra.mxu1 %v6626_v44  ;;  %2994 = vmatpush1.msra.mxu0 %v6627_v7  ;;  %v6684_v44 = vld [vmem:[#allocation101_spill] sm:$0xff]  ;;  %v6685_v7 = vld [vmem:[#allocation103_spill] sm:$0xff] }
 0x866   : > { %2932 = vmatprep.subr.mxu1 %v6628_v46  ;;  %2995 = vmatprep.subr.mxu0 %v6629_v22  ;;  %v6686_v46 = vld [vmem:[#allocation96_spill] sm:$0xff] }
 0x867   : > { %2933 = vmatpush1.msra.mxu1 %v6630_v23  ;;  %2996 = vmatpush1.msra.mxu0 %v6631_v24  ;;  %v6687_v22 = vld [vmem:[#allocation104_spill] sm:$0xff]  ;;  %v6688_v23 = vld [vmem:[#allocation106_spill] sm:$0xff]  ;;  %v6689_v24 = vld [vmem:[#allocation99_spill] sm:$0xff] }
 0x868   : > { %2934 = vmatprep.subr.mxu1 %v6632_v33  ;;  %2997 = vmatprep.subr.mxu0 %v6633_v29  ;;  %v6690_v33 = vld [vmem:[#allocation107_spill] sm:$0xff]  ;;  %v6691_v29 = vld [vmem:[#allocation109_spill] sm:$0xff] }
 0x869   : > { %2935 = vmatpush1.msra.mxu1 %v6634_v2  ;;  %2998 = vmatpush1.msra.mxu0 %v6635_v47  ;;  %v6692_v2 = vld [vmem:[#allocation102_spill] sm:$0xff] }
 0x86a   : > { %2936 = vmatprep.subr.mxu1 %v6636_v60  ;;  %2999 = vmatprep.subr.mxu0 %v6637_v63  ;;  %v6693_v47 = vld [vmem:[#allocation110_spill] sm:$0xff]  ;;  %v6694_v60 = vld [vmem:[#allocation112_spill] sm:$0xff]  ;;  %v6695_v63 = vld [vmem:[#allocation105_spill] sm:$0xff] }
 0x86b   : > { %2937 = vmatpush1.msra.mxu1 %v6638_v54  ;;  %3000 = vmatpush1.msra.mxu0 %v6639_v4  ;;  %v6696_v54 = vld [vmem:[#allocation113_spill] sm:$0xff]  ;;  %v6697_v4 = vld [vmem:[#allocation115_spill] sm:$0xff] }
 0x86c   : > { %2938 = vmatprep.subr.mxu1 %v6640_v55  ;;  %3001 = vmatprep.subr.mxu0 %v6641_v58  ;;  %v6698_v55 = vld [vmem:[#allocation108_spill] sm:$0xff] }
 0x86d   : > { %2939 = vmatpush1.msra.mxu1 %v6642_v0  ;;  %3002 = vmatpush1.msra.mxu0 %v6643_v14  ;;  %v6699_v58 = vld [vmem:[#allocation116_spill] sm:$0xff]  ;;  %v6700_v0 = vld [vmem:[#allocation118_spill] sm:$0xff]  ;;  %v6701_v14 = vld [vmem:[#allocation111_spill] sm:$0xff] }
 0x86e   : > { %2940 = vmatprep.subr.mxu1 %v6644_v9  ;;  %3003 = vmatprep.subr.mxu0 %v6645_v45  ;;  %v6702_v9 = vld [vmem:[#allocation119_spill] sm:$0xff]  ;;  %v6703_v45 = vld [vmem:[#allocation114_spill] sm:$0xff] }
 0x86f   : > { %2941 = vmatpush1.msra.mxu1 %v6646_v48  ;;  %3004 = vmatpush1.msra.mxu0 %v6647_v49  ;;  %v6704_v48 = vld [vmem:[#allocation117_spill] sm:$0xff]  ;;  %v6705_v49 = vld [vmem:[#allocation120_spill] sm:$0xff] }
 0x870   : > { %2942 = vmatprep.subr.mxu1 %v6648_v56  ;;  %3005 = vmatprep.subr.mxu0 %v6649_v50  ;;  %v6706_v56 = vld [vmem:[#allocation121_spill] sm:$0xff]  ;;  %v6707_v50 = vld [vmem:[#allocation122_spill] sm:$0xff] }
 0x871   : > { %2943 = vmatpush1.msra.mxu1 %v6650_v51  ;;  %2976 = vmatprep.mubr.f32.mxu1 %v6363_v8 }
 0x872   : > { %3006 = vmatpush1.msra.mxu0 %v6651_v52  ;;  %2977 = vmatmul.mubr.f32.vlgmr.msra.gmra.mxu1 %v5847_v12 }
 0x873   : > { %3007 = vmatprep.subr.mxu0 %v6652_v1  ;;  %3047 = vmatprep.mubr.f32.mxu0 %v6363_v8 }
 0x874   : > { %3008 = vmatpush1.msra.mxu0 %v6653_v30  ;;  %3088 = vmatprep.subr.mxu1 %v6654_v10 }
 0x875   : > { %3009 = vmatprep.subr.mxu0 %v6655_v62  ;;  %3089 = vmatpush1.msra.mxu1 %v6656_v13 }
 0x876   : > { %3010 = vmatpush1.msra.mxu0 %v6657_v16  ;;  %3090 = vmatprep.subr.mxu1 %v6658_v17  ;;  %v2684_v17 = vld [vmem:[#allocation2 + $0x3c] sm:$0xff] }
 0x877   : > { %3011 = vmatprep.subr.mxu0 %v6659_v19  ;;  %3091 = vmatpush1.msra.mxu1 %v6660_v21 }
 0x878   : > { %3012 = vmatpush1.msra.mxu0 %v6661_v25  ;;  %3092 = vmatprep.subr.mxu1 %v6662_v26 }
 0x879   : > { %3013 = vmatprep.subr.mxu0 %v6663_v28  ;;  %3093 = vmatpush1.msra.mxu1 %v6664_v31 }
 0x87a   : > { %3014 = vmatpush1.msra.mxu0 %v6665_v57  ;;  %3094 = vmatprep.subr.mxu1 %v6666_v6 }
 0x87b   : > { %3048 = vmatmul.mubr.f32.vlgmr.msra.gmra.mxu0 %v5847_v12  ;;  %3766 = vmatprep.subr.mxu0 %v6363_v8  ;;  %v6674_v12 = vld [vmem:[#allocation84_spill] sm:$0xff] }
 0x87c   : > { %3767 = vmatpush3.msra.mxu0 %v6667_v5  ;;  %3095 = vmatpush1.msra.mxu1 %v6668_v32  ;;  %v2685_v5 = vld [vmem:[#allocation2 + $0x44] sm:$0xff] }
 0x87d   : > { %3768 = vmatprep.subr.mxu0 %v6363_v8  ;;  %3096 = vmatprep.subr.mxu1 %v6669_v11 }
 0x87e   : > { %3769 = vmatpush3.msra.mxu0 %v6670_v34  ;;  %3097 = vmatpush1.msra.mxu1 %v6671_v35 }
 0x87f   : > { %3770 = vmatprep.subr.mxu0 %v6363_v8  ;;  %3098 = vmatprep.subr.mxu1 %v6672_v15 }
 0x880   : > { %3771 = vmatpush3.msra.mxu0 %v6673_v36  ;;  %3099 = vmatpush1.msra.mxu1 %v6674_v12 }
 0x881   : > { %3772 = vmatprep.subr.mxu0 %v6363_v8  ;;  %3100 = vmatprep.subr.mxu1 %v6675_v3 }
 0x882   : > { %3773 = vmatpush3.msra.mxu0 %v6676_v37  ;;  %3101 = vmatpush1.msra.mxu1 %v6677_v38 }
 0x883   : > { %3774 = vmatprep.subr.mxu0 %v6363_v8  ;;  %3102 = vmatprep.subr.mxu1 %v6678_v39 }
 0x884   : > { %3775 = vmatpush3.msra.mxu0 %v6679_v59  ;;  %3103 = vmatpush1.msra.mxu1 %v6680_v40 }
 0x885   : > { %3776 = vmatprep.subr.mxu0 %v6363_v8  ;;  %3104 = vmatprep.subr.mxu1 %v6681_v41 }
 0x886   : > { %3777 = vmatpush3.msra.mxu0 %v6682_v42  ;;  %3105 = vmatpush1.msra.mxu1 %v6683_v43 }
 0x887   : > { %3778 = vmatprep.subr.mxu0 %v6363_v8  ;;  %3106 = vmatprep.subr.mxu1 %v6684_v44 }
 0x888   : > { %3779 = vmatpush3.msra.mxu0 %v6685_v7  ;;  %3107 = vmatpush1.msra.mxu1 %v6686_v46 }
 0x889   : > { %3780 = vmatprep.subr.mxu0 %v6363_v8  ;;  %3108 = vmatprep.subr.mxu1 %v6687_v22 }
 0x88a   : > { %3781 = vmatpush3.msra.mxu0 %v6688_v23  ;;  %3109 = vmatpush1.msra.mxu1 %v6689_v24 }
 0x88b   : > { %3782 = vmatprep.subr.mxu0 %v6363_v8  ;;  %3110 = vmatprep.subr.mxu1 %v6690_v33 }
 0x88c   : > { %3783 = vmatpush3.msra.mxu0 %v6691_v29  ;;  %3111 = vmatpush1.msra.mxu1 %v6692_v2 }
 0x88d   : > { %3784 = vmatprep.subr.mxu0 %v6363_v8  ;;  %3112 = vmatprep.subr.mxu1 %v6693_v47 }
 0x88e   : > { %3785 = vmatpush3.msra.mxu0 %v6694_v60  ;;  %3113 = vmatpush1.msra.mxu1 %v6695_v63 }
 0x88f   : > { %3786 = vmatprep.subr.mxu0 %v6363_v8  ;;  %3114 = vmatprep.subr.mxu1 %v6696_v54 }
 0x890   : > { %3787 = vmatpush3.msra.mxu0 %v6697_v4  ;;  %3115 = vmatpush1.msra.mxu1 %v6698_v55 }
 0x891   : > { %3788 = vmatprep.subr.mxu0 %v6363_v8  ;;  %3116 = vmatprep.subr.mxu1 %v6699_v58 }
 0x892   : > { %3789 = vmatpush3.msra.mxu0 %v6700_v0  ;;  %3117 = vmatpush1.msra.mxu1 %v6701_v14 }
 0x893   : > { %3790 = vmatprep.subr.mxu0 %v6363_v8  ;;  %3118 = vmatprep.subr.mxu1 %v6702_v9 }
 0x894   : > { %3791 = vmatpush3.msra.mxu0 %v6703_v45  ;;  %3119 = vmatpush1.msra.mxu1 %v6704_v48 }
 0x895   : > { %3792 = vmatprep.subr.mxu0 %v6363_v8  ;;  %3152 = vmatprep.mubr.f32.mxu1 %v6363_v8 }
 0x896   : > { %3793 = vmatpush3.msra.mxu0 %v6705_v49  ;;  %3798 = vmatprep.mubr.msk.f32.mxu0 %vm4513_vm3, %v6363_v8 }
 0x897   : > { %3794 = vmatprep.subr.mxu0 %v6363_v8 }
 0x898   : > { %3795 = vmatpush3.msra.mxu0 %v6706_v56 }
 0x899   : > { %3796 = vmatprep.subr.mxu0 %v6363_v8 }
 0x89a   : > { %3797 = vmatpush3.msra.mxu0 %v6707_v50 }
 0x911   : > { %v2756_v51 = vpop.f32.mrf.mxu0  ;;  %v2827_v10 = vpop.f32.mrf.mxu1 }
 0x913   : > { %v2758_v52 = vpop.f32.mrf.mxu0  ;;  %v2829_v62 = vpop.f32.mrf.mxu1 }
 0x914   : > { %v2906_v13 = vcombine.low %v2756_v51, %v2758_v52  ;;  %v2907_v57 = vcombine.low %v2827_v10, %v2829_v62 }
 0x916   : > { %v2910_v21 = vadd.f32 %v2906_v13, %v2684_v17  ;;  %v2911_v32 = vadd.f32 %v2907_v57, %v2685_v5 }
 0x919   : > { %v2898_v1 = vpop.f32.mrf.mxu0 }
 0x91b   : > { %v3765_v30 = vpop.f32.mrf.mxu0 }
 0x932   : > { %v2978_v16 = vpop.f32.mrf.mxu1 }
 0x934   : > { %v2980_v19 = vpop.f32.mrf.mxu1 }
 0x935   : > { %v3058_v25 = vcombine.low %v2978_v16, %v2980_v19 }
 0x937   : > { %v3062_v26 = vadd.f32 %v3058_v25, %v2910_v21 }
 0x939   : > { %v3504_v28 = vmul.f32 -1.442695, %v3062_v26 }
 0x93b   : > { %4015 = vpow2.f32 %v3504_v28  ;;  %v3049_v31 = vpop.f32.mrf.mxu0 }
 0x93d   : > { %v3051_v8 = vpop.f32.mrf.mxu0 }
 0x93e   : > { %v3059_v6 = vcombine.low %v3049_v31, %v3051_v8 }
 0x940   : > { %v3063_v11 = vadd.f32 %v3059_v6, %v2911_v32 }
 0x942   : > { %v3505_v34 = vmul.f32 -1.442695, %v3063_v11  ;;  %v3077_v36 = vrot.slane %v3063_v11, 4 }
 0x944   : > { %4017 = vpow2.f32 %v3505_v34 }
 0x948   : > { %v4016_v35 = vpop.eup %4015 }
 0x949   : > { %v3070_v15 = vadd.f32 1.0, %v4016_v35 }
 0x94b   : > { %4019 = vrcp.f32 %v3070_v15 }
 0x94c   : > { %4021 = vtanh.f32 %v3077_v36 }
 0x951   : > { %v4018_v12 = vpop.eup %4017 }
 0x952   : > { %v3071_v39 = vadd.f32 1.0, %v4018_v12 }
 0x954   : > { %4023 = vrcp.f32 %v3071_v39 }
 0x958   : > { %v4020_v3 = vpop.eup %4019 }
 0x959   : > { %v3081_v37 = vcombine.high %v4020_v3, %v4020_v3  ;;  %v4022_v38 = vpop.eup %4021 }
 0x95a   : > { %v3084_v40 = vmul.f32 %v4022_v38, %v4020_v3 }
 0x95b   : > { %v3083_v59 = vmul.f32 %v3081_v37, %v5844_v53  ;;  %v2686_v53 = vld [vmem:[#allocation2 + $0x4c] sm:$0xf] }
 0x95d   : > { %v3085_v41 = vadd.f32 %v3084_v40, %v3083_v59 }
 0x95f   : > { %3260 = vst [vmem:[#allocation18] sm:$0xf] %v3085_v41  ;;  %4025 = vtanh.f32 %v3085_v41 }
 0x961   : > { %v4024_v42 = vpop.eup %4023 }
 0x96c   : > { %v4026_v43 = vpop.eup %4025 }
 0x96d   : > { %v3087_v44 = vmul.f32 %v4026_v43, %v4024_v42 }
 0x96f   : > { %3153 = vmatmul.mubr.f32.vlgmr.msra.gmra.mxu1 %v3087_v44  ;;  %3259 = vst [vmem:[#allocation17] sm:$0xf] %v3087_v44  ;;  %3799 = vmatmul.mubr.f32.vlgmr.msra.gmra.mxu0 %v3087_v44 }
 0xa2f   : > { %v3154_v7 = vpop.f32.mrf.mxu1  ;;  %v3225_v46 = vpop.f32.mrf.mxu0 }
 0xa30   : > { %v3155_v22 = vadd.f32 %v3154_v7, %v5220_v18  ;;  %v3226_v47 = vadd.f32 %v3225_v46, %v5229_v27 }
 0xa31   : > { %v3156_v23 = vpop.f32.mrf.mxu1  ;;  %v3800_v24 = vpop.f32.mrf.mxu0 }
 0xa32   : > { %v3157_v33 = vadd.f32 %v3156_v23, %v5224_v20  ;;  %v3229_v29 = vmul.f32 %v3155_v22, %v2686_v53 }
 0xa34   : > { %v3230_v2 = vmul.f32 %v3157_v33, %v2898_v1 }
 0xa36   : > { %v3231_v60 = vadd.f32 %v3230_v2, %v3229_v29 }
 0xa38   : > { %v3232_v63 = vadd.f32 %v3231_v60, %v3226_v47 }
 0xa3a   : > { %v3506_v54 = vmul.f32 -1.442695, %v3232_v63  ;;  %4027 = vtanh.f32 %v3232_v63 }
 0xa3c   : > { %4029 = vpow2.f32 %v3506_v54 }
 0xa47   : > { %v4028_v4 = vpop.eup %4027 }
 0xa48   : > { %3246 = vrot.lane.b32.xlu0 %v4028_v4, %s4516_s21 }
 0xa49   : > { %v4030_v55 = vpop.eup %4029 }
 0xa4a   : > { %v3236_v18 = vadd.f32 1.0, %v4030_v55 }
 0xa4c   : > { %4031 = vrcp.f32 %v3236_v18 }
 0xa59   : > { %v4032_v58 = vpop.eup %4031 }
 0xa5a   : > { %3241 = vrot.lane.b32.xlu1 %v4032_v58, %s4515_s20 }
 0xa5e   : > { %3252 = vrot.lane.b32.xlu1 %v4032_v58, %s4514_s16 }
 0xa5f   : > { %4338 = shalt.err (!%p4335_p8)
}
 0xa60   : > { %3834 = dma.vmem_to_hbm [thread:$0]  (%p6035_p1), %s3310_s13, 64, %s6110_s10, [#allocation19]   ;;  %vm3256_vm4 = vcmask 257024  }
 0xa61   : > { %s4518_s1 = smov [#allocation15]   ;;  %s4519_s23 = smov [#allocation17]  }
 0xa62   : > { %s3283_s22 = sshll.u32 %s4518_s1, 4  ;;  %s3296_s19 = sshll.u32 %s4519_s23, 4  ;;  %s3284_s22 = int_to_ptr.vmem [resolvable:$true] %s3283_s22  ;;  %s3297_s19 = int_to_ptr.vmem [resolvable:$true] %s3296_s19 }
 0xa63   : > { %s4349_s29 = scalar_lea.vmem %s3284_s22, 64  ;;  %p4356_p11 = scmp.lt.s32.totalorder %s3284_s22, %s3284_s22 }
 0xa64   : > { %p4350_p6 = scmp.ne.s32.totalorder %s3284_s22, %s4349_s29  ;;  %p4357_p12 = scmp.lt.s32.totalorder %s4349_s29, %s4349_s29 }
 0xa66   : > { %p4351_p10 = pnand %p4350_p6, %p6035_p1  ;;  %p4358_p13 = por %p4357_p12, %p4356_p11 }
 0xa68   : > { %p4352_p9 = pneg %p4351_p10 }
 0xa6a   : > { %p4359_p0 = pnand %p4358_p13, %p4352_p9 }
 0xaba   : > { %v3247_v20 = vpop.permute.xlu0 %3246 }
 0xabb   : > { %v3249_v0 = vmul.f32 %v4032_v58, %v3247_v20 }
 0xacc   : > { %v3242_v27 = vpop.permute.xlu1 %3241 }
 0xacd   : > { %v3244_v14 = vmul.f32 %v3242_v27, %v5877_v61 }
 0xacf   : > { %v3250_v9 = vadd.f32 %v3249_v0, %v3244_v14 }
 0xad1   : > { %4033 = vtanh.f32 %v3250_v9  ;;  %3258 = vst.msk [vmem:[#allocation15] sm:$0xf] %vm3256_vm4, %v3250_v9 }
 0xad2   : > { %4362 = shalt.err (!%p4359_p0)
}
 0xad3   : > { %3830 = dma.vmem_to_hbm [thread:$0]  (%p6035_p1), %s3284_s22, 64, %s6108_s8, [#allocation16]  }
 0xad4   : > { %s4373_s3 = scalar_lea.vmem %s3297_s19, 64  ;;  %p4380_p3 = scmp.lt.s32.totalorder %s3297_s19, %s3297_s19 }
 0xad5   : > { %p4374_p2 = scmp.ne.s32.totalorder %s3297_s19, %s4373_s3  ;;  %p4381_p4 = scmp.lt.s32.totalorder %s4373_s3, %s4373_s3 }
 0xad7   : > { %p4375_p5 = pnand %p4374_p2, %p6035_p1  ;;  %p4382_p8 = por %p4381_p4, %p4380_p3 }
 0xad9   : > { %p4376_p7 = pneg %p4375_p5 }
 0xadb   : > { %p4383_p6 = pnand %p4382_p8, %p4376_p7 }
 0xadd   : > { %4386 = shalt.err (!%p4383_p6)
}
 0xade   : > { %3832 = dma.vmem_to_hbm [thread:$0]  (%p6035_p1), %s3297_s19, 64, %s6109_s9, [#allocation16]   ;;  %v4034_v61 = vpop.eup %4033  ;;  %v3253_v45 = vpop.permute.xlu1 %3252 }
 0xadf   : > { %s4520_s21 = smov [#allocation14]   ;;  %v3255_v48 = vmul.f32 %v4034_v61, %v3253_v45 }
 0xae0   : > { %s3270_s28 = sshll.u32 %s4520_s21, 4  ;;  %s3271_s28 = int_to_ptr.vmem [resolvable:$true] %s3270_s28 }
 0xae1   : > { %3257 = vst.msk [vmem:[#allocation14] sm:$0xf] %vm3256_vm4, %v3255_v48  ;;  %s4397_s11 = scalar_lea.vmem %s3271_s28, 64  ;;  %p4404_p12 = scmp.lt.s32.totalorder %s3271_s28, %s3271_s28 }
 0xae2   : > { %p4398_p10 = scmp.ne.s32.totalorder %s3271_s28, %s4397_s11  ;;  %p4405_p13 = scmp.lt.s32.totalorder %s4397_s11, %s4397_s11 }
 0xae4   : > { %p4399_p9 = pnand %p4398_p10, %p6035_p1  ;;  %p4406_p0 = por %p4405_p13, %p4404_p12 }
 0xae6   : > { %p4400_p11 = pneg %p4399_p9 }
 0xae8   : > { %p4407_p2 = pnand %p4406_p0, %p4400_p11 }
 0xaea   : > { %4410 = shalt.err (!%p4407_p2)
}
 0xaeb   : > { %3828 = dma.vmem_to_hbm [thread:$0]  (%p6035_p1), %s3271_s28, 64, %s6107_s7, [#allocation5]  }
 0xaec   : > { %4462 = dma.done.wait (%p6035_p1), [#allocation5], 64  }
 0xaed   : > { %4464 = vsyncadd (%p6035_p1), [#allocation5], 4294967232 }
 0xaee   : > { %4466 = dma.done.wait (%p6035_p1), [#allocation16], 128  }
 0xaef   : > { %4468 = vsyncadd (%p6035_p1), [#allocation16], 4294967168 }
 0xaf0   : > { %4470 = dma.done.wait (%p6035_p1), [#allocation19], 64  }
 0xaf1   : > { %4472 = vsyncadd (%p6035_p1), [#allocation19], 4294967232 }
 0xaf2 PF: > { %s30_s18 = sadd.s32 1, %s4495_s18   ;;  %s6710_s13 = smov %s4479_s14 }
 0xaf3   : > { %p27_p5 = scmp.ge.s32.totalorder %s30_s18, 4   ;;  %s6711_s14 = smov %s4483_s15 }
 0xaf4   : > { %s6712_s15 = smov %s4693_s27  ;;  %s6713_s16 = smov %s4491_s17 }
 0xaf5   : > { %s6714_s17 = smov %s6716_s12  ;;  %29 = sbr.rel (!%p27_p5) target bundleno = 15 (0xf), region = 140 }
 0xafa   :  { %3334 = vsyncpa [#allocation4], 1 }
 0xafb   :  { %3336 = vsyncpa [#allocation4 + $0x1], 1 }
 0xafc   :  { %3337 = vsyncpa [#allocation7], 1 }
 0xafd   :  { %3338 = vsyncpa [#allocation10], 1 }
 0xafe   :  { %3339 = vsyncpa [#allocation13], 1 }
 0xaff   :  { %3340 = vsyncpa [#allocation5], 1 }
 0xb00   :  { %3342 = vsyncpa [#allocation5 + $0x1], 1 }
 0xb01   :  { %3343 = vsyncpa [#allocation16], 1 }
 0xb02   :  { %3344 = vsyncpa [#allocation19], 1 }

</bundles_post_ra>
